<compile_context>
chip_gen: v5e
topology: v5e:2x2
jax: 0.10.0
libtpu: 0.0.40
codegen_flags: <defaults>
</compile_context>

<pallas_src>
import jax
import jax.numpy as jnp
from jax.experimental import pallas as pl
from jax.experimental.pallas import tpu as pltpu


_LANE = 128            # lane (last-dim) padding granularity
_BF16_SUBLANE = 16     # one bf16 vreg holds [16, 128] -> row tiles in multiples of 16
_MIB = 1024 * 1024
_VMEM_CAP = 48 * _MIB              # stay well below v7x's 64 MiB physical VMEM
_RESIDENT_WEIGHT_BUDGET = 20 * _MIB  # above this, switch to the K-tiled path


def _round_up(x, m):
    return (x + m - 1) // m * m


# ------------------------------- kernels -----------------------------------

def _gnn_resident_kernel(x_ref, w1_ref, b1_ref, w2_ref, b2_ref, out_ref):
    """logits = relu(x @ W1 + b1) @ W2 + b2 for one row tile (weights resident)."""
    h = jnp.dot(x_ref[...], w1_ref[...], preferred_element_type=jnp.float32)
    h = jnp.maximum(h + b1_ref[...], 0.0)                      # f32 VPU math
    logits = jnp.dot(h.astype(w2_ref.dtype), w2_ref[...],
                     preferred_element_type=jnp.float32)
    out_ref[...] = (logits + b2_ref[...]).astype(out_ref.dtype)


def _gnn_ktiled_kernel(x_ref, w1_ref, b1_ref, w2_ref, b2_ref, out_ref, h_acc):
    """Same math, with the first matmul reduced over a K (=F) grid axis."""
    k = pl.program_id(1)

    @pl.when(k == 0)
    def _():
        h_acc[...] = jnp.zeros_like(h_acc)

    h_acc[...] += jnp.dot(x_ref[...], w1_ref[...],
                          preferred_element_type=jnp.float32)

    @pl.when(k == pl.num_programs(1) - 1)
    def _():
        h = jnp.maximum(h_acc[...] + b1_ref[...], 0.0)
        logits = jnp.dot(h.astype(w2_ref.dtype), w2_ref[...],
                         preferred_element_type=jnp.float32)
        out_ref[...] = (logits + b2_ref[...]).astype(out_ref.dtype)


# ------------------------------- wrapper ------------------------------------

def prepare_gnn_params(params):
    """One-time bf16 cast + lane-dense zero padding of the GNN weights.

    Do this ONCE (at init / checkpoint load) and reuse for every forward call,
    so per-call HBM traffic is just x in and logits out.
    """
    w1, b1, w2, b2 = params["w1"], params["b1"], params["w2"], params["b2"]
    f, h = w1.shape
    c = w2.shape[1]
    fp, hp, cp = _round_up(f, _LANE), _round_up(h, _LANE), _round_up(c, _LANE)
    # NOTE: on v6e/v7x (256-wide MXU) rounding *large* F/H up to multiples of
    # 256 is marginally better; 128 keeps v5e optimal and the padding minimal.

    w1_p = jnp.zeros((fp, hp), jnp.bfloat16).at[:f, :h].set(w1.astype(jnp.bfloat16))
    w2_p = jnp.zeros((hp, cp), jnp.bfloat16).at[:h, :c].set(w2.astype(jnp.bfloat16))
    b1_p = jnp.zeros((1, hp), jnp.float32).at[:, :h].set(b1.astype(jnp.float32))
    b2_p = jnp.zeros((1, cp), jnp.float32).at[:, :c].set(b2.astype(jnp.float32))
    return {
        "w1": w1_p, "b1": b1_p, "w2": w2_p, "b2": b2_p,
        "f": f, "h": h, "c": c, "fp": fp, "hp": hp, "cp": cp,
    }


def gcod_wrapper_forward(x, prepared, *, row_tile=512, force_k_tiling=False):
    """Equivalent of GCODWrapper.forward: returns gnn(x) (bf16 logits).

    The per-sample GCOD parameter uB is deliberately unused, exactly like the
    reference forward.
    """
    n, f = x.shape
    assert f == prepared["f"], "feature dim mismatch with prepared params"
    fp, hp, cp, c = prepared["fp"], prepared["hp"], prepared["cp"], prepared["c"]
    w1_p, b1_p, w2_p, b2_p = (prepared["w1"], prepared["b1"],
                              prepared["w2"], prepared["b2"])

    # Only the lane (F) pad of x remains; skipped when the producer already
    # hands over bf16 with an aligned feature dim.
    if x.dtype == jnp.bfloat16 and f == fp:
        x_p = x
    else:
        x_p = jnp.pad(x.astype(jnp.bfloat16), ((0, 0), (0, fp - f)))

    # Row tile: multiple of 16 (bf16 sublane packing); default 512 keeps the
    # f32 intermediate h bounded and is a multiple of 256 for v6e/v7x MXUs.
    tn = max(_BF16_SUBLANE, _round_up(min(row_tile, n), _BF16_SUBLANE))
    grid_rows = pl.cdiv(n, tn)

    weight_bytes = fp * hp * 2 + hp * cp * 2 + (hp + cp) * 4
    use_ktiled = force_k_tiling or weight_bytes > _RESIDENT_WEIGHT_BUDGET

    cost = pl.CostEstimate(
        flops=2 * n * (fp * hp + hp * cp),
        transcendentals=0,
        bytes_accessed=n * fp * 2 + weight_bytes + n * cp * 2,
    )
    out_shape = jax.ShapeDtypeStruct((n, cp), jnp.bfloat16)

    if not use_ktiled:
        est = (2 * tn * fp * 2            # x tile (bf16), double-buffered
               + 2 * tn * cp * 2          # out tile (bf16), double-buffered
               + weight_bytes             # resident weights, single-buffered
               + tn * hp * 4)             # f32 intermediate h
        vmem_limit = int(min(_VMEM_CAP, max(16 * _MIB, 2 * est)))

        out_p = pl.pallas_call(
            _gnn_resident_kernel,
            out_shape=out_shape,
            grid_spec=pl.GridSpec(
                grid=(grid_rows,),
                in_specs=[
                    pl.BlockSpec((tn, fp), lambda i: (i, 0)),       # x: row-tiled
                    pl.BlockSpec((fp, hp), lambda i: (0, 0),        # W1: resident
                                 pipeline_mode=pl.Buffered(1)),
                    pl.BlockSpec((1, hp), lambda i: (0, 0),         # b1: resident
                                 pipeline_mode=pl.Buffered(1)),
                    pl.BlockSpec((hp, cp), lambda i: (0, 0),        # W2: resident
                                 pipeline_mode=pl.Buffered(1)),
                    pl.BlockSpec((1, cp), lambda i: (0, 0),         # b2: resident
                                 pipeline_mode=pl.Buffered(1)),
                ],
                out_specs=pl.BlockSpec((tn, cp), lambda i: (i, 0)),
            ),
            compiler_params=pltpu.CompilerParams(
                dimension_semantics=("parallel",),   # megacore over row blocks
                vmem_limit_bytes=vmem_limit,
            ),
            cost_estimate=cost,
        )(x_p, w1_p, b1_p, w2_p, b2_p)
    else:
        # K-tiled path: needed when the padded weights can't stay fully VMEM
        # resident (most relevant on v7x's 64 MiB VMEM).
        # TODO(synk): also tile an H grid axis if hp*cp*2 alone outgrows VMEM.
        tk = 256 if fp % 256 == 0 else _LANE        # exact divisor of fp
        grid = (grid_rows, fp // tk)
        est = (2 * tn * tk * 2                      # x tile, double-buffered
               + 2 * tk * hp * 2                    # W1 K-slab, double-buffered
               + 2 * tn * cp * 2                    # out tile, double-buffered
               + hp * cp * 2 + (hp + cp) * 4        # resident W2 / biases
               + tn * hp * 4)                       # f32 accumulator scratch
        vmem_limit = int(min(_VMEM_CAP, max(16 * _MIB, 2 * est)))

        out_p = pl.pallas_call(
            _gnn_ktiled_kernel,
            out_shape=out_shape,
            grid_spec=pltpu.PrefetchScalarGridSpec(
                num_scalar_prefetch=0,
                grid=grid,
                in_specs=[
                    pl.BlockSpec((tn, tk), lambda i, k: (i, k)),    # x
                    pl.BlockSpec((tk, hp), lambda i, k: (k, 0)),    # W1 K-slab
                    pl.BlockSpec((1, hp), lambda i, k: (0, 0),
                                 pipeline_mode=pl.Buffered(1)),     # b1
                    pl.BlockSpec((hp, cp), lambda i, k: (0, 0),
                                 pipeline_mode=pl.Buffered(1)),     # W2
                    pl.BlockSpec((1, cp), lambda i, k: (0, 0),
                                 pipeline_mode=pl.Buffered(1)),     # b2
                ],
                out_specs=pl.BlockSpec((tn, cp), lambda i, k: (i, 0)),
                scratch_shapes=[pltpu.VMEM((tn, hp), jnp.float32)],
            ),
            compiler_params=pltpu.CompilerParams(
                dimension_semantics=("parallel", "arbitrary"),
                vmem_limit_bytes=vmem_limit,
            ),
            cost_estimate=cost,
        )(x_p, w1_p, b1_p, w2_p, b2_p)

    # Strip the class padding (the row axis was never padded).
    return out_p[:, :c] if c != cp else out_p


def init_params(key, in_features, hidden, num_classes, dataset_size):
    k1, k2, k3, k4 = jax.random.split(key, 4)
    return {
        "w1": jax.random.normal(k1, (in_features, hidden), jnp.float32) * 0.1,
        "b1": jax.random.normal(k2, (1, hidden), jnp.float32) * 0.01,
        "w2": jax.random.normal(k3, (hidden, num_classes), jnp.float32) * 0.1,
        "b2": jax.random.normal(k4, (1, num_classes), jnp.float32) * 0.01,
        # GCODWrapper.__init__: self.uB = nn.Parameter(torch.zeros(dataset_size))
        # Kept for parity with the reference module; unused in forward.
        "uB": jnp.zeros((dataset_size,), jnp.float32),
    }


if __name__ == "__main__":
    key = jax.random.PRNGKey(0)
    # Small-but-representative shapes: non-multiples of 128 exercise the lane
    # padding, N/tn = 2 row blocks exercise tiling (and feed both v7x cores),
    # and F > 128 gives the K-tiled path more than one reduction step.
    N, F_IN, HID, C = 1024, 320, 160, 10
    DATASET_SIZE = 2048

    kx, kp = jax.random.split(key)
    x = jax.random.normal(kx, (N, F_IN), jnp.float32)
    params = init_params(kp, F_IN, HID, C, DATASET_SIZE)

    # One-time weight prep (cached and reused across forward calls).
    prepared = prepare_gnn_params(params)

    logits = gcod_wrapper_forward(x, prepared, row_tile=512)
    logits_kt = gcod_wrapper_forward(x, prepared, row_tile=512, force_k_tiling=True)
    jax.block_until_ready((logits, logits_kt))

    # bf16-consistent pure-JAX reference of the same "gnn" forward.
    xb = x.astype(jnp.bfloat16)
    w1b = params["w1"].astype(jnp.bfloat16)
    w2b = params["w2"].astype(jnp.bfloat16)
    h_ref = jnp.maximum(
        jnp.dot(xb, w1b, preferred_element_type=jnp.float32) + params["b1"], 0.0)
    ref = jnp.dot(h_ref.astype(jnp.bfloat16), w2b,
                  preferred_element_type=jnp.float32) + params["b2"]

    assert logits.shape == (N, C) and logits.dtype == jnp.bfloat16
    assert logits_kt.shape == (N, C)
    ok_res = jnp.allclose(logits.astype(jnp.float32), ref, atol=5e-2, rtol=5e-2)
    ok_kt = jnp.allclose(logits_kt.astype(jnp.float32), ref, atol=5e-2, rtol=5e-2)
    assert bool(ok_res), float(jnp.max(jnp.abs(logits.astype(jnp.float32) - ref)))
    assert bool(ok_kt), float(jnp.max(jnp.abs(logits_kt.astype(jnp.float32) - ref)))

    print("KERNEL_OK")
</pallas_src>

<mosaic_0001>
module attributes {stable_mosaic.version = 11 : i64} {
  func.func @_gnn_resident_kernel(%arg0: i32, %arg1: memref<512x384xbf16, #tpu.memory_space<vmem>>, %arg2: memref<384x256xbf16, #tpu.memory_space<vmem>>, %arg3: memref<1x256xf32, #tpu.memory_space<vmem>>, %arg4: memref<256x128xbf16, #tpu.memory_space<vmem>>, %arg5: memref<1x128xf32, #tpu.memory_space<vmem>>, %arg6: memref<512x128xbf16, #tpu.memory_space<vmem>>) attributes {dimension_semantics = [#tpu.dimension_semantics<parallel>], iteration_bounds = array<i64: 2>, scalar_prefetch = 0 : i64, scratch_operands = 0 : i64, tpu.core_type = #tpu.core_type<tc>, window_params = [{transform_indices = @transform_0, window_bounds = array<i64: 512, 384>}, {pipeline_mode = #tpu.pipeline_mode<synchronous>, transform_indices = @transform_1, window_bounds = array<i64: 384, 256>}, {pipeline_mode = #tpu.pipeline_mode<synchronous>, transform_indices = @transform_2, window_bounds = array<i64: 1, 256>}, {pipeline_mode = #tpu.pipeline_mode<synchronous>, transform_indices = @transform_3, window_bounds = array<i64: 256, 128>}, {pipeline_mode = #tpu.pipeline_mode<synchronous>, transform_indices = @transform_4, window_bounds = array<i64: 1, 128>}, {transform_indices = @transform_5, window_bounds = array<i64: 512, 128>}]} {
    %c0 = arith.constant 0 : index
    %c0_0 = arith.constant 0 : index
    %0 = vector.load %arg1[%c0, %c0_0] : memref<512x384xbf16, #tpu.memory_space<vmem>>, vector<512x384xbf16>
    %c0_1 = arith.constant 0 : index
    %c0_2 = arith.constant 0 : index
    %1 = vector.load %arg2[%c0_1, %c0_2] : memref<384x256xbf16, #tpu.memory_space<vmem>>, vector<384x256xbf16>
    %cst = arith.constant dense<0.000000e+00> : vector<512x256xf32>
    %2 = tpu.matmul %0, %1, %cst {dimension_numbers = #tpu.dot_dimension_numbers<[1], [0], [0], [1], [0, 0, 1, 1], [], []>} : vector<512x384xbf16>, vector<384x256xbf16>, vector<512x256xf32> -> vector<512x256xf32>
    %c0_3 = arith.constant 0 : index
    %c0_4 = arith.constant 0 : index
    %3 = vector.load %arg3[%c0_3, %c0_4] : memref<1x256xf32, #tpu.memory_space<vmem>>, vector<1x256xf32>
    %4 = vector.broadcast %3 : vector<1x256xf32> to vector<512x256xf32>
    %5 = arith.addf %2, %4 : vector<512x256xf32>
    %cst_5 = arith.constant 0.000000e+00 : f32
    %6 = vector.broadcast %cst_5 : f32 to vector<512x256xf32>
    %7 = arith.maximumf %5, %6 : vector<512x256xf32>
    %8 = arith.truncf %7 : vector<512x256xf32> to vector<512x256xbf16>
    %c0_6 = arith.constant 0 : index
    %c0_7 = arith.constant 0 : index
    %9 = vector.load %arg4[%c0_6, %c0_7] : memref<256x128xbf16, #tpu.memory_space<vmem>>, vector<256x128xbf16>
    %cst_8 = arith.constant dense<0.000000e+00> : vector<512x128xf32>
    %10 = tpu.matmul %8, %9, %cst_8 {dimension_numbers = #tpu.dot_dimension_numbers<[1], [0], [0], [1], [0, 0, 1, 1], [], []>} : vector<512x256xbf16>, vector<256x128xbf16>, vector<512x128xf32> -> vector<512x128xf32>
    %c0_9 = arith.constant 0 : index
    %c0_10 = arith.constant 0 : index
    %11 = vector.load %arg5[%c0_9, %c0_10] : memref<1x128xf32, #tpu.memory_space<vmem>>, vector<1x128xf32>
    %12 = vector.broadcast %11 : vector<1x128xf32> to vector<512x128xf32>
    %13 = arith.addf %10, %12 : vector<512x128xf32>
    %14 = arith.truncf %13 : vector<512x128xf32> to vector<512x128xbf16>
    %c0_11 = arith.constant 0 : index
    %c0_12 = arith.constant 0 : index
    %15 = vector.load %arg6[%c0_11, %c0_12] : memref<512x128xbf16, #tpu.memory_space<vmem>>, vector<512x128xbf16>
    tpu.vector_store %arg6[%c0_11, %c0_12], %14 {strides = array<i32>} : memref<512x128xbf16, #tpu.memory_space<vmem>>, vector<512x128xbf16>,
    return
  }
  func.func @transform_0(%arg0: i32) -> (i32, i32) {
    %c0_i32 = arith.constant 0 : i32
    %c0_i32_0 = arith.constant 0 : i32
    return %arg0, %c0_i32 : i32, i32
  }
  func.func @transform_1(%arg0: i32) -> (i32, i32) {
    %c0_i32 = arith.constant 0 : i32
    %c0_i32_0 = arith.constant 0 : i32
    %c0_i32_1 = arith.constant 0 : i32
    return %c0_i32, %c0_i32_0 : i32, i32
  }
  func.func @transform_2(%arg0: i32) -> (i32, i32) {
    %c0_i32 = arith.constant 0 : i32
    %c0_i32_0 = arith.constant 0 : i32
    %c0_i32_1 = arith.constant 0 : i32
    return %c0_i32, %c0_i32_0 : i32, i32
  }
  func.func @transform_3(%arg0: i32) -> (i32, i32) {
    %c0_i32 = arith.constant 0 : i32
    %c0_i32_0 = arith.constant 0 : i32
    %c0_i32_1 = arith.constant 0 : i32
    return %c0_i32, %c0_i32_0 : i32, i32
  }
  func.func @transform_4(%arg0: i32) -> (i32, i32) {
    %c0_i32 = arith.constant 0 : i32
    %c0_i32_0 = arith.constant 0 : i32
    %c0_i32_1 = arith.constant 0 : i32
    return %c0_i32, %c0_i32_0 : i32, i32
  }
  func.func @transform_5(%arg0: i32) -> (i32, i32) {
    %c0_i32 = arith.constant 0 : i32
    %c0_i32_0 = arith.constant 0 : i32
    return %arg0, %c0_i32 : i32, i32
  }
}

</mosaic_0001>

<bundles_post_ra>
// kernel: tpu_custom_call.1
= control target key start
LH: loop header
LB: loop body
LE: loop exit
PB: predicated region body
PF: predicated region fallthrough
CT: control target
= control target key end

     0   :  { %s5892_s0 = inlined_call_operand.hbm [shape: bf16[1024,384], index: 0, kind: input, shape index: {}]   ;;  %s5893_s1 = inlined_call_operand.hbm [shape: bf16[384,256], index: 1, kind: input, shape index: {}]   ;;  %s5894_s2 = inlined_call_operand.hbm [shape: f32[1,256], index: 2, kind: input, shape index: {}]   ;;  %s5895_s3 = inlined_call_operand.hbm [shape: bf16[256,128], index: 3, kind: input, shape index: {}]   ;;  %s5896_s4 = inlined_call_operand.vmem [shape: f32[1,128], index: 4, kind: input, shape index: {}]   ;;  %s5897_s5 = inlined_call_operand.hbm [shape: bf16[1024,128], index: 5, kind: output, shape index: {}]  }
   0x1   :  { %5940 = sst [smem:[#allocation103_spill]] %s5893_s1 }
   0x2   :  { %10 = vsyncpa [#allocation3], 0 }
   0x3   :  { %12 = vsyncpa [#allocation3 + $0x1], 0 }
   0x4   :  { %13 = vsyncpa [#allocation6], 0 }
   0x5   :  { %14 = vsyncpa [#allocation9], 0 }
   0x6   :  { %15 = vsyncpa [#allocation4], 0 }
   0x7   :  { %17 = vsyncpa [#allocation4 + $0x1], 0  ;;  %s4491_s18 = smov 0   ;;  %s4493_s19 = smov 0  }
   0x8   :  { %s4495_s20 = smov 0   ;;  %s4497_s21 = smov 0  }
   0x9 LB: > { %s4512_s22 = sadd.s32 4294967295, %s4448_s21   ;;  %s3152_s23 = sadd.s32 4294967294, %s4448_s21   ;;  %s4448_s21 = sphi %s4497_s21, %s6150_s21   ;;  %s4444_s20 = sphi %s4495_s20, %s6149_s20   ;;  %s4440_s19 = sphi %s4493_s19, %s6148_s19   ;;  %s4436_s18 = sphi %s4491_s18, %s6147_s18  }
   0xa   : > { %p43_p0 = scmp.ne.s32.totalorder %s4440_s19, %s4436_s18  ;;  %p44_p1 = scmp.eq.s32.totalorder %s4512_s22, 0 }
   0xb   : > { %p151_p2 = scmp.eq.s32.totalorder %s4512_s22, 1  ;;  %p157_p3 = scmp.eq.s32.totalorder %s3152_s23, 1 }
   0xc   : > { %p4521_p4 = por %p44_p1, %p43_p0  ;;  %p3153_p5 = scmp.ge.s32.totalorder %s4448_s21, 1 }
   0xd   : > { %p4526_p6 = por %p157_p3, %p43_p0  ;;  %p164_p7 = scmp.lt.s32.totalorder %s4448_s21, 3 }
   0xe   : > { %s5943_s1 = sld [smem:[#allocation103_spill]]  ;;  %s4450_s30 = smov [#allocation5]  }
   0xf   : > { %p4534_p8 = pnand %p3153_p5, %p164_p7  ;;  %s177_s6 = sshll.u32 %s4450_s30, 4  ;;  %s178_s6 = int_to_ptr.vmem [resolvable:$true] %s177_s6 }
  0x10   : > { %s190_s10 = sshll.u32 %s5894_s2, 4  ;;  %s4451_s11 = smov 128   ;;  %s191_s10 = int_to_ptr.hbm [resolvable:$true] %s190_s10 }
  0x11   : > { %p4182_p9 = pneg %p4534_p8  ;;  %s4452_s12 = smov 8  }
  0x12   : > { %s4453_s13 = smov [#allocation7]   ;;  %s201_s17 = sshll.u32 %s5895_s3, 4  ;;  %s202_s17 = int_to_ptr.hbm [resolvable:$true] %s201_s17 }
  0x13   : > { %p4542_p10 = pnand %p4182_p9, %p44_p1  ;;  %s192_s14 = sshll.u32 %s4453_s13, 4  ;;  %s193_s14 = int_to_ptr.vmem [resolvable:$true] %s192_s14 }
  0x14   : > { %s175_s28 = sshll.u32 %s5943_s1, 4  ;;  %s4454_s23 = smov [#allocation8]   ;;  %s176_s28 = int_to_ptr.hbm [resolvable:$true] %s175_s28 }
  0x15   : > { %4185 = dma.hbm_to_vmem [thread:$0]  (!%p4542_p10), %s176_s28, 6144, %s178_s6, [#allocation6], %s4451_s11, %s4451_s11, %s4452_s12  }
  0x16   : > { %4188 = dma.hbm_to_vmem [thread:$0]  (!%p4542_p10), %s191_s10, 32, %s193_s14, [#allocation6]  }
  0x17   : > { %s203_s26 = sshll.u32 %s4454_s23, 4  ;;  %s4455_s27 = smov 64   ;;  %s204_s26 = int_to_ptr.vmem [resolvable:$true] %s203_s26 }
  0x18   : > { %s4456_s28 = smov 4   ;;  %s4560_s30 = sadd.s32 1, %s4448_s21  }
  0x19   : > { %4191 = dma.hbm_to_vmem [thread:$0]  (!%p4542_p10), %s202_s17, 2048, %s204_s26, [#allocation9], %s4455_s27, %s4455_s27, %s4456_s28  }
  0x1a   : > { %s27_s6 = ssub.s32 %s4448_s21, %s4560_s30  ;;  %s30_s8 = sadd.s32 1, %s4444_s20 }
  0x1b   : > { %p28_p12 = scmp.eq.s32.totalorder %s27_s6, 0  ;;  %p37_p13 = scmp.ne.s32.totalorder %s4444_s20, %s4440_s19 }
  0x1c   : > { %p38_p0 = scmp.eq.s32.totalorder %s4448_s21, 0  ;;  %p4203_p3 = scmp.lt.s32.totalorder %s4448_s21, 2 }
  0x1d   : > { %s4570_s9 = scalar_select %p28_p12, %s4444_s20, %s30_s8  }
  0x1e   : > { %p39_p5 = por %p38_p0, %p37_p13  ;;  %p4574_p7 = por %p151_p2, %p37_p13 }
  0x1f   : > { %s220_s11 = sand.u32 1, %s4444_s20   ;;  %s4164_s7 = smul.u32 768, %s4448_s21 }
  0x20   : > { %s4163_s12 = smul.u32 768, %s220_s11  ;;  %p4583_p9 = pnand %p4203_p3, %p39_p5 }
  0x21   : > { %s230_s15 = scalar_lea.hbm %s5892_s0, %s4164_s7  ;;  %s221_s27 = scalar_lea.sflag [#allocation3], %s220_s11 }
  0x22   : > { %s231_s17 = sshll.u32 %s230_s15, 4  ;;  %s224_s23 = scalar_lea.vmem [#allocation2], %s4163_s12  ;;  %s232_s17 = int_to_ptr.hbm [resolvable:$true] %s231_s17 }
  0x23   : > { %s233_s26 = sshll.u32 %s224_s23, 4  ;;  %s4344_s28 = sshra.s32 %s232_s17, 4  ;;  %s234_s26 = int_to_ptr.vmem [resolvable:$true] %s233_s26  ;;  %s4345_s28 = int_to_ptr.hbm [resolvable:$true] %s4344_s28 }
  0x24   : > { %s4346_s6 = scalar_lea.hbm %s4345_s28, 768  ;;  %p4348_p10 = pneg %p4583_p9 }
  0x25   : > { %p4347_p2 = scmp.ne.s32.totalorder %s4345_s28, %s4346_s6  ;;  %s4351_s13 = scalar_lea.hbm %s5892_s0, 1536 }
  0x26   : > { %p4352_p0 = scmp.lt.s32.totalorder %s4345_s28, %s5892_s0  ;;  %p4353_p3 = scmp.lt.s32.totalorder %s4351_s13, %s4346_s6 }
  0x27   : > { %p4349_p12 = pnand %p4348_p10, %p4347_p2 }
  0x28   : > { %p4354_p5 = por %p4353_p3, %p4352_p0 }
  0x29   : > { %p4350_p13 = pneg %p4349_p12 }
  0x2b   : > { %p4355_p11 = pnand %p4354_p5, %p4350_p13 }
  0x2d   : > { %4358 = shalt.err (!%p4355_p11)
}
  0x2e   : > { %s4457_s11 = smov 192   ;;  %s4458_s12 = smov 12  }
  0x2f   : > { %4195 = dma.hbm_to_vmem [thread:$0]  (!%p4583_p9), %s232_s17, 12288, %s234_s26, %s221_s27, %s4457_s11, %s4457_s11, %s4458_s12  }
  0x30   : > { %245 = sbr.rel (%p4534_p8) target bundleno = 1394 (0x572), region = 40 }
  0x35   : > { %s4600_s15 = sand.u32 1, %s4440_s19  }
  0x36   : > { %s4165_s1 = smul.u32 768, %s4600_s15  ;;  %s248_s23 = scalar_lea.sflag [#allocation3], %s4600_s15 }
  0x38   : > { %s4604_s28 = scalar_lea.vmem [#allocation2], %s4165_s1 }
  0x39   : > { %4419 = dma.done.wait (%p4521_p4), %s248_s23, 12288  }
  0x3a   : > { %4421 = vsyncadd (%p4521_p4), %s248_s23, 4294955008 }
  0x3b   : > { %4423 = dma.done.wait (%p44_p1), [#allocation6], 6176  }
  0x3c   : > { %4425 = vsyncadd (%p44_p1), [#allocation6], 4294961120 }
  0x3d   : > { %4427 = dma.done.wait (%p44_p1), [#allocation9], 2048  }
  0x3e   : > { %4429 = vsyncadd (%p44_p1), [#allocation9], 4294965248  ;;  %v3608_v0 = vld [vmem:[#allocation5 + $0x70] sm:$0xf]  ;;  %v3922_v1 = vld [vmem:[#allocation5 + $0x74] sm:$0xf0] }
  0x3f   : > { %v3672_v2 = vld [vmem:[#allocation5 + $0xf0] sm:$0xf]  ;;  %v3609_v3 = vor.u32 %v3922_v1, %v3608_v0  ;;  %v3938_v4 = vld [vmem:[#allocation5 + $0xf4] sm:$0xf0]  ;;  %v3600_v9 = vld [vmem:[#allocation5 + $0x60] sm:$0xf] }
  0x40   : > { %v3736_v5 = vld [vmem:[#allocation5 + $0x170] sm:$0xf]  ;;  %v3954_v6 = vld [vmem:[#allocation5 + $0x174] sm:$0xf0]  ;;  %v3673_v7 = vor.u32 %v3938_v4, %v3672_v2  ;;  %v3920_v10 = vld [vmem:[#allocation5 + $0x64] sm:$0xf0] }
  0x41   : > { %v3737_v8 = vor.u32 %v3954_v6, %v3736_v5  ;;  %v3664_v11 = vld [vmem:[#allocation5 + $0xe0] sm:$0xf]  ;;  %1230 = vmatpush.bf16.msra.mxu0 %v3609_v3  ;;  %v3601_v12 = vor.u32 %v3920_v10, %v3600_v9  ;;  %v3936_v13 = vld [vmem:[#allocation5 + $0xe4] sm:$0xf0]  ;;  %v3592_v18 = vld [vmem:[#allocation5 + $0x50] sm:$0xf] }
  0x42   : > { %v3728_v14 = vld [vmem:[#allocation5 + $0x160] sm:$0xf]  ;;  %v3952_v15 = vld [vmem:[#allocation5 + $0x164] sm:$0xf0]  ;;  %1399 = vmatpush.bf16.msra.mxu1 %v3673_v7  ;;  %v3665_v16 = vor.u32 %v3936_v13, %v3664_v11  ;;  %v3918_v19 = vld [vmem:[#allocation5 + $0x54] sm:$0xf0] }
  0x43   : > { %1568 = vmatpush.bf16.msra.mxu2 %v3737_v8  ;;  %v3729_v17 = vor.u32 %v3952_v15, %v3728_v14  ;;  %v3656_v20 = vld [vmem:[#allocation5 + $0xd0] sm:$0xf]  ;;  %v3934_v21 = vld [vmem:[#allocation5 + $0xd4] sm:$0xf0]  ;;  %v3593_v24 = vor.u32 %v3918_v19, %v3592_v18  ;;  %v3584_v27 = vld [vmem:[#allocation5 + $0x40] sm:$0xf] }
  0x44   : > { %v3720_v22 = vld [vmem:[#allocation5 + $0x150] sm:$0xf]  ;;  %v3950_v23 = vld [vmem:[#allocation5 + $0x154] sm:$0xf0]  ;;  %v3657_v25 = vor.u32 %v3934_v21, %v3656_v20  ;;  %v3916_v28 = vld [vmem:[#allocation5 + $0x44] sm:$0xf0] }
  0x45   : > { %1231 = vmatpush.bf16.msra.mxu0 %v3601_v12  ;;  %v3721_v26 = vor.u32 %v3950_v23, %v3720_v22  ;;  %v3648_v29 = vld [vmem:[#allocation5 + $0xc0] sm:$0xf]  ;;  %v3932_v30 = vld [vmem:[#allocation5 + $0xc4] sm:$0xf0]  ;;  %v3585_v33 = vor.u32 %v3916_v28, %v3584_v27  ;;  %v3576_v36 = vld [vmem:[#allocation5 + $0x30] sm:$0xf] }
  0x46   : > { %1400 = vmatpush.bf16.msra.mxu1 %v3665_v16  ;;  %v3712_v31 = vld [vmem:[#allocation5 + $0x140] sm:$0xf]  ;;  %v3948_v32 = vld [vmem:[#allocation5 + $0x144] sm:$0xf0]  ;;  %v3649_v34 = vor.u32 %v3932_v30, %v3648_v29  ;;  %v3914_v37 = vld [vmem:[#allocation5 + $0x34] sm:$0xf0] }
  0x47   : > { %1569 = vmatpush.bf16.msra.mxu2 %v3729_v17  ;;  %v3713_v35 = vor.u32 %v3948_v32, %v3712_v31  ;;  %v3640_v38 = vld [vmem:[#allocation5 + $0xb0] sm:$0xf]  ;;  %v3930_v39 = vld [vmem:[#allocation5 + $0xb4] sm:$0xf0]  ;;  %v3577_v42 = vor.u32 %v3914_v37, %v3576_v36  ;;  %v3568_v45 = vld [vmem:[#allocation5 + $0x20] sm:$0xf] }
  0x48   : > { %v3704_v40 = vld [vmem:[#allocation5 + $0x130] sm:$0xf]  ;;  %v3946_v41 = vld [vmem:[#allocation5 + $0x134] sm:$0xf0]  ;;  %v3641_v43 = vor.u32 %v3930_v39, %v3640_v38  ;;  %v3912_v46 = vld [vmem:[#allocation5 + $0x24] sm:$0xf0] }
  0x49   : > { %1232 = vmatpush.bf16.msra.mxu0 %v3593_v24  ;;  %v3705_v44 = vor.u32 %v3946_v41, %v3704_v40  ;;  %v3632_v47 = vld [vmem:[#allocation5 + $0xa0] sm:$0xf]  ;;  %v3928_v48 = vld [vmem:[#allocation5 + $0xa4] sm:$0xf0]  ;;  %v3569_v51 = vor.u32 %v3912_v46, %v3568_v45  ;;  %v3560_v54 = vld [vmem:[#allocation5 + $0x10] sm:$0xf] }
  0x4a   : > { %1401 = vmatpush.bf16.msra.mxu1 %v3657_v25  ;;  %v3696_v49 = vld [vmem:[#allocation5 + $0x120] sm:$0xf]  ;;  %v3944_v50 = vld [vmem:[#allocation5 + $0x124] sm:$0xf0]  ;;  %v3633_v52 = vor.u32 %v3928_v48, %v3632_v47  ;;  %v3910_v55 = vld [vmem:[#allocation5 + $0x14] sm:$0xf0] }
  0x4b   : > { %1570 = vmatpush.bf16.msra.mxu2 %v3721_v26  ;;  %v3697_v53 = vor.u32 %v3944_v50, %v3696_v49  ;;  %v3624_v56 = vld [vmem:[#allocation5 + $0x90] sm:$0xf]  ;;  %v3926_v57 = vld [vmem:[#allocation5 + $0x94] sm:$0xf0]  ;;  %v3561_v60 = vor.u32 %v3910_v55, %v3560_v54  ;;  %v3552_v61 = vld [vmem:[#allocation5] sm:$0xf] }
  0x4c   : > { %v3688_v58 = vld [vmem:[#allocation5 + $0x110] sm:$0xf]  ;;  %v3942_v59 = vld [vmem:[#allocation5 + $0x114] sm:$0xf0]  ;;  %v3625_v62 = vor.u32 %v3926_v57, %v3624_v56  ;;  %v3908_v0 = vld [vmem:[#allocation5 + $0x4] sm:$0xf0] }
  0x4d   : > { %1233 = vmatpush.bf16.msra.mxu0 %v3585_v33  ;;  %v3689_v63 = vor.u32 %v3942_v59, %v3688_v58  ;;  %v3616_v1 = vld [vmem:[#allocation5 + $0x80] sm:$0xf]  ;;  %v3924_v2 = vld [vmem:[#allocation5 + $0x84] sm:$0xf0]  ;;  %v3937_v5 = vld [vmem:[#allocation5 + $0xf4] sm:$0xf]  ;;  %v3553_v9 = vor.u32 %v3908_v0, %v3552_v61 }
  0x4e   : > { %1402 = vmatpush.bf16.msra.mxu1 %v3649_v34  ;;  %v3680_v3 = vld [vmem:[#allocation5 + $0x100] sm:$0xf]  ;;  %v3940_v4 = vld [vmem:[#allocation5 + $0x104] sm:$0xf0]  ;;  %v3674_v6 = vld [vmem:[#allocation5 + $0xf8] sm:$0xf0]  ;;  %v3617_v13 = vor.u32 %v3924_v2, %v3616_v1 }
  0x4f   : > { %1571 = vmatpush.bf16.msra.mxu2 %v3713_v35  ;;  %v3953_v7 = vld [vmem:[#allocation5 + $0x174] sm:$0xf]  ;;  %v3738_v8 = vld [vmem:[#allocation5 + $0x178] sm:$0xf0]  ;;  %v3168_v10 = vld [vmem:[%s4604_s28] sm:$0xf]  ;;  %v3681_v14 = vor.u32 %v3940_v4, %v3680_v3  ;;  %v3677_v18 = vor.u32 %v3937_v5, %v3674_v6 }
  0x50   : > { %v3812_v11 = vld [vmem:[%s4604_s28 + $0x8] sm:$0xf0]  ;;  %v3811_v12 = vld [vmem:[%s4604_s28 + $0x4] sm:$0xf]  ;;  %v3170_v15 = vld [vmem:[%s4604_s28 + $0xc] sm:$0xf0]  ;;  %v3741_v19 = vor.u32 %v3953_v7, %v3738_v8 }
  0x51   : > { %1234 = vmatpush.bf16.msra.mxu0 %v3577_v42  ;;  %v3176_v16 = vld [vmem:[%s4604_s28 + $0x8] sm:$0xf]  ;;  %v3813_v17 = vld [vmem:[%s4604_s28 + $0x10] sm:$0xf0]  ;;  %v4624_v20 = vor.u32 %v3812_v11, %v3168_v10  ;;  %v4626_v21 = vor.u32 %v3811_v12, %v3170_v15  ;;  %v3180_v23 = vld [vmem:[%s4604_s28 + $0x18] sm:$0xf] }
  0x52   : > { %1403 = vmatpush.bf16.msra.mxu1 %v3641_v43  ;;  %v4628_v22 = vor.u32 %v3813_v17, %v3176_v16  ;;  %v3815_v24 = vld [vmem:[%s4604_s28 + $0x20] sm:$0xf0]  ;;  %v3814_v25 = vld [vmem:[%s4604_s28 + $0x1c] sm:$0xf]  ;;  %v3182_v26 = vld [vmem:[%s4604_s28 + $0x24] sm:$0xf0] }
  0x53   : > { %1572 = vmatpush.bf16.msra.mxu2 %v3705_v44  ;;  %v3188_v27 = vld [vmem:[%s4604_s28 + $0x20] sm:$0xf]  ;;  %v3816_v28 = vld [vmem:[%s4604_s28 + $0x28] sm:$0xf0]  ;;  %v4639_v29 = vor.u32 %v3815_v24, %v3180_v23  ;;  %v4641_v30 = vor.u32 %v3814_v25, %v3182_v26  ;;  %v3192_v32 = vld [vmem:[%s4604_s28 + $0x30] sm:$0xf] }
  0x54   : > { %v4643_v31 = vor.u32 %v3816_v28, %v3188_v27  ;;  %v3818_v33 = vld [vmem:[%s4604_s28 + $0x38] sm:$0xf0]  ;;  %v3817_v34 = vld [vmem:[%s4604_s28 + $0x34] sm:$0xf]  ;;  %v3194_v35 = vld [vmem:[%s4604_s28 + $0x3c] sm:$0xf0] }
  0x55   : > { %1235 = vmatpush.bf16.msra.mxu0 %v3569_v51  ;;  %v3200_v36 = vld [vmem:[%s4604_s28 + $0x38] sm:$0xf]  ;;  %v3819_v37 = vld [vmem:[%s4604_s28 + $0x40] sm:$0xf0]  ;;  %v4654_v38 = vor.u32 %v3818_v33, %v3192_v32  ;;  %v4656_v39 = vor.u32 %v3817_v34, %v3194_v35  ;;  %v3666_v42 = vld [vmem:[#allocation5 + $0xe8] sm:$0xf0] }
  0x56   : > { %1404 = vmatpush.bf16.msra.mxu1 %v3633_v52  ;;  %v4658_v40 = vor.u32 %v3819_v37, %v3200_v36  ;;  %v3935_v41 = vld [vmem:[#allocation5 + $0xe4] sm:$0xf]  ;;  %v3730_v45 = vld [vmem:[#allocation5 + $0x168] sm:$0xf0]  ;;  %v3204_v47 = vld [vmem:[%s4604_s28 + $0x48] sm:$0xf] }
  0x57   : > { %1573 = vmatpush.bf16.msra.mxu2 %v3697_v53  ;;  %v3951_v43 = vld [vmem:[#allocation5 + $0x164] sm:$0xf]  ;;  %v3669_v44 = vor.u32 %v3935_v41, %v3666_v42  ;;  %v3821_v48 = vld [vmem:[%s4604_s28 + $0x50] sm:$0xf0]  ;;  %v3820_v49 = vld [vmem:[%s4604_s28 + $0x4c] sm:$0xf] }
  0x58   : > { %v3733_v46 = vor.u32 %v3951_v43, %v3730_v45  ;;  %v3206_v50 = vld [vmem:[%s4604_s28 + $0x54] sm:$0xf0]  ;;  %v3212_v51 = vld [vmem:[%s4604_s28 + $0x50] sm:$0xf]  ;;  %v3822_v52 = vld [vmem:[%s4604_s28 + $0x58] sm:$0xf0]  ;;  %v4669_v53 = vor.u32 %v3821_v48, %v3204_v47 }
  0x59   : > { %1236 = vmatpush.bf16.msra.mxu0 %v3561_v60  ;;  %v4671_v54 = vor.u32 %v3820_v49, %v3206_v50  ;;  %v4673_v55 = vor.u32 %v3822_v52, %v3212_v51  ;;  %v3216_v56 = vld [vmem:[%s4604_s28 + $0x60] sm:$0xf]  ;;  %v3824_v57 = vld [vmem:[%s4604_s28 + $0x68] sm:$0xf0]  ;;  %v3823_v58 = vld [vmem:[%s4604_s28 + $0x64] sm:$0xf] }
  0x5a   : > { %1405 = vmatpush.bf16.msra.mxu1 %v3625_v62  ;;  %v3218_v59 = vld [vmem:[%s4604_s28 + $0x6c] sm:$0xf0]  ;;  %v3224_v60 = vld [vmem:[%s4604_s28 + $0x68] sm:$0xf]  ;;  %v3825_v61 = vld [vmem:[%s4604_s28 + $0x70] sm:$0xf0]  ;;  %v4684_v62 = vor.u32 %v3824_v57, %v3216_v56 }
  0x5b   : > { %1574 = vmatpush.bf16.msra.mxu2 %v3689_v63  ;;  %v4686_v63 = vor.u32 %v3823_v58, %v3218_v59  ;;  %v4688_v0 = vor.u32 %v3825_v61, %v3224_v60  ;;  %v3921_v1 = vld [vmem:[#allocation5 + $0x74] sm:$0xf]  ;;  %v3610_v2 = vld [vmem:[#allocation5 + $0x78] sm:$0xf0]  ;;  %v3919_v3 = vld [vmem:[#allocation5 + $0x64] sm:$0xf] }
  0x5c   : > { %v3613_v4 = vor.u32 %v3921_v1, %v3610_v2  ;;  %v3602_v5 = vld [vmem:[#allocation5 + $0x68] sm:$0xf0]  ;;  %v3917_v7 = vld [vmem:[#allocation5 + $0x54] sm:$0xf]  ;;  %v3594_v8 = vld [vmem:[#allocation5 + $0x58] sm:$0xf0] }
  0x5d   : > { %1237 = vmatpush.bf16.msra.mxu0 %v3553_v9  ;;  %v3605_v6 = vor.u32 %v3919_v3, %v3602_v5  ;;  %v3597_v9 = vor.u32 %v3917_v7, %v3594_v8  ;;  %v3228_v10 = vld [vmem:[%s4604_s28 + $0x78] sm:$0xf]  ;;  %v3827_v11 = vld [vmem:[%s4604_s28 + $0x80] sm:$0xf0]  ;;  %v3826_v12 = vld [vmem:[%s4604_s28 + $0x7c] sm:$0xf] }
  0x5e   : > { %1406 = vmatpush.bf16.msra.mxu1 %v3617_v13  ;;  %1737 = vmatpush.bf16.msra.mxu3 %v3613_v4  ;;  %v3230_v13 = vld [vmem:[%s4604_s28 + $0x84] sm:$0xf0]  ;;  %v3828_v15 = vld [vmem:[%s4604_s28 + $0x88] sm:$0xf0]  ;;  %v4699_v16 = vor.u32 %v3827_v11, %v3228_v10  ;;  %v3913_v24 = vld [vmem:[#allocation5 + $0x34] sm:$0xf] }
  0x5f   : > { %1575 = vmatpush.bf16.msra.mxu2 %v3681_v14  ;;  %v3236_v14 = vld [vmem:[%s4604_s28 + $0x80] sm:$0xf]  ;;  %v4701_v17 = vor.u32 %v3826_v12, %v3230_v13  ;;  %v3586_v23 = vld [vmem:[#allocation5 + $0x48] sm:$0xf0]  ;;  %v3578_v26 = vld [vmem:[#allocation5 + $0x38] sm:$0xf0] }
  0x60   : > { %1238 = vmatmul.bf16.vlgmr.msra.gmra.mxu0 %v4624_v20  ;;  %v3581_v27 = vor.u32 %v3913_v24, %v3578_v26  ;;  %v3911_v28 = vld [vmem:[#allocation5 + $0x24] sm:$0xf]  ;;  %v3570_v32 = vld [vmem:[#allocation5 + $0x28] sm:$0xf0]  ;;  %v3240_v34 = vld [vmem:[%s4604_s28 + $0x90] sm:$0xf] }
  0x61   : > { %1906 = vmatpush.bf16.msrb.mxu0 %v3677_v18  ;;  %1407 = vmatmul.bf16.vlgmr.msra.gmra.mxu1 %v4626_v21  ;;  %v4703_v18 = vor.u32 %v3828_v15, %v3236_v14  ;;  %v3573_v33 = vor.u32 %v3911_v28, %v3570_v32  ;;  %v3830_v35 = vld [vmem:[%s4604_s28 + $0x98] sm:$0xf0]  ;;  %v3829_v36 = vld [vmem:[%s4604_s28 + $0x94] sm:$0xf]  ;;  %v3242_v37 = vld [vmem:[%s4604_s28 + $0x9c] sm:$0xf0] }
  0x62   : > { %2075 = vmatpush.bf16.msrb.mxu1 %v3741_v19  ;;  %1576 = vmatmul.bf16.vlgmr.msra.gmra.mxu2 %v4628_v22  ;;  %v3915_v19 = vld [vmem:[#allocation5 + $0x44] sm:$0xf]  ;;  %v3248_v41 = vld [vmem:[%s4604_s28 + $0x98] sm:$0xf]  ;;  %v4714_v43 = vor.u32 %v3830_v35, %v3240_v34  ;;  %v3562_v47 = vld [vmem:[#allocation5 + $0x18] sm:$0xf0] }
  0x63   : > { %1738 = vmatpush.bf16.msra.mxu3 %v3605_v6  ;;  %v3589_v25 = vor.u32 %v3915_v19, %v3586_v23  ;;  %v3831_v42 = vld [vmem:[%s4604_s28 + $0xa0] sm:$0xf0]  ;;  %v3933_v49 = vld [vmem:[#allocation5 + $0xd4] sm:$0xf]  ;;  %v3658_v50 = vld [vmem:[#allocation5 + $0xd8] sm:$0xf0] }
  0x64   : > { %v4718_v45 = vor.u32 %v3831_v42, %v3248_v41  ;;  %v3949_v51 = vld [vmem:[#allocation5 + $0x154] sm:$0xf]  ;;  %v3661_v52 = vor.u32 %v3933_v49, %v3658_v50  ;;  %v3722_v56 = vld [vmem:[#allocation5 + $0x158] sm:$0xf0]  ;;  %v3907_v57 = vld [vmem:[#allocation5 + $0x4] sm:$0xf] }
  0x65   : > { %1907 = vmatpush.bf16.msrb.mxu0 %v3669_v44  ;;  %v4716_v44 = vor.u32 %v3829_v36, %v3242_v37  ;;  %v3554_v58 = vld [vmem:[#allocation5 + $0x8] sm:$0xf0]  ;;  %v3725_v59 = vor.u32 %v3949_v51, %v3722_v56  ;;  %v3252_v61 = vld [vmem:[%s4604_s28 + $0xa8] sm:$0xf]  ;;  %v3833_v1 = vld [vmem:[%s4604_s28 + $0xb0] sm:$0xf0] }
  0x66   : > { %2076 = vmatpush.bf16.msrb.mxu1 %v3733_v46  ;;  %v3909_v46 = vld [vmem:[#allocation5 + $0x14] sm:$0xf]  ;;  %v3557_v60 = vor.u32 %v3907_v57, %v3554_v58  ;;  %v3832_v2 = vld [vmem:[%s4604_s28 + $0xac] sm:$0xf]  ;;  %v3254_v3 = vld [vmem:[%s4604_s28 + $0xb4] sm:$0xf0]  ;;  %v4730_v6 = vor.u32 %v3833_v1, %v3252_v61 }
  0x67   : > { %1739 = vmatpush.bf16.msra.mxu3 %v3597_v9  ;;  %v3565_v48 = vor.u32 %v3909_v46, %v3562_v47  ;;  %v3260_v4 = vld [vmem:[%s4604_s28 + $0xb0] sm:$0xf]  ;;  %v3834_v5 = vld [vmem:[%s4604_s28 + $0xb8] sm:$0xf0]  ;;  %v4732_v7 = vor.u32 %v3832_v2, %v3254_v3  ;;  %v472_v10 = vld [vmem:[#allocation7] sm:$0x3] }
  0x68   : > { %v4734_v8 = vor.u32 %v3834_v5, %v3260_v4  ;;  %v3970_v9 = vld [vmem:[#allocation8 + $0x78] sm:$0xff]  ;;  %v4739_v11 = vperm.slane %v472_v10, 0  ;;  %v3836_v13 = vld [vmem:[%s4604_s28 + $0xc8] sm:$0xf0]  ;;  %v3835_v14 = vld [vmem:[%s4604_s28 + $0xc4] sm:$0xf] }
  0x69   : > { %1908 = vmatpush.bf16.msrb.mxu0 %v3661_v52  ;;  %v3264_v12 = vld [vmem:[%s4604_s28 + $0xc0] sm:$0xf]  ;;  %v3266_v15 = vld [vmem:[%s4604_s28 + $0xcc] sm:$0xf0]  ;;  %v3272_v19 = vld [vmem:[%s4604_s28 + $0xc8] sm:$0xf] }
  0x6a   : > { %2077 = vmatpush.bf16.msrb.mxu1 %v3725_v59  ;;  %v3837_v23 = vld [vmem:[%s4604_s28 + $0xd0] sm:$0xf0]  ;;  %v4748_v24 = vor.u32 %v3836_v13, %v3264_v12  ;;  %v4750_v26 = vor.u32 %v3835_v14, %v3266_v15  ;;  %v3276_v42 = vld [vmem:[%s4604_s28 + $0xd8] sm:$0xf]  ;;  %v3839_v46 = vld [vmem:[%s4604_s28 + $0xe0] sm:$0xf0] }
  0x6b   : > { %1740 = vmatpush.bf16.msra.mxu3 %v3589_v25  ;;  %v3838_v47 = vld [vmem:[%s4604_s28 + $0xdc] sm:$0xf]  ;;  %v3284_v49 = vld [vmem:[%s4604_s28 + $0xe0] sm:$0xf]  ;;  %v3840_v50 = vld [vmem:[%s4604_s28 + $0xe8] sm:$0xf0]  ;;  %v4766_v52 = vor.u32 %v3839_v46, %v3276_v42 }
  0x6c   : > { %v4770_v59 = vor.u32 %v3840_v50, %v3284_v49  ;;  %v3288_v13 = vld [vmem:[%s4604_s28 + $0xf0] sm:$0xf]  ;;  %v3842_v14 = vld [vmem:[%s4604_s28 + $0xf8] sm:$0xf0]  ;;  %v3841_v15 = vld [vmem:[%s4604_s28 + $0xf4] sm:$0xf] }
  0x6d   : > { %v3931_v46 = vld [vmem:[#allocation5 + $0xc4] sm:$0xf]  ;;  %s3165_s16 = sshll.u32 %s4600_s15, 8  ;;  %s3971_s6 = sshll.u32 %s4512_s22, 8 }
  0x6e   : > { %s5530_s17 = scalar_lea.vmem [#allocation10], %s3165_s16  ;;  %s3046_s13 = scalar_lea.hbm %s5897_s5, %s3971_s6 }
  0x6f   : > { %1741 = vmatpush.bf16.msra.mxu3 %v3581_v27  ;;  %v4752_v27 = vor.u32 %v3837_v23, %v3272_v19  ;;  %v3290_v19 = vld [vmem:[%s4604_s28 + $0xfc] sm:$0xf0]  ;;  %v3296_v23 = vld [vmem:[%s4604_s28 + $0xf8] sm:$0xf]  ;;  %s3047_s14 = sshll.u32 %s5530_s17, 4  ;;  %s3049_s11 = sshll.u32 %s3046_s13, 4  ;;  %s3048_s14 = int_to_ptr.vmem [resolvable:$true] %s3047_s14  ;;  %s3050_s11 = int_to_ptr.hbm [resolvable:$true] %s3049_s11 }
  0x70   : > { %1243 = vmatmul.bf16.gmra.mxu0 %v4639_v29  ;;  %s3035_s22 = scalar_lea.sflag [#allocation4], %s4600_s15  ;;  %s4388_s12 = sshra.s32 %s3050_s11, 4  ;;  %s4389_s12 = int_to_ptr.hbm [resolvable:$true] %s4388_s12 }
  0x71   : > { %1412 = vmatmul.bf16.gmra.mxu1 %v4641_v30  ;;  %s4390_s1 = scalar_lea.hbm %s4389_s12, 256  ;;  %s4394_s24 = scalar_lea.hbm %s5897_s5, 512 }
  0x72   : > { %1581 = vmatmul.bf16.gmra.mxu2 %v4643_v31  ;;  %p4391_p1 = scmp.ne.s32.totalorder %s4389_s12, %s4390_s1  ;;  %p4395_p11 = scmp.lt.s32.totalorder %s4389_s12, %s5897_s5 }
  0x73   : > { %1742 = vmatpush.bf16.msra.mxu3 %v3573_v33  ;;  %p4396_p9 = scmp.lt.s32.totalorder %s4394_s24, %s4390_s1 }
  0x74   : > { %p4392_p4 = pnand %p4391_p1, %p4574_p7 }
  0x75   : > { %p4397_p2 = por %p4396_p9, %p4395_p11 }
  0x76   : > { %p4393_p8 = pneg %p4392_p4 }
  0x77   : > { %1743 = vmatpush.bf16.msra.mxu3 %v3565_v48  ;;  %v3278_v48 = vld [vmem:[%s4604_s28 + $0xe4] sm:$0xf0] }
  0x78   : > { %v4768_v58 = vor.u32 %v3838_v47, %v3278_v48  ;;  %v3650_v47 = vld [vmem:[#allocation5 + $0xc8] sm:$0xf0]  ;;  %v3947_v48 = vld [vmem:[#allocation5 + $0x144] sm:$0xf]  ;;  %p4398_p10 = pnand %p4397_p2, %p4393_p8 }
  0x79   : > { %v3653_v50 = vor.u32 %v3931_v46, %v3650_v47 }
  0x7b   : > { %1744 = vmatpush.bf16.msra.mxu3 %v3557_v60  ;;  %1909 = vmatpush.bf16.msrb.mxu0 %v3653_v50 }
  0x7e   : > { %1745 = vmatmul.bf16.vlgmr.msra.gmra.mxu3 %v4624_v20  ;;  %v3962_v20 = vld [vmem:[#allocation8 + $0x38] sm:$0xff] }
  0x7f   : > { %2568 = vmatpush.bf16.msrb.mxu2 %v3962_v20  ;;  %2737 = vmatpush.bf16.msrb.mxu3 %v3970_v9 }
  0x80   : > { %1248 = vmatmul.bf16.gmra.mxu0 %v4654_v38 }
  0x81   : > { %1417 = vmatmul.bf16.gmra.mxu1 %v4656_v39 }
  0x82   : > { %1586 = vmatmul.bf16.gmra.mxu2 %v4658_v40 }
  0x8e   : > { %1750 = vmatmul.bf16.gmra.mxu3 %v4639_v29 }
  0x90   : > { %1253 = vmatmul.bf16.gmra.mxu0 %v4669_v53 }
  0x91   : > { %1422 = vmatmul.bf16.gmra.mxu1 %v4671_v54 }
  0x92   : > { %1591 = vmatmul.bf16.gmra.mxu2 %v4673_v55 }
  0x9e   : > { %1755 = vmatmul.bf16.gmra.mxu3 %v4654_v38 }
  0xa0   : > { %1258 = vmatmul.bf16.gmra.mxu0 %v4684_v62 }
  0xa1   : > { %1427 = vmatmul.bf16.gmra.mxu1 %v4686_v63 }
  0xa2   : > { %1596 = vmatmul.bf16.gmra.mxu2 %v4688_v0 }
  0xae   : > { %1760 = vmatmul.bf16.gmra.mxu3 %v4669_v53 }
  0xb0   : > { %1263 = vmatmul.bf16.gmra.mxu0 %v4699_v16 }
  0xb1   : > { %1432 = vmatmul.bf16.gmra.mxu1 %v4701_v17 }
  0xb2   : > { %1601 = vmatmul.bf16.gmra.mxu2 %v4703_v18 }
  0xbe   : > { %1765 = vmatmul.bf16.gmra.mxu3 %v4684_v62 }
  0xc0   : > { %1268 = vmatmul.bf16.gmra.mxu0 %v4714_v43 }
  0xc1   : > { %1437 = vmatmul.bf16.gmra.mxu1 %v4716_v44 }
  0xc2   : > { %1606 = vmatmul.bf16.gmra.mxu2 %v4718_v45 }
  0xce   : > { %1770 = vmatmul.bf16.gmra.mxu3 %v4699_v16 }
  0xd0   : > { %1273 = vmatmul.bf16.gmra.mxu0 %v4730_v6 }
  0xd1   : > { %1442 = vmatmul.bf16.gmra.mxu1 %v4732_v7 }
  0xd2   : > { %1611 = vmatmul.bf16.gmra.mxu2 %v4734_v8 }
  0xdd   : > { %v1239_v25 = vpop.f32.mrf.mxu0 }
  0xde   : > { %v1240_v28 = vadd.f32 %v1239_v25, %v4739_v11  ;;  %v1408_v29 = vpop.f32.mrf.mxu1  ;;  %v3843_v25 = vld [vmem:[%s4604_s28 + $0x100] sm:$0xf0]  ;;  %1775 = vmatmul.bf16.gmra.mxu3 %v4714_v43 }
  0xe0   : > { %v1409_v32 = vadd.f32 %v1408_v29, %v1240_v28  ;;  %1278 = vmatmul.bf16.gmra.mxu0 %v4748_v24  ;;  %v4786_v29 = vor.u32 %v3842_v14, %v3288_v13 }
  0xe1   : > { %1447 = vmatmul.bf16.gmra.mxu1 %v4750_v26 }
  0xe2   : > { %1616 = vmatmul.bf16.gmra.mxu2 %v4752_v27 }
  0xe5   : > { %v1577_v33 = vpop.f32.mrf.mxu2  ;;  %v1241_v35 = vpop.f32.mrf.mxu0 }
  0xe6   : > { %v1578_v34 = vadd.f32 %v1577_v33, %v1409_v32  ;;  %v1242_v36 = vadd.f32 %v1241_v35, %v4739_v11  ;;  %v1410_v37 = vpop.f32.mrf.mxu1  ;;  %v4790_v35 = vor.u32 %v3843_v25, %v3296_v23 }
  0xe8   : > { %v1411_v41 = vadd.f32 %v1410_v37, %v1242_v36  ;;  %v2244_v38 = vmax.f32 %v1578_v34, 0.0  ;;  %v4788_v34 = vor.u32 %v3841_v15, %v3290_v19  ;;  %5948 = vst [vmem:[#allocation15_spill] sm:$0xff] %v4790_v35 }
  0xed   : > { %v1579_v51 = vpop.f32.mrf.mxu2  ;;  %v1244_v57 = vpop.f32.mrf.mxu0 }
  0xee   : > { %v1580_v56 = vadd.f32 %v1579_v51, %v1411_v41  ;;  %v1245_v60 = vadd.f32 %v1244_v57, %v4739_v11  ;;  %v1413_v61 = vpop.f32.mrf.mxu1  ;;  %v3714_v51 = vld [vmem:[#allocation5 + $0x148] sm:$0xf0]  ;;  %1780 = vmatmul.bf16.gmra.mxu3 %v4730_v6 }
  0xf0   : > { %v2246_v1 = vmax.f32 %v1580_v56, 0.0  ;;  %v1414_v2 = vadd.f32 %v1413_v61, %v1245_v60  ;;  %1283 = vmatmul.bf16.gmra.mxu0 %v4766_v52  ;;  %v3717_v56 = vor.u32 %v3947_v48, %v3714_v51 }
  0xf1   : > { %1452 = vmatmul.bf16.gmra.mxu1 %v4768_v58 }
  0xf2   : > { %v4774_v3 = vpack.c.bf16 %v2246_v1, %v2244_v38  ;;  %1621 = vmatmul.bf16.gmra.mxu2 %v4770_v59  ;;  %2078 = vmatpush.bf16.msrb.mxu1 %v3717_v56  ;;  %v3312_v56 = vld [vmem:[%s4604_s28 + $0x120] sm:$0xf] }
  0xf5   : > { %v1582_v4 = vpop.f32.mrf.mxu2  ;;  %v1246_v20 = vpop.f32.mrf.mxu0 }
  0xf6   : > { %v1583_v5 = vadd.f32 %v1582_v4, %v1414_v2  ;;  %v1247_v9 = vadd.f32 %v1246_v20, %v4739_v11  ;;  %v1415_v10 = vpop.f32.mrf.mxu1  ;;  %v3300_v4 = vld [vmem:[%s4604_s28 + $0x108] sm:$0xf]  ;;  %v3844_v20 = vld [vmem:[%s4604_s28 + $0x10c] sm:$0xf] }
  0xf8   : > { %v1416_v12 = vadd.f32 %v1415_v10, %v1247_v9  ;;  %v2248_v41 = vmax.f32 %v1583_v5, 0.0  ;;  %v3845_v5 = vld [vmem:[%s4604_s28 + $0x110] sm:$0xf0]  ;;  %v3302_v9 = vld [vmem:[%s4604_s28 + $0x114] sm:$0xf0] }
  0xf9   : > { %v3308_v10 = vld [vmem:[%s4604_s28 + $0x110] sm:$0xf]  ;;  %v4806_v14 = vor.u32 %v3845_v5, %v3300_v4  ;;  %v4808_v23 = vor.u32 %v3844_v20, %v3302_v9 }
  0xfb   : > { %5949 = vst [vmem:[#allocation16_spill] sm:$0xff] %v4808_v23 }
  0xfd   : > { %v1584_v28 = vpop.f32.mrf.mxu2  ;;  %v1249_v33 = vpop.f32.mrf.mxu0 }
  0xfe   : > { %v1585_v32 = vadd.f32 %v1584_v28, %v1416_v12  ;;  %v1250_v36 = vadd.f32 %v1249_v33, %v4739_v11  ;;  %v1418_v37 = vpop.f32.mrf.mxu1  ;;  %v3846_v12 = vld [vmem:[%s4604_s28 + $0x118] sm:$0xf0]  ;;  %1785 = vmatmul.bf16.gmra.mxu3 %v4748_v24 }
  0xff   : > { %v4810_v25 = vor.u32 %v3846_v12, %v3308_v10 }
 0x100   : > { %v2250_v53 = vmax.f32 %v1585_v32, 0.0  ;;  %v1419_v42 = vadd.f32 %v1418_v37, %v1250_v36  ;;  %1288 = vmatmul.bf16.gmra.mxu0 %v4786_v29  ;;  %v3961_v36 = vld [vmem:[#allocation8 + $0x30] sm:$0xff] }
 0x101   : > { %1457 = vmatmul.bf16.gmra.mxu1 %v4788_v34  ;;  %5950 = vst [vmem:[#allocation17_spill] sm:$0xff] %v4810_v25  ;;  %2569 = vmatpush.bf16.msrb.mxu2 %v3961_v36 }
 0x102   : > { %1626 = vmatmul.bf16.gmra.mxu2 %v4790_v35  ;;  %v4796_v49 = vpack.c.bf16 %v2250_v53, %v2248_v41  ;;  %v3969_v41 = vld [vmem:[#allocation8 + $0x70] sm:$0xff] }
 0x103   : > { %2738 = vmatpush.bf16.msrb.mxu3 %v3969_v41 }
 0x105   : > { %v1587_v57 = vpop.f32.mrf.mxu2  ;;  %v1251_v61 = vpop.f32.mrf.mxu0 }
 0x106   : > { %v1588_v60 = vadd.f32 %v1587_v57, %v1419_v42  ;;  %v1252_v38 = vadd.f32 %v1251_v61, %v4739_v11  ;;  %v1420_v1 = vpop.f32.mrf.mxu1  ;;  %v3848_v57 = vld [vmem:[%s4604_s28 + $0x128] sm:$0xf0]  ;;  %v3314_v61 = vld [vmem:[%s4604_s28 + $0x12c] sm:$0xf0] }
 0x107   : > { %v4826_v4 = vor.u32 %v3848_v57, %v3312_v56 }
 0x108   : > { %v1421_v2 = vadd.f32 %v1420_v1, %v1252_v38  ;;  %v2252_v33 = vmax.f32 %v1588_v60, 0.0  ;;  %v3847_v60 = vld [vmem:[%s4604_s28 + $0x124] sm:$0xf]  ;;  %v3320_v38 = vld [vmem:[%s4604_s28 + $0x128] sm:$0xf] }
 0x109   : > { %v3849_v1 = vld [vmem:[%s4604_s28 + $0x130] sm:$0xf0]  ;;  %v4828_v9 = vor.u32 %v3847_v60, %v3314_v61 }
 0x10a   : > { %v4830_v10 = vor.u32 %v3849_v1, %v3320_v38 }
 0x10b   : > { %5951 = vst [vmem:[#allocation18_spill] sm:$0xff] %v4828_v9 }
 0x10c   : > { %5952 = vst [vmem:[#allocation19_spill] sm:$0xff] %v4830_v10 }
 0x10d   : > { %v1589_v13 = vpop.f32.mrf.mxu2  ;;  %v1254_v19 = vpop.f32.mrf.mxu0 }
 0x10e   : > { %v1590_v15 = vadd.f32 %v1589_v13, %v1421_v2  ;;  %v1255_v28 = vadd.f32 %v1254_v19, %v4739_v11  ;;  %v1423_v32 = vpop.f32.mrf.mxu1  ;;  %1790 = vmatmul.bf16.gmra.mxu3 %v4766_v52 }
 0x110   : > { %v2254_v62 = vmax.f32 %v1590_v15, 0.0  ;;  %v1424_v37 = vadd.f32 %v1423_v32, %v1255_v28  ;;  %1293 = vmatmul.bf16.gmra.mxu0 %v4806_v14 }
 0x111   : > { %1462 = vmatmul.bf16.gmra.mxu1 %v4808_v23 }
 0x112   : > { %1631 = vmatmul.bf16.gmra.mxu2 %v4810_v25  ;;  %v4816_v53 = vpack.c.bf16 %v2254_v62, %v2252_v33 }
 0x115   : > { %v1592_v42 = vpop.f32.mrf.mxu2  ;;  %v1256_v47 = vpop.f32.mrf.mxu0 }
 0x116   : > { %v1593_v46 = vadd.f32 %v1592_v42, %v1424_v37  ;;  %v1257_v48 = vadd.f32 %v1256_v47, %v4739_v11  ;;  %v1425_v50 = vpop.f32.mrf.mxu1  ;;  %v3324_v42 = vld [vmem:[%s4604_s28 + $0x138] sm:$0xf]  ;;  %v3850_v47 = vld [vmem:[%s4604_s28 + $0x13c] sm:$0xf] }
 0x118   : > { %v1426_v51 = vadd.f32 %v1425_v50, %v1257_v48  ;;  %v2256_v16 = vmax.f32 %v1593_v46, 0.0  ;;  %v3851_v46 = vld [vmem:[%s4604_s28 + $0x140] sm:$0xf0]  ;;  %v3326_v48 = vld [vmem:[%s4604_s28 + $0x144] sm:$0xf0] }
 0x119   : > { %v3332_v50 = vld [vmem:[%s4604_s28 + $0x140] sm:$0xf]  ;;  %v4846_v57 = vor.u32 %v3851_v46, %v3324_v42  ;;  %v4848_v38 = vor.u32 %v3850_v47, %v3326_v48  ;;  %v3344_v46 = vld [vmem:[%s4604_s28 + $0x158] sm:$0xf]  ;;  %v3855_v47 = vld [vmem:[%s4604_s28 + $0x160] sm:$0xf0] }
 0x11a   : > { %v3338_v42 = vld [vmem:[%s4604_s28 + $0x15c] sm:$0xf0] }
 0x11b   : > { %5953 = vst [vmem:[#allocation20_spill] sm:$0xff] %v4848_v38 }
 0x11d   : > { %v1594_v2 = vpop.f32.mrf.mxu2  ;;  %v1259_v20 = vpop.f32.mrf.mxu0 }
 0x11e   : > { %v1595_v5 = vadd.f32 %v1594_v2, %v1426_v51  ;;  %v1260_v12 = vadd.f32 %v1259_v20, %v4739_v11  ;;  %v1428_v13 = vpop.f32.mrf.mxu1  ;;  %v3852_v51 = vld [vmem:[%s4604_s28 + $0x148] sm:$0xf0]  ;;  %1795 = vmatmul.bf16.gmra.mxu3 %v4786_v29 }
 0x11f   : > { %v4850_v1 = vor.u32 %v3852_v51, %v3332_v50 }
 0x120   : > { %v2258_v15 = vmax.f32 %v1595_v5, 0.0  ;;  %v1429_v19 = vadd.f32 %v1428_v13, %v1260_v12  ;;  %1298 = vmatmul.bf16.gmra.mxu0 %v4826_v4 }
 0x121   : > { %1467 = vmatmul.bf16.gmra.mxu1 %v4828_v9  ;;  %5954 = vst [vmem:[#allocation21_spill] sm:$0xff] %v4850_v1 }
 0x122   : > { %1636 = vmatmul.bf16.gmra.mxu2 %v4830_v10  ;;  %v4836_v28 = vpack.c.bf16 %v2258_v15, %v2256_v16 }
 0x125   : > { %v1597_v32 = vpop.f32.mrf.mxu2  ;;  %v1261_v62 = vpop.f32.mrf.mxu0 }
 0x126   : > { %v1598_v33 = vadd.f32 %v1597_v32, %v1429_v19  ;;  %v1262_v36 = vadd.f32 %v1261_v62, %v4739_v11  ;;  %v1430_v37 = vpop.f32.mrf.mxu1 }
 0x128   : > { %v1431_v41 = vadd.f32 %v1430_v37, %v1262_v36  ;;  %v2260_v43 = vmax.f32 %v1598_v33, 0.0  ;;  %v3336_v36 = vld [vmem:[%s4604_s28 + $0x150] sm:$0xf]  ;;  %v3854_v37 = vld [vmem:[%s4604_s28 + $0x158] sm:$0xf0] }
 0x129   : > { %v4866_v50 = vor.u32 %v3854_v37, %v3336_v36 }
 0x12d   : > { %v1599_v56 = vpop.f32.mrf.mxu2  ;;  %v1264_v61 = vpop.f32.mrf.mxu0 }
 0x12e   : > { %v1600_v60 = vadd.f32 %v1599_v56, %v1431_v41  ;;  %v1265_v2 = vadd.f32 %v1264_v61, %v4739_v11  ;;  %v1433_v5 = vpop.f32.mrf.mxu1  ;;  %v3853_v41 = vld [vmem:[%s4604_s28 + $0x154] sm:$0xf]  ;;  %v4870_v61 = vor.u32 %v3855_v47, %v3344_v46  ;;  %1800 = vmatmul.bf16.gmra.mxu3 %v4806_v14 }
 0x130   : > { %v2262_v20 = vmax.f32 %v1600_v60, 0.0  ;;  %v1434_v12 = vadd.f32 %v1433_v5, %v1265_v2  ;;  %1303 = vmatmul.bf16.gmra.mxu0 %v4846_v57  ;;  %v4868_v60 = vor.u32 %v3853_v41, %v3338_v42  ;;  %5956 = vst [vmem:[#allocation23_spill] sm:$0xff] %v4870_v61 }
 0x131   : > { %1472 = vmatmul.bf16.gmra.mxu1 %v4848_v38 }
 0x132   : > { %1641 = vmatmul.bf16.gmra.mxu2 %v4850_v1  ;;  %v4856_v13 = vpack.c.bf16 %v2262_v20, %v2260_v43  ;;  %5955 = vst [vmem:[#allocation22_spill] sm:$0xff] %v4868_v60 }
 0x135   : > { %v1602_v16 = vpop.f32.mrf.mxu2  ;;  %v1266_v19 = vpop.f32.mrf.mxu0 }
 0x136   : > { %v1603_v15 = vadd.f32 %v1602_v16, %v1434_v12  ;;  %v1267_v32 = vadd.f32 %v1266_v19, %v4739_v11  ;;  %v1435_v33 = vpop.f32.mrf.mxu1  ;;  %v3929_v12 = vld [vmem:[#allocation5 + $0xb4] sm:$0xf]  ;;  %v3642_v16 = vld [vmem:[#allocation5 + $0xb8] sm:$0xf0] }
 0x137   : > { %v3945_v19 = vld [vmem:[#allocation5 + $0x134] sm:$0xf] }
 0x138   : > { %v1436_v62 = vadd.f32 %v1435_v33, %v1267_v32  ;;  %v2264_v43 = vmax.f32 %v1603_v15, 0.0  ;;  %v3645_v33 = vor.u32 %v3929_v12, %v3642_v16  ;;  %v3706_v15 = vld [vmem:[#allocation5 + $0x138] sm:$0xf0] }
 0x13a   : > { %1910 = vmatpush.bf16.msrb.mxu0 %v3645_v33 }
 0x13d   : > { %v1604_v48 = vpop.f32.mrf.mxu2  ;;  %v1269_v56 = vpop.f32.mrf.mxu0 }
 0x13e   : > { %v1605_v51 = vadd.f32 %v1604_v48, %v1436_v62  ;;  %v1270_v2 = vadd.f32 %v1269_v56, %v4739_v11  ;;  %v1438_v5 = vpop.f32.mrf.mxu1  ;;  %v3709_v62 = vor.u32 %v3945_v19, %v3706_v15  ;;  %v3348_v48 = vld [vmem:[%s4604_s28 + $0x168] sm:$0xf]  ;;  %v3856_v56 = vld [vmem:[%s4604_s28 + $0x16c] sm:$0xf] }
 0x140   : > { %v2266_v6 = vmax.f32 %v1605_v51, 0.0  ;;  %v1439_v20 = vadd.f32 %v1438_v5, %v1270_v2  ;;  %1308 = vmatmul.bf16.gmra.mxu0 %v4866_v50  ;;  %2079 = vmatpush.bf16.msrb.mxu1 %v3709_v62  ;;  %v3857_v51 = vld [vmem:[%s4604_s28 + $0x170] sm:$0xf0]  ;;  %v3350_v2 = vld [vmem:[%s4604_s28 + $0x174] sm:$0xf0] }
 0x141   : > { %1477 = vmatmul.bf16.gmra.mxu1 %v4868_v60  ;;  %v3356_v5 = vld [vmem:[%s4604_s28 + $0x170] sm:$0xf]  ;;  %v4888_v16 = vor.u32 %v3857_v51, %v3348_v48  ;;  %v4890_v33 = vor.u32 %v3856_v56, %v3350_v2 }
 0x142   : > { %1646 = vmatmul.bf16.gmra.mxu2 %v4870_v61  ;;  %v4876_v32 = vpack.c.bf16 %v2266_v6, %v2264_v43  ;;  %v3858_v43 = vld [vmem:[%s4604_s28 + $0x178] sm:$0xf0]  ;;  %v4886_v6 = vpop.f32.mrf.mxu3  ;;  %v3968_v61 = vld [vmem:[#allocation8 + $0x68] sm:$0xff] }
 0x143   : > { %5957 = vst [vmem:[#allocation24_spill] sm:$0xff] %v4890_v33  ;;  %v4892_v15 = vor.u32 %v3858_v43, %v3356_v5  ;;  %2739 = vmatpush.bf16.msrb.mxu3 %v3968_v61 }
 0x145   : > { %v1607_v36 = vpop.f32.mrf.mxu2  ;;  %v1271_v41 = vpop.f32.mrf.mxu0  ;;  %5958 = vst [vmem:[#allocation25_spill] sm:$0xff] %v4892_v15 }
 0x146   : > { %v1608_v37 = vadd.f32 %v1607_v36, %v1439_v20  ;;  %v1272_v42 = vadd.f32 %v1271_v41, %v4739_v11  ;;  %v1440_v46 = vpop.f32.mrf.mxu1 }
 0x148   : > { %v1441_v47 = vadd.f32 %v1440_v46, %v1272_v42  ;;  %v2268_v36 = vmax.f32 %v1608_v37, 0.0  ;;  %v3960_v42 = vld [vmem:[#allocation8 + $0x28] sm:$0xff] }
 0x149   : > { %2570 = vmatpush.bf16.msrb.mxu2 %v3960_v42 }
 0x14a   : > { %v4900_v37 = vpop.f32.mrf.mxu3  ;;  %1805 = vmatmul.bf16.gmra.mxu3 %v4826_v4 }
 0x14d   : > { %v1609_v12 = vpop.f32.mrf.mxu2  ;;  %v1274_v19 = vpop.f32.mrf.mxu0 }
 0x14e   : > { %v1610_v20 = vadd.f32 %v1609_v12, %v1441_v47  ;;  %v1275_v62 = vadd.f32 %v1274_v19, %v4739_v11  ;;  %v1443_v24 = vpop.f32.mrf.mxu1  ;;  %v3360_v12 = vld [vmem:[%s4604_s28 + $0x180] sm:$0xf]  ;;  %v3859_v19 = vld [vmem:[%s4604_s28 + $0x184] sm:$0xf] }
 0x150   : > { %v2270_v41 = vmax.f32 %v1610_v20, 0.0  ;;  %v1444_v46 = vadd.f32 %v1443_v24, %v1275_v62  ;;  %1313 = vmatmul.bf16.gmra.mxu0 %v4888_v16  ;;  %v3860_v20 = vld [vmem:[%s4604_s28 + $0x188] sm:$0xf0]  ;;  %v3362_v62 = vld [vmem:[%s4604_s28 + $0x18c] sm:$0xf0] }
 0x151   : > { %1482 = vmatmul.bf16.gmra.mxu1 %v4890_v33  ;;  %v3368_v24 = vld [vmem:[%s4604_s28 + $0x188] sm:$0xf]  ;;  %v4912_v42 = vor.u32 %v3860_v20, %v3360_v12 }
 0x152   : > { %1651 = vmatmul.bf16.gmra.mxu2 %v4892_v15  ;;  %v4898_v47 = vpack.c.bf16 %v2270_v41, %v2268_v36  ;;  %v3861_v36 = vld [vmem:[%s4604_s28 + $0x190] sm:$0xf0]  ;;  %v4910_v41 = vpop.f32.mrf.mxu3 }
 0x155   : > { %v1612_v48 = vpop.f32.mrf.mxu2  ;;  %v1276_v56 = vpop.f32.mrf.mxu0 }
 0x156   : > { %v1613_v51 = vadd.f32 %v1612_v48, %v1444_v46  ;;  %v1277_v2 = vadd.f32 %v1276_v56, %v4739_v11  ;;  %v1445_v5 = vpop.f32.mrf.mxu1  ;;  %v4914_v48 = vor.u32 %v3859_v19, %v3362_v62  ;;  %v4916_v56 = vor.u32 %v3861_v36, %v3368_v24  ;;  %v3372_v36 = vld [vmem:[%s4604_s28 + $0x198] sm:$0xf] }
 0x158   : > { %v1446_v43 = vadd.f32 %v1445_v5, %v1277_v2  ;;  %5959 = vst [vmem:[#allocation26_spill] sm:$0xff] %v4914_v48  ;;  %v2272_v5 = vmax.f32 %v1613_v51, 0.0 }
 0x159   : > { %5960 = vst [vmem:[#allocation27_spill] sm:$0xff] %v4916_v56 }
 0x15a   : > { %v4924_v12 = vpop.f32.mrf.mxu3  ;;  %1810 = vmatmul.bf16.gmra.mxu3 %v4846_v57 }
 0x15d   : > { %v1614_v61 = vpop.f32.mrf.mxu2  ;;  %v1279_v46 = vpop.f32.mrf.mxu0 }
 0x15e   : > { %v1615_v15 = vadd.f32 %v1614_v61, %v1446_v43  ;;  %v1280_v2 = vadd.f32 %v1279_v46, %v4739_v11  ;;  %v1448_v52 = vpop.f32.mrf.mxu1  ;;  %v3863_v61 = vld [vmem:[%s4604_s28 + $0x1a0] sm:$0xf0]  ;;  %v3862_v46 = vld [vmem:[%s4604_s28 + $0x19c] sm:$0xf] }
 0x160   : > { %v2274_v33 = vmax.f32 %v1615_v15, 0.0  ;;  %v1449_v60 = vadd.f32 %v1448_v52, %v1280_v2  ;;  %1318 = vmatmul.bf16.gmra.mxu0 %v4912_v42  ;;  %v3374_v2 = vld [vmem:[%s4604_s28 + $0x1a4] sm:$0xf0]  ;;  %v3380_v52 = vld [vmem:[%s4604_s28 + $0x1a0] sm:$0xf] }
 0x161   : > { %1487 = vmatmul.bf16.gmra.mxu1 %v4914_v48  ;;  %v3864_v48 = vld [vmem:[%s4604_s28 + $0x1a8] sm:$0xf0] }
 0x162   : > { %1656 = vmatmul.bf16.gmra.mxu2 %v4916_v56  ;;  %v4922_v43 = vpack.c.bf16 %v2274_v33, %v2272_v5  ;;  %v4934_v56 = vpop.f32.mrf.mxu3  ;;  %v4936_v5 = vor.u32 %v3863_v61, %v3372_v36 }
 0x165   : > { %v1617_v20 = vpop.f32.mrf.mxu2  ;;  %v1281_v51 = vpop.f32.mrf.mxu0 }
 0x166   : > { %v1618_v19 = vadd.f32 %v1617_v20, %v1449_v60  ;;  %v1282_v15 = vadd.f32 %v1281_v51, %v4739_v11  ;;  %v1450_v62 = vpop.f32.mrf.mxu1  ;;  %v4938_v20 = vor.u32 %v3862_v46, %v3374_v2  ;;  %v4940_v51 = vor.u32 %v3864_v48, %v3380_v52  ;;  %v3384_v52 = vld [vmem:[%s4604_s28 + $0x1b0] sm:$0xf] }
 0x168   : > { %v1451_v24 = vadd.f32 %v1450_v62, %v1282_v15  ;;  %5961 = vst [vmem:[#allocation28_spill] sm:$0xff] %v4938_v20  ;;  %v2276_v62 = vmax.f32 %v1618_v19, 0.0 }
 0x169   : > { %5962 = vst [vmem:[#allocation29_spill] sm:$0xff] %v4940_v51 }
 0x16d   : > { %v1619_v33 = vpop.f32.mrf.mxu2  ;;  %v1284_v60 = vpop.f32.mrf.mxu0 }
 0x16e   : > { %v1620_v1 = vadd.f32 %v1619_v33, %v1451_v24  ;;  %v1285_v15 = vadd.f32 %v1284_v60, %v4739_v11  ;;  %v1453_v29 = vpop.f32.mrf.mxu1  ;;  %v4948_v24 = vpop.f32.mrf.mxu3  ;;  %v3866_v33 = vld [vmem:[%s4604_s28 + $0x1b8] sm:$0xf0]  ;;  %v3865_v60 = vld [vmem:[%s4604_s28 + $0x1b4] sm:$0xf]  ;;  %1815 = vmatmul.bf16.gmra.mxu3 %v4866_v50 }
 0x16f   : > { %5963 = vst [vmem:[#allocation30_spill] sm:$0xff] %v4948_v24  ;;  %v3959_v24 = vld [vmem:[#allocation8 + $0x20] sm:$0xff] }
 0x170   : > { %v2278_v38 = vmax.f32 %v1620_v1, 0.0  ;;  %v1454_v10 = vadd.f32 %v1453_v29, %v1285_v15  ;;  %1323 = vmatmul.bf16.gmra.mxu0 %v4936_v5  ;;  %v3386_v15 = vld [vmem:[%s4604_s28 + $0x1bc] sm:$0xf0]  ;;  %v3392_v29 = vld [vmem:[%s4604_s28 + $0x1b8] sm:$0xf]  ;;  %2571 = vmatpush.bf16.msrb.mxu2 %v3959_v24 }
 0x171   : > { %1492 = vmatmul.bf16.gmra.mxu1 %v4938_v20  ;;  %v3867_v20 = vld [vmem:[%s4604_s28 + $0x1c0] sm:$0xf0] }
 0x172   : > { %1661 = vmatmul.bf16.gmra.mxu2 %v4940_v51  ;;  %v4946_v48 = vpack.c.bf16 %v2278_v38, %v2276_v62  ;;  %v4960_v62 = vor.u32 %v3866_v33, %v3384_v52  ;;  %v3927_v52 = vld [vmem:[#allocation5 + $0xa4] sm:$0xf]  ;;  %v3634_v33 = vld [vmem:[#allocation5 + $0xa8] sm:$0xf0] }
 0x175   : > { %v1622_v36 = vpop.f32.mrf.mxu2  ;;  %v1286_v19 = vpop.f32.mrf.mxu0 }
 0x176   : > { %v1623_v61 = vadd.f32 %v1622_v36, %v1454_v10  ;;  %v1287_v1 = vadd.f32 %v1286_v19, %v4739_v11  ;;  %v1455_v46 = vpop.f32.mrf.mxu1  ;;  %v4958_v51 = vpop.f32.mrf.mxu3  ;;  %v4962_v36 = vor.u32 %v3865_v60, %v3386_v15  ;;  %v4964_v19 = vor.u32 %v3867_v20, %v3392_v29  ;;  %v3698_v15 = vld [vmem:[#allocation5 + $0x128] sm:$0xf0] }
 0x177   : > { %5964 = vst [vmem:[#allocation31_spill] sm:$0xff] %v4958_v51  ;;  %v3637_v20 = vor.u32 %v3927_v52, %v3634_v33  ;;  %v3868_v52 = vld [vmem:[%s4604_s28 + $0x1cc] sm:$0xf]  ;;  %v3398_v33 = vld [vmem:[%s4604_s28 + $0x1d4] sm:$0xf0] }
 0x178   : > { %v1456_v2 = vadd.f32 %v1455_v46, %v1287_v1  ;;  %5965 = vst [vmem:[#allocation32_spill] sm:$0xff] %v4962_v36  ;;  %v2280_v46 = vmax.f32 %v1623_v61, 0.0  ;;  %v3870_v51 = vld [vmem:[%s4604_s28 + $0x1d8] sm:$0xf0] }
 0x179   : > { %5966 = vst [vmem:[#allocation33_spill] sm:$0xff] %v4964_v19  ;;  %1911 = vmatpush.bf16.msrb.mxu0 %v3637_v20 }
 0x17d   : > { %v1624_v38 = vpop.f32.mrf.mxu2  ;;  %v1289_v10 = vpop.f32.mrf.mxu0 }
 0x17e   : > { %v1625_v9 = vadd.f32 %v1624_v38, %v1456_v2  ;;  %v1290_v1 = vadd.f32 %v1289_v10, %v4739_v11  ;;  %v1458_v14 = vpop.f32.mrf.mxu1  ;;  %v3943_v2 = vld [vmem:[#allocation5 + $0x124] sm:$0xf] }
 0x17f   : > { %v3701_v61 = vor.u32 %v3943_v2, %v3698_v15 }
 0x180   : > { %v2282_v25 = vmax.f32 %v1625_v9, 0.0  ;;  %v1459_v23 = vadd.f32 %v1458_v14, %v1290_v1  ;;  %1328 = vmatmul.bf16.gmra.mxu0 %v4960_v62  ;;  %v4972_v9 = vpop.f32.mrf.mxu3  ;;  %1820 = vmatmul.bf16.gmra.mxu3 %v4888_v16 }
 0x181   : > { %1497 = vmatmul.bf16.gmra.mxu1 %v4962_v36  ;;  %5967 = vst [vmem:[#allocation34_spill] sm:$0xff] %v4972_v9  ;;  %v3404_v36 = vld [vmem:[%s4604_s28 + $0x1d0] sm:$0xf] }
 0x182   : > { %1666 = vmatmul.bf16.gmra.mxu2 %v4964_v19  ;;  %v4970_v60 = vpack.c.bf16 %v2282_v25, %v2280_v46  ;;  %2080 = vmatpush.bf16.msrb.mxu1 %v3701_v61  ;;  %v3396_v25 = vld [vmem:[%s4604_s28 + $0x1c8] sm:$0xf]  ;;  %v3869_v46 = vld [vmem:[%s4604_s28 + $0x1d0] sm:$0xf0]  ;;  %v4986_v61 = vor.u32 %v3868_v52, %v3398_v33 }
 0x183   : > { %v4984_v15 = vor.u32 %v3869_v46, %v3396_v25 }
 0x184   : > { %5969 = vst [vmem:[#allocation36_spill] sm:$0xff] %v4986_v61 }
 0x185   : > { %v1627_v29 = vpop.f32.mrf.mxu2  ;;  %v1291_v10 = vpop.f32.mrf.mxu0 }
 0x186   : > { %v1628_v38 = vadd.f32 %v1627_v29, %v1459_v23  ;;  %v1292_v1 = vadd.f32 %v1291_v10, %v4739_v11  ;;  %v1460_v14 = vpop.f32.mrf.mxu1  ;;  %v4988_v29 = vor.u32 %v3870_v51, %v3404_v36 }
 0x188   : > { %v1461_v19 = vadd.f32 %v1460_v14, %v1292_v1  ;;  %v4982_v9 = vpop.f32.mrf.mxu3  ;;  %5970 = vst [vmem:[#allocation37_spill] sm:$0xff] %v4988_v29  ;;  %v2284_v1 = vmax.f32 %v1628_v38, 0.0 }
 0x189   : > { %5968 = vst [vmem:[#allocation35_spill] sm:$0xff] %v4982_v9  ;;  %v3967_v9 = vld [vmem:[#allocation8 + $0x60] sm:$0xff] }
 0x18a   : > { %2740 = vmatpush.bf16.msrb.mxu3 %v3967_v9 }
 0x18d   : > { %v1629_v2 = vpop.f32.mrf.mxu2  ;;  %v1294_v20 = vpop.f32.mrf.mxu0 }
 0x18e   : > { %v1630_v23 = vadd.f32 %v1629_v2, %v1461_v19  ;;  %v1295_v10 = vadd.f32 %v1294_v20, %v4739_v11  ;;  %v1463_v4 = vpop.f32.mrf.mxu1  ;;  %v3408_v2 = vld [vmem:[%s4604_s28 + $0x1e0] sm:$0xf]  ;;  %v3871_v20 = vld [vmem:[%s4604_s28 + $0x1e4] sm:$0xf] }
 0x190   : > { %v2286_v14 = vmax.f32 %v1630_v23, 0.0  ;;  %v1464_v35 = vadd.f32 %v1463_v4, %v1295_v10  ;;  %1333 = vmatmul.bf16.gmra.mxu0 %v4984_v15  ;;  %v4996_v36 = vpop.f32.mrf.mxu3  ;;  %v3872_v23 = vld [vmem:[%s4604_s28 + $0x1e8] sm:$0xf0]  ;;  %v3410_v10 = vld [vmem:[%s4604_s28 + $0x1ec] sm:$0xf0]  ;;  %1825 = vmatmul.bf16.gmra.mxu3 %v4912_v42 }
 0x191   : > { %1502 = vmatmul.bf16.gmra.mxu1 %v4986_v61  ;;  %5972 = vst [vmem:[#allocation39_spill] sm:$0xff] %v4996_v36  ;;  %v3416_v4 = vld [vmem:[%s4604_s28 + $0x1e8] sm:$0xf]  ;;  %v5008_v9 = vor.u32 %v3872_v23, %v3408_v2 }
 0x192   : > { %1671 = vmatmul.bf16.gmra.mxu2 %v4988_v29  ;;  %v4994_v51 = vpack.c.bf16 %v2286_v14, %v2284_v1  ;;  %v3873_v1 = vld [vmem:[%s4604_s28 + $0x1f0] sm:$0xf0] }
 0x194   : > { %5971 = vst [vmem:[#allocation38_spill] sm:$0xff] %v4994_v51 }
 0x195   : > { %v1632_v19 = vpop.f32.mrf.mxu2  ;;  %v1296_v25 = vpop.f32.mrf.mxu0 }
 0x196   : > { %v1633_v38 = vadd.f32 %v1632_v19, %v1464_v35  ;;  %v1297_v46 = vadd.f32 %v1296_v25, %v4739_v11  ;;  %v1465_v52 = vpop.f32.mrf.mxu1  ;;  %v5010_v19 = vor.u32 %v3871_v20, %v3410_v10  ;;  %v5012_v25 = vor.u32 %v3873_v1, %v3416_v4  ;;  %v3420_v1 = vld [vmem:[%s4604_s28 + $0x1f8] sm:$0xf] }
 0x198   : > { %v1466_v33 = vadd.f32 %v1465_v52, %v1297_v46  ;;  %v5006_v14 = vpop.f32.mrf.mxu3  ;;  %5974 = vst [vmem:[#allocation41_spill] sm:$0xff] %v5010_v19  ;;  %v2288_v52 = vmax.f32 %v1633_v38, 0.0 }
 0x199   : > { %5973 = vst [vmem:[#allocation40_spill] sm:$0xff] %v5006_v14 }
 0x19a   : > { %5975 = vst [vmem:[#allocation42_spill] sm:$0xff] %v5012_v25 }
 0x19d   : > { %v1634_v24 = vpop.f32.mrf.mxu2  ;;  %v1299_v35 = vpop.f32.mrf.mxu0 }
 0x19e   : > { %v1635_v29 = vadd.f32 %v1634_v24, %v1466_v33  ;;  %v1300_v46 = vadd.f32 %v1299_v35, %v4739_v11  ;;  %v1468_v57 = vpop.f32.mrf.mxu1  ;;  %v3875_v24 = vld [vmem:[%s4604_s28 + $0x200] sm:$0xf0]  ;;  %v3874_v35 = vld [vmem:[%s4604_s28 + $0x1fc] sm:$0xf] }
 0x1a0   : > { %v2290_v61 = vmax.f32 %v1635_v29, 0.0  ;;  %v1469_v36 = vadd.f32 %v1468_v57, %v1300_v46  ;;  %1338 = vmatmul.bf16.gmra.mxu0 %v5008_v9  ;;  %v5020_v2 = vpop.f32.mrf.mxu3  ;;  %v3422_v46 = vld [vmem:[%s4604_s28 + $0x204] sm:$0xf0]  ;;  %v3428_v57 = vld [vmem:[%s4604_s28 + $0x200] sm:$0xf]  ;;  %1830 = vmatmul.bf16.gmra.mxu3 %v4936_v5 }
 0x1a1   : > { %1507 = vmatmul.bf16.gmra.mxu1 %v5010_v19  ;;  %5977 = vst [vmem:[#allocation44_spill] sm:$0xff] %v5020_v2  ;;  %v3876_v19 = vld [vmem:[%s4604_s28 + $0x208] sm:$0xf0] }
 0x1a2   : > { %1676 = vmatmul.bf16.gmra.mxu2 %v5012_v25  ;;  %v5018_v33 = vpack.c.bf16 %v2290_v61, %v2288_v52  ;;  %v5032_v52 = vor.u32 %v3875_v24, %v3420_v1 }
 0x1a4   : > { %5976 = vst [vmem:[#allocation43_spill] sm:$0xff] %v5018_v33 }
 0x1a5   : > { %v1637_v23 = vpop.f32.mrf.mxu2  ;;  %v1301_v38 = vpop.f32.mrf.mxu0 }
 0x1a6   : > { %v1638_v20 = vadd.f32 %v1637_v23, %v1469_v36  ;;  %v1302_v29 = vadd.f32 %v1301_v38, %v4739_v11  ;;  %v1470_v10 = vpop.f32.mrf.mxu1  ;;  %v5034_v23 = vor.u32 %v3874_v35, %v3422_v46  ;;  %v5036_v38 = vor.u32 %v3876_v19, %v3428_v57  ;;  %v3432_v57 = vld [vmem:[%s4604_s28 + $0x210] sm:$0xf] }
 0x1a8   : > { %v1471_v4 = vadd.f32 %v1470_v10, %v1302_v29  ;;  %v5030_v25 = vpop.f32.mrf.mxu3  ;;  %5979 = vst [vmem:[#allocation46_spill] sm:$0xff] %v5034_v23  ;;  %v2292_v10 = vmax.f32 %v1638_v20, 0.0 }
 0x1a9   : > { %5978 = vst [vmem:[#allocation45_spill] sm:$0xff] %v5030_v25 }
 0x1aa   : > { %5980 = vst [vmem:[#allocation47_spill] sm:$0xff] %v5036_v38 }
 0x1ad   : > { %v1639_v61 = vpop.f32.mrf.mxu2  ;;  %v1304_v36 = vpop.f32.mrf.mxu0 }
 0x1ae   : > { %v1640_v2 = vadd.f32 %v1639_v61, %v1471_v4  ;;  %v1305_v29 = vadd.f32 %v1304_v36, %v4739_v11  ;;  %v1473_v50 = vpop.f32.mrf.mxu1  ;;  %v3878_v61 = vld [vmem:[%s4604_s28 + $0x218] sm:$0xf0]  ;;  %v3877_v36 = vld [vmem:[%s4604_s28 + $0x214] sm:$0xf] }
 0x1b0   : > { %v2294_v14 = vmax.f32 %v1640_v2, 0.0  ;;  %v1474_v33 = vadd.f32 %v1473_v50, %v1305_v29  ;;  %1343 = vmatmul.bf16.gmra.mxu0 %v5032_v52  ;;  %v5044_v4 = vpop.f32.mrf.mxu3  ;;  %v3434_v29 = vld [vmem:[%s4604_s28 + $0x21c] sm:$0xf0]  ;;  %v3440_v50 = vld [vmem:[%s4604_s28 + $0x218] sm:$0xf]  ;;  %1835 = vmatmul.bf16.gmra.mxu3 %v4960_v62 }
 0x1b1   : > { %1512 = vmatmul.bf16.gmra.mxu1 %v5034_v23  ;;  %5982 = vst [vmem:[#allocation49_spill] sm:$0xff] %v5044_v4  ;;  %v3879_v23 = vld [vmem:[%s4604_s28 + $0x220] sm:$0xf0] }
 0x1b2   : > { %1681 = vmatmul.bf16.gmra.mxu2 %v5036_v38  ;;  %v5042_v19 = vpack.c.bf16 %v2294_v14, %v2292_v10  ;;  %v5056_v10 = vor.u32 %v3878_v61, %v3432_v57  ;;  %v3925_v57 = vld [vmem:[#allocation5 + $0x94] sm:$0xf]  ;;  %v3626_v61 = vld [vmem:[#allocation5 + $0x98] sm:$0xf0] }
 0x1b4   : > { %5981 = vst [vmem:[#allocation48_spill] sm:$0xff] %v5042_v19 }
 0x1b5   : > { %v1642_v1 = vpop.f32.mrf.mxu2  ;;  %v1306_v20 = vpop.f32.mrf.mxu0 }
 0x1b6   : > { %v1643_v24 = vadd.f32 %v1642_v1, %v1474_v33  ;;  %v1307_v2 = vadd.f32 %v1306_v20, %v4739_v11  ;;  %v1475_v35 = vpop.f32.mrf.mxu1  ;;  %v5058_v1 = vor.u32 %v3877_v36, %v3434_v29  ;;  %v5060_v20 = vor.u32 %v3879_v23, %v3440_v50  ;;  %v3690_v29 = vld [vmem:[#allocation5 + $0x118] sm:$0xf0] }
 0x1b7   : > { %v3629_v23 = vor.u32 %v3925_v57, %v3626_v61  ;;  %v3880_v57 = vld [vmem:[%s4604_s28 + $0x22c] sm:$0xf]  ;;  %v3446_v61 = vld [vmem:[%s4604_s28 + $0x234] sm:$0xf0] }
 0x1b8   : > { %v1476_v46 = vadd.f32 %v1475_v35, %v1307_v2  ;;  %v5054_v38 = vpop.f32.mrf.mxu3  ;;  %5984 = vst [vmem:[#allocation51_spill] sm:$0xff] %v5058_v1  ;;  %v2296_v35 = vmax.f32 %v1643_v24, 0.0 }
 0x1b9   : > { %5983 = vst [vmem:[#allocation50_spill] sm:$0xff] %v5054_v38  ;;  %1912 = vmatpush.bf16.msrb.mxu0 %v3629_v23  ;;  %v3882_v38 = vld [vmem:[%s4604_s28 + $0x238] sm:$0xf0] }
 0x1ba   : > { %5985 = vst [vmem:[#allocation52_spill] sm:$0xff] %v5060_v20 }
 0x1bd   : > { %v1644_v14 = vpop.f32.mrf.mxu2  ;;  %v1309_v33 = vpop.f32.mrf.mxu0 }
 0x1be   : > { %v1645_v4 = vadd.f32 %v1644_v14, %v1476_v46  ;;  %v1310_v2 = vadd.f32 %v1309_v33, %v4739_v11  ;;  %v1478_v16 = vpop.f32.mrf.mxu1  ;;  %v3941_v46 = vld [vmem:[#allocation5 + $0x114] sm:$0xf] }
 0x1bf   : > { %v3693_v24 = vor.u32 %v3941_v46, %v3690_v29 }
 0x1c0   : > { %v2298_v25 = vmax.f32 %v1645_v4, 0.0  ;;  %v1479_v19 = vadd.f32 %v1478_v16, %v1310_v2  ;;  %1348 = vmatmul.bf16.gmra.mxu0 %v5056_v10  ;;  %v5068_v4 = vpop.f32.mrf.mxu3  ;;  %1840 = vmatmul.bf16.gmra.mxu3 %v4984_v15 }
 0x1c1   : > { %1517 = vmatmul.bf16.gmra.mxu1 %v5058_v1  ;;  %5987 = vst [vmem:[#allocation54_spill] sm:$0xff] %v5068_v4  ;;  %v3452_v1 = vld [vmem:[%s4604_s28 + $0x230] sm:$0xf] }
 0x1c2   : > { %1686 = vmatmul.bf16.gmra.mxu2 %v5060_v20  ;;  %v5066_v36 = vpack.c.bf16 %v2298_v25, %v2296_v35  ;;  %2081 = vmatpush.bf16.msrb.mxu1 %v3693_v24  ;;  %v3444_v25 = vld [vmem:[%s4604_s28 + $0x228] sm:$0xf]  ;;  %v3881_v35 = vld [vmem:[%s4604_s28 + $0x230] sm:$0xf0]  ;;  %v5082_v24 = vor.u32 %v3880_v57, %v3446_v61 }
 0x1c3   : > { %v5080_v29 = vor.u32 %v3881_v35, %v3444_v25 }
 0x1c4   : > { %5986 = vst [vmem:[#allocation53_spill] sm:$0xff] %v5066_v36  ;;  %v3958_v36 = vld [vmem:[#allocation8 + $0x18] sm:$0xff] }
 0x1c5   : > { %v1647_v50 = vpop.f32.mrf.mxu2  ;;  %v1311_v33 = vpop.f32.mrf.mxu0  ;;  %5989 = vst [vmem:[#allocation56_spill] sm:$0xff] %v5082_v24  ;;  %2572 = vmatpush.bf16.msrb.mxu2 %v3958_v36 }
 0x1c6   : > { %v1648_v14 = vadd.f32 %v1647_v50, %v1479_v19  ;;  %v1312_v2 = vadd.f32 %v1311_v33, %v4739_v11  ;;  %v1480_v16 = vpop.f32.mrf.mxu1  ;;  %v5084_v50 = vor.u32 %v3882_v38, %v3452_v1 }
 0x1c8   : > { %v1481_v20 = vadd.f32 %v1480_v16, %v1312_v2  ;;  %v5078_v4 = vpop.f32.mrf.mxu3  ;;  %5990 = vst [vmem:[#allocation57_spill] sm:$0xff] %v5084_v50  ;;  %v2300_v2 = vmax.f32 %v1648_v14, 0.0 }
 0x1c9   : > { %5988 = vst [vmem:[#allocation55_spill] sm:$0xff] %v5078_v4  ;;  %v3966_v4 = vld [vmem:[#allocation8 + $0x58] sm:$0xff] }
 0x1ca   : > { %2741 = vmatpush.bf16.msrb.mxu3 %v3966_v4 }
 0x1cd   : > { %v1649_v46 = vpop.f32.mrf.mxu2  ;;  %v1314_v23 = vpop.f32.mrf.mxu0 }
 0x1ce   : > { %v1650_v19 = vadd.f32 %v1649_v46, %v1481_v20  ;;  %v1315_v33 = vadd.f32 %v1314_v23, %v4739_v11  ;;  %v1483_v42 = vpop.f32.mrf.mxu1  ;;  %v3456_v46 = vld [vmem:[%s4604_s28 + $0x240] sm:$0xf]  ;;  %v3883_v23 = vld [vmem:[%s4604_s28 + $0x244] sm:$0xf] }
 0x1d0   : > { %v2302_v16 = vmax.f32 %v1650_v19, 0.0  ;;  %v1484_v51 = vadd.f32 %v1483_v42, %v1315_v33  ;;  %1353 = vmatmul.bf16.gmra.mxu0 %v5080_v29  ;;  %v5092_v1 = vpop.f32.mrf.mxu3  ;;  %v3884_v19 = vld [vmem:[%s4604_s28 + $0x248] sm:$0xf0]  ;;  %v3458_v33 = vld [vmem:[%s4604_s28 + $0x24c] sm:$0xf0]  ;;  %1845 = vmatmul.bf16.gmra.mxu3 %v5008_v9 }
 0x1d1   : > { %1522 = vmatmul.bf16.gmra.mxu1 %v5082_v24  ;;  %5992 = vst [vmem:[#allocation59_spill] sm:$0xff] %v5092_v1  ;;  %v3464_v42 = vld [vmem:[%s4604_s28 + $0x248] sm:$0xf]  ;;  %v5104_v4 = vor.u32 %v3884_v19, %v3456_v46 }
 0x1d2   : > { %1691 = vmatmul.bf16.gmra.mxu2 %v5084_v50  ;;  %v5090_v38 = vpack.c.bf16 %v2302_v16, %v2300_v2  ;;  %v3885_v2 = vld [vmem:[%s4604_s28 + $0x250] sm:$0xf0] }
 0x1d4   : > { %5991 = vst [vmem:[#allocation58_spill] sm:$0xff] %v5090_v38 }
 0x1d5   : > { %v1652_v20 = vpop.f32.mrf.mxu2  ;;  %v1316_v25 = vpop.f32.mrf.mxu0 }
 0x1d6   : > { %v1653_v14 = vadd.f32 %v1652_v20, %v1484_v51  ;;  %v1317_v35 = vadd.f32 %v1316_v25, %v4739_v11  ;;  %v1485_v57 = vpop.f32.mrf.mxu1  ;;  %v5106_v20 = vor.u32 %v3883_v23, %v3458_v33  ;;  %v5108_v25 = vor.u32 %v3885_v2, %v3464_v42  ;;  %v3468_v2 = vld [vmem:[%s4604_s28 + $0x258] sm:$0xf] }
 0x1d8   : > { %v1486_v61 = vadd.f32 %v1485_v57, %v1317_v35  ;;  %v5102_v16 = vpop.f32.mrf.mxu3  ;;  %5994 = vst [vmem:[#allocation61_spill] sm:$0xff] %v5106_v20  ;;  %v2304_v57 = vmax.f32 %v1653_v14, 0.0 }
 0x1d9   : > { %5993 = vst [vmem:[#allocation60_spill] sm:$0xff] %v5102_v16 }
 0x1da   : > { %5995 = vst [vmem:[#allocation62_spill] sm:$0xff] %v5108_v25 }
 0x1dd   : > { %v1654_v36 = vpop.f32.mrf.mxu2  ;;  %v1319_v51 = vpop.f32.mrf.mxu0 }
 0x1de   : > { %v1655_v50 = vadd.f32 %v1654_v36, %v1486_v61  ;;  %v1320_v35 = vadd.f32 %v1319_v51, %v4739_v11  ;;  %v1488_v5 = vpop.f32.mrf.mxu1  ;;  %v3887_v36 = vld [vmem:[%s4604_s28 + $0x260] sm:$0xf0]  ;;  %v3886_v51 = vld [vmem:[%s4604_s28 + $0x25c] sm:$0xf] }
 0x1e0   : > { %v2306_v24 = vmax.f32 %v1655_v50, 0.0  ;;  %v1489_v1 = vadd.f32 %v1488_v5, %v1320_v35  ;;  %1358 = vmatmul.bf16.gmra.mxu0 %v5104_v4  ;;  %v5116_v46 = vpop.f32.mrf.mxu3  ;;  %v3470_v35 = vld [vmem:[%s4604_s28 + $0x264] sm:$0xf0]  ;;  %v3476_v5 = vld [vmem:[%s4604_s28 + $0x260] sm:$0xf]  ;;  %1850 = vmatmul.bf16.gmra.mxu3 %v5032_v52 }
 0x1e1   : > { %1527 = vmatmul.bf16.gmra.mxu1 %v5106_v20  ;;  %5997 = vst [vmem:[#allocation64_spill] sm:$0xff] %v5116_v46  ;;  %v3888_v20 = vld [vmem:[%s4604_s28 + $0x268] sm:$0xf0] }
 0x1e2   : > { %1696 = vmatmul.bf16.gmra.mxu2 %v5108_v25  ;;  %v5114_v61 = vpack.c.bf16 %v2306_v24, %v2304_v57  ;;  %v5128_v57 = vor.u32 %v3887_v36, %v3468_v2 }
 0x1e4   : > { %5996 = vst [vmem:[#allocation63_spill] sm:$0xff] %v5114_v61 }
 0x1e5   : > { %v1657_v19 = vpop.f32.mrf.mxu2  ;;  %v1321_v14 = vpop.f32.mrf.mxu0 }
 0x1e6   : > { %v1658_v23 = vadd.f32 %v1657_v19, %v1489_v1  ;;  %v1322_v50 = vadd.f32 %v1321_v14, %v4739_v11  ;;  %v1490_v33 = vpop.f32.mrf.mxu1  ;;  %v5130_v19 = vor.u32 %v3886_v51, %v3470_v35  ;;  %v5132_v14 = vor.u32 %v3888_v20, %v3476_v5  ;;  %v3480_v5 = vld [vmem:[%s4604_s28 + $0x270] sm:$0xf] }
 0x1e8   : > { %v1491_v42 = vadd.f32 %v1490_v33, %v1322_v50  ;;  %v5126_v25 = vpop.f32.mrf.mxu3  ;;  %5999 = vst [vmem:[#allocation66_spill] sm:$0xff] %v5130_v19  ;;  %v2308_v33 = vmax.f32 %v1658_v23, 0.0 }
 0x1e9   : > { %5998 = vst [vmem:[#allocation65_spill] sm:$0xff] %v5126_v25 }
 0x1ea   : > { %6000 = vst [vmem:[#allocation67_spill] sm:$0xff] %v5132_v14 }
 0x1ed   : > { %v1659_v24 = vpop.f32.mrf.mxu2  ;;  %v1324_v1 = vpop.f32.mrf.mxu0 }
 0x1ee   : > { %v1660_v46 = vadd.f32 %v1659_v24, %v1491_v42  ;;  %v1325_v50 = vadd.f32 %v1324_v1, %v4739_v11  ;;  %v1493_v62 = vpop.f32.mrf.mxu1  ;;  %v3890_v24 = vld [vmem:[%s4604_s28 + $0x278] sm:$0xf0]  ;;  %v3889_v1 = vld [vmem:[%s4604_s28 + $0x274] sm:$0xf] }
 0x1f0   : > { %v2310_v16 = vmax.f32 %v1660_v46, 0.0  ;;  %v1494_v61 = vadd.f32 %v1493_v62, %v1325_v50  ;;  %1363 = vmatmul.bf16.gmra.mxu0 %v5128_v57  ;;  %v5140_v42 = vpop.f32.mrf.mxu3  ;;  %v3482_v50 = vld [vmem:[%s4604_s28 + $0x27c] sm:$0xf0]  ;;  %v3488_v62 = vld [vmem:[%s4604_s28 + $0x278] sm:$0xf]  ;;  %1855 = vmatmul.bf16.gmra.mxu3 %v5056_v10 }
 0x1f1   : > { %1532 = vmatmul.bf16.gmra.mxu1 %v5130_v19  ;;  %6002 = vst [vmem:[#allocation69_spill] sm:$0xff] %v5140_v42  ;;  %v3891_v19 = vld [vmem:[%s4604_s28 + $0x280] sm:$0xf0] }
 0x1f2   : > { %1701 = vmatmul.bf16.gmra.mxu2 %v5132_v14  ;;  %v5138_v20 = vpack.c.bf16 %v2310_v16, %v2308_v33  ;;  %v5152_v33 = vor.u32 %v3890_v24, %v3480_v5  ;;  %v3923_v5 = vld [vmem:[#allocation5 + $0x84] sm:$0xf]  ;;  %v3618_v24 = vld [vmem:[#allocation5 + $0x88] sm:$0xf0] }
 0x1f4   : > { %6001 = vst [vmem:[#allocation68_spill] sm:$0xff] %v5138_v20 }
 0x1f5   : > { %v1662_v2 = vpop.f32.mrf.mxu2  ;;  %v1326_v23 = vpop.f32.mrf.mxu0 }
 0x1f6   : > { %v1663_v36 = vadd.f32 %v1662_v2, %v1494_v61  ;;  %v1327_v46 = vadd.f32 %v1326_v23, %v4739_v11  ;;  %v1495_v51 = vpop.f32.mrf.mxu1  ;;  %v5154_v2 = vor.u32 %v3889_v1, %v3482_v50  ;;  %v5156_v23 = vor.u32 %v3891_v19, %v3488_v62  ;;  %v3682_v50 = vld [vmem:[#allocation5 + $0x108] sm:$0xf0] }
 0x1f7   : > { %v3621_v19 = vor.u32 %v3923_v5, %v3618_v24  ;;  %v3892_v5 = vld [vmem:[%s4604_s28 + $0x28c] sm:$0xf]  ;;  %v3494_v24 = vld [vmem:[%s4604_s28 + $0x294] sm:$0xf0] }
 0x1f8   : > { %v1496_v35 = vadd.f32 %v1495_v51, %v1327_v46  ;;  %v5150_v14 = vpop.f32.mrf.mxu3  ;;  %6004 = vst [vmem:[#allocation71_spill] sm:$0xff] %v5154_v2  ;;  %v2312_v51 = vmax.f32 %v1663_v36, 0.0 }
 0x1f9   : > { %6003 = vst [vmem:[#allocation70_spill] sm:$0xff] %v5150_v14  ;;  %1913 = vmatpush.bf16.msrb.mxu0 %v3621_v19  ;;  %v3894_v14 = vld [vmem:[%s4604_s28 + $0x298] sm:$0xf0] }
 0x1fa   : > { %6005 = vst [vmem:[#allocation72_spill] sm:$0xff] %v5156_v23 }
 0x1fd   : > { %v1664_v16 = vpop.f32.mrf.mxu2  ;;  %v1329_v61 = vpop.f32.mrf.mxu0 }
 0x1fe   : > { %v1665_v42 = vadd.f32 %v1664_v16, %v1496_v35  ;;  %v1330_v46 = vadd.f32 %v1329_v61, %v4739_v11  ;;  %v1498_v15 = vpop.f32.mrf.mxu1  ;;  %v3939_v35 = vld [vmem:[#allocation5 + $0x104] sm:$0xf] }
 0x1ff   : > { %v3685_v36 = vor.u32 %v3939_v35, %v3682_v50 }
 0x200   : > { %v2314_v25 = vmax.f32 %v1665_v42, 0.0  ;;  %v1499_v20 = vadd.f32 %v1498_v15, %v1330_v46  ;;  %1368 = vmatmul.bf16.gmra.mxu0 %v5152_v33  ;;  %v5164_v42 = vpop.f32.mrf.mxu3  ;;  %1860 = vmatmul.bf16.gmra.mxu3 %v5080_v29 }
 0x201   : > { %1537 = vmatmul.bf16.gmra.mxu1 %v5154_v2  ;;  %6007 = vst [vmem:[#allocation74_spill] sm:$0xff] %v5164_v42  ;;  %v3500_v2 = vld [vmem:[%s4604_s28 + $0x290] sm:$0xf] }
 0x202   : > { %1706 = vmatmul.bf16.gmra.mxu2 %v5156_v23  ;;  %v5162_v1 = vpack.c.bf16 %v2314_v25, %v2312_v51  ;;  %2082 = vmatpush.bf16.msrb.mxu1 %v3685_v36  ;;  %v3492_v25 = vld [vmem:[%s4604_s28 + $0x288] sm:$0xf]  ;;  %v3893_v51 = vld [vmem:[%s4604_s28 + $0x290] sm:$0xf0]  ;;  %v5178_v36 = vor.u32 %v3892_v5, %v3494_v24 }
 0x203   : > { %v5176_v50 = vor.u32 %v3893_v51, %v3492_v25 }
 0x204   : > { %6006 = vst [vmem:[#allocation73_spill] sm:$0xff] %v5162_v1  ;;  %v3957_v1 = vld [vmem:[#allocation8 + $0x10] sm:$0xff] }
 0x205   : > { %v1667_v62 = vpop.f32.mrf.mxu2  ;;  %v1331_v61 = vpop.f32.mrf.mxu0  ;;  %6009 = vst [vmem:[#allocation76_spill] sm:$0xff] %v5178_v36  ;;  %2573 = vmatpush.bf16.msrb.mxu2 %v3957_v1 }
 0x206   : > { %v1668_v16 = vadd.f32 %v1667_v62, %v1499_v20  ;;  %v1332_v46 = vadd.f32 %v1331_v61, %v4739_v11  ;;  %v1500_v15 = vpop.f32.mrf.mxu1  ;;  %v5180_v62 = vor.u32 %v3894_v14, %v3500_v2 }
 0x208   : > { %v1501_v23 = vadd.f32 %v1500_v15, %v1332_v46  ;;  %v5174_v42 = vpop.f32.mrf.mxu3  ;;  %6010 = vst [vmem:[#allocation77_spill] sm:$0xff] %v5180_v62  ;;  %v2316_v46 = vmax.f32 %v1668_v16, 0.0 }
 0x209   : > { %6008 = vst [vmem:[#allocation75_spill] sm:$0xff] %v5174_v42  ;;  %v3965_v42 = vld [vmem:[#allocation8 + $0x50] sm:$0xff] }
 0x20a   : > { %2742 = vmatpush.bf16.msrb.mxu3 %v3965_v42 }
 0x20d   : > { %v1669_v35 = vpop.f32.mrf.mxu2  ;;  %v1334_v19 = vpop.f32.mrf.mxu0 }
 0x20e   : > { %v1670_v20 = vadd.f32 %v1669_v35, %v1501_v23  ;;  %v1335_v61 = vadd.f32 %v1334_v19, %v4739_v11  ;;  %v1503_v9 = vpop.f32.mrf.mxu1  ;;  %v3504_v35 = vld [vmem:[%s4604_s28 + $0x2a0] sm:$0xf]  ;;  %v3895_v19 = vld [vmem:[%s4604_s28 + $0x2a4] sm:$0xf] }
 0x210   : > { %v2318_v15 = vmax.f32 %v1670_v20, 0.0  ;;  %v1504_v38 = vadd.f32 %v1503_v9, %v1335_v61  ;;  %1373 = vmatmul.bf16.gmra.mxu0 %v5176_v50  ;;  %v5188_v2 = vpop.f32.mrf.mxu3  ;;  %v3896_v20 = vld [vmem:[%s4604_s28 + $0x2a8] sm:$0xf0]  ;;  %v3506_v61 = vld [vmem:[%s4604_s28 + $0x2ac] sm:$0xf0]  ;;  %1865 = vmatmul.bf16.gmra.mxu3 %v5104_v4 }
 0x211   : > { %1542 = vmatmul.bf16.gmra.mxu1 %v5178_v36  ;;  %6012 = vst [vmem:[#allocation79_spill] sm:$0xff] %v5188_v2  ;;  %v3512_v9 = vld [vmem:[%s4604_s28 + $0x2a8] sm:$0xf]  ;;  %v5200_v42 = vor.u32 %v3896_v20, %v3504_v35 }
 0x212   : > { %1711 = vmatmul.bf16.gmra.mxu2 %v5180_v62  ;;  %v5186_v14 = vpack.c.bf16 %v2318_v15, %v2316_v46  ;;  %v3897_v46 = vld [vmem:[%s4604_s28 + $0x2b0] sm:$0xf0] }
 0x214   : > { %6011 = vst [vmem:[#allocation78_spill] sm:$0xff] %v5186_v14  ;;  %v3964_v14 = vld [vmem:[#allocation8 + $0x48] sm:$0xff] }
 0x215   : > { %v1672_v23 = vpop.f32.mrf.mxu2  ;;  %v1336_v25 = vpop.f32.mrf.mxu0  ;;  %2743 = vmatpush.bf16.msrb.mxu3 %v3964_v14 }
 0x216   : > { %v1673_v16 = vadd.f32 %v1672_v23, %v1504_v38  ;;  %v1337_v51 = vadd.f32 %v1336_v25, %v4739_v11  ;;  %v1505_v5 = vpop.f32.mrf.mxu1  ;;  %v5202_v23 = vor.u32 %v3895_v19, %v3506_v61  ;;  %v5204_v25 = vor.u32 %v3897_v46, %v3512_v9  ;;  %v3516_v46 = vld [vmem:[%s4604_s28 + $0x2b8] sm:$0xf] }
 0x218   : > { %v1506_v24 = vadd.f32 %v1505_v5, %v1337_v51  ;;  %v5198_v15 = vpop.f32.mrf.mxu3  ;;  %6014 = vst [vmem:[#allocation81_spill] sm:$0xff] %v5202_v23  ;;  %v2320_v5 = vmax.f32 %v1673_v16, 0.0 }
 0x219   : > { %6013 = vst [vmem:[#allocation80_spill] sm:$0xff] %v5198_v15 }
 0x21a   : > { %6015 = vst [vmem:[#allocation82_spill] sm:$0xff] %v5204_v25 }
 0x21d   : > { %v1674_v1 = vpop.f32.mrf.mxu2  ;;  %v1339_v38 = vpop.f32.mrf.mxu0 }
 0x21e   : > { %v1675_v62 = vadd.f32 %v1674_v1, %v1506_v24  ;;  %v1340_v51 = vadd.f32 %v1339_v38, %v4739_v11  ;;  %v1508_v52 = vpop.f32.mrf.mxu1  ;;  %v3899_v1 = vld [vmem:[%s4604_s28 + $0x2c0] sm:$0xf0]  ;;  %v3898_v38 = vld [vmem:[%s4604_s28 + $0x2bc] sm:$0xf] }
 0x220   : > { %v2322_v36 = vmax.f32 %v1675_v62, 0.0  ;;  %v1509_v2 = vadd.f32 %v1508_v52, %v1340_v51  ;;  %1378 = vmatmul.bf16.gmra.mxu0 %v5200_v42  ;;  %v5212_v35 = vpop.f32.mrf.mxu3  ;;  %v3518_v51 = vld [vmem:[%s4604_s28 + $0x2c4] sm:$0xf0]  ;;  %v3524_v52 = vld [vmem:[%s4604_s28 + $0x2c0] sm:$0xf]  ;;  %1870 = vmatmul.bf16.gmra.mxu3 %v5128_v57 }
 0x221   : > { %1547 = vmatmul.bf16.gmra.mxu1 %v5202_v23  ;;  %6017 = vst [vmem:[#allocation84_spill] sm:$0xff] %v5212_v35  ;;  %v3900_v23 = vld [vmem:[%s4604_s28 + $0x2c8] sm:$0xf0] }
 0x222   : > { %1716 = vmatmul.bf16.gmra.mxu2 %v5204_v25  ;;  %v5210_v24 = vpack.c.bf16 %v2322_v36, %v2320_v5  ;;  %v5224_v5 = vor.u32 %v3899_v1, %v3516_v46 }
 0x224   : > { %6016 = vst [vmem:[#allocation83_spill] sm:$0xff] %v5210_v24 }
 0x225   : > { %v1677_v20 = vpop.f32.mrf.mxu2  ;;  %v1341_v16 = vpop.f32.mrf.mxu0 }
 0x226   : > { %v1678_v19 = vadd.f32 %v1677_v20, %v1509_v2  ;;  %v1342_v62 = vadd.f32 %v1341_v16, %v4739_v11  ;;  %v1510_v61 = vpop.f32.mrf.mxu1  ;;  %v5226_v20 = vor.u32 %v3898_v38, %v3518_v51  ;;  %v5228_v16 = vor.u32 %v3900_v23, %v3524_v52  ;;  %v3956_v52 = vld [vmem:[#allocation8 + $0x8] sm:$0xff] }
 0x227   : > { %2574 = vmatpush.bf16.msrb.mxu2 %v3956_v52 }
 0x228   : > { %v1511_v9 = vadd.f32 %v1510_v61, %v1342_v62  ;;  %v5222_v25 = vpop.f32.mrf.mxu3  ;;  %6019 = vst [vmem:[#allocation86_spill] sm:$0xff] %v5226_v20  ;;  %v2324_v61 = vmax.f32 %v1678_v19, 0.0 }
 0x229   : > { %6018 = vst [vmem:[#allocation85_spill] sm:$0xff] %v5222_v25 }
 0x22a   : > { %6020 = vst [vmem:[#allocation87_spill] sm:$0xff] %v5228_v16 }
 0x22d   : > { %v1679_v36 = vpop.f32.mrf.mxu2  ;;  %v1344_v2 = vpop.f32.mrf.mxu0 }
 0x22e   : > { %v1680_v35 = vadd.f32 %v1679_v36, %v1511_v9  ;;  %v1345_v62 = vadd.f32 %v1344_v2, %v4739_v11  ;;  %v1513_v10 = vpop.f32.mrf.mxu1  ;;  %v3528_v36 = vld [vmem:[%s4604_s28 + $0x2d0] sm:$0xf]  ;;  %v3902_v2 = vld [vmem:[%s4604_s28 + $0x2d8] sm:$0xf0] }
 0x230   : > { %v2326_v15 = vmax.f32 %v1680_v35, 0.0  ;;  %v1514_v24 = vadd.f32 %v1513_v10, %v1345_v62  ;;  %1383 = vmatmul.bf16.gmra.mxu0 %v5224_v5  ;;  %v5236_v9 = vpop.f32.mrf.mxu3  ;;  %v3901_v62 = vld [vmem:[%s4604_s28 + $0x2d4] sm:$0xf]  ;;  %v3530_v10 = vld [vmem:[%s4604_s28 + $0x2dc] sm:$0xf0]  ;;  %1875 = vmatmul.bf16.gmra.mxu3 %v5152_v33 }
 0x231   : > { %1552 = vmatmul.bf16.gmra.mxu1 %v5226_v20  ;;  %6022 = vst [vmem:[#allocation89_spill] sm:$0xff] %v5236_v9  ;;  %v3903_v20 = vld [vmem:[%s4604_s28 + $0x2e0] sm:$0xf0]  ;;  %v5248_v9 = vor.u32 %v3902_v2, %v3528_v36  ;;  %v5250_v25 = vor.u32 %v3901_v62, %v3530_v10 }
 0x232   : > { %1721 = vmatmul.bf16.gmra.mxu2 %v5228_v16  ;;  %v5234_v23 = vpack.c.bf16 %v2326_v15, %v2324_v61  ;;  %v3536_v16 = vld [vmem:[%s4604_s28 + $0x2d8] sm:$0xf] }
 0x233   : > { %6024 = vst [vmem:[#allocation91_spill] sm:$0xff] %v5250_v25 }
 0x234   : > { %6021 = vst [vmem:[#allocation88_spill] sm:$0xff] %v5234_v23 }
 0x235   : > { %v1682_v46 = vpop.f32.mrf.mxu2  ;;  %v1346_v1 = vpop.f32.mrf.mxu0 }
 0x236   : > { %v1683_v19 = vadd.f32 %v1682_v46, %v1514_v24  ;;  %v1347_v35 = vadd.f32 %v1346_v1, %v4739_v11  ;;  %v1515_v38 = vpop.f32.mrf.mxu1  ;;  %v3955_v24 = vld [vmem:[#allocation8] sm:$0xff] }
 0x237   : > { %2575 = vmatpush.bf16.msrb.mxu2 %v3955_v24  ;;  %v3905_v24 = vld [vmem:[%s4604_s28 + $0x2f0] sm:$0xf0] }
 0x238   : > { %v1516_v51 = vadd.f32 %v1515_v38, %v1347_v35  ;;  %v5246_v15 = vpop.f32.mrf.mxu3  ;;  %v5252_v35 = vor.u32 %v3903_v20, %v3536_v16  ;;  %v2328_v23 = vmax.f32 %v1683_v19, 0.0 }
 0x239   : > { %6023 = vst [vmem:[#allocation90_spill] sm:$0xff] %v5246_v15 }
 0x23a   : > { %6025 = vst [vmem:[#allocation92_spill] sm:$0xff] %v5252_v35 }
 0x23d   : > { %v1684_v61 = vpop.f32.mrf.mxu2  ;;  %v1349_v1 = vpop.f32.mrf.mxu0 }
 0x23e   : > { %v1685_v46 = vadd.f32 %v1684_v61, %v1516_v51  ;;  %v1350_v29 = vadd.f32 %v1349_v1, %v4739_v11  ;;  %v1518_v38 = vpop.f32.mrf.mxu1  ;;  %v3540_v61 = vld [vmem:[%s4604_s28 + $0x2e8] sm:$0xf]  ;;  %v3542_v1 = vld [vmem:[%s4604_s28 + $0x2f4] sm:$0xf0] }
 0x240   : > { %v2330_v52 = vmax.f32 %v1685_v46, 0.0  ;;  %v1519_v15 = vadd.f32 %v1518_v38, %v1350_v29  ;;  %1388 = vmatmul.bf16.gmra.mxu0 %v5248_v9  ;;  %v5260_v16 = vpop.f32.mrf.mxu3  ;;  %v3904_v46 = vld [vmem:[%s4604_s28 + $0x2ec] sm:$0xf]  ;;  %v3548_v29 = vld [vmem:[%s4604_s28 + $0x2f0] sm:$0xf]  ;;  %1880 = vmatmul.bf16.gmra.mxu3 %v5176_v50 }
 0x241   : > { %1557 = vmatmul.bf16.gmra.mxu1 %v5250_v25  ;;  %6027 = vst [vmem:[#allocation94_spill] sm:$0xff] %v5260_v16  ;;  %v3906_v38 = vld [vmem:[%s4604_s28 + $0x2f8] sm:$0xf0] }
 0x242   : > { %1726 = vmatmul.bf16.gmra.mxu2 %v5252_v35  ;;  %v5258_v20 = vpack.c.bf16 %v2330_v52, %v2328_v23  ;;  %v5272_v52 = vor.u32 %v3905_v24, %v3540_v61 }
 0x244   : > { %6026 = vst [vmem:[#allocation93_spill] sm:$0xff] %v5258_v20 }
 0x245   : > { %v1687_v51 = vpop.f32.mrf.mxu2  ;;  %v1351_v19 = vpop.f32.mrf.mxu0 }
 0x246   : > { %v1688_v36 = vadd.f32 %v1687_v51, %v1519_v15  ;;  %v1352_v2 = vadd.f32 %v1351_v19, %v4739_v11  ;;  %v1520_v62 = vpop.f32.mrf.mxu1  ;;  %v5274_v51 = vor.u32 %v3904_v46, %v3542_v1  ;;  %v5276_v19 = vor.u32 %v3906_v38, %v3548_v29 }
 0x248   : > { %v1521_v10 = vadd.f32 %v1520_v62, %v1352_v2  ;;  %v5270_v35 = vpop.f32.mrf.mxu3  ;;  %6028 = vst [vmem:[#allocation95_spill] sm:$0xff] %v5276_v19  ;;  %v2332_v62 = vmax.f32 %v1688_v36, 0.0 }
 0x24d   : > { %v1689_v23 = vpop.f32.mrf.mxu2  ;;  %v1354_v15 = vpop.f32.mrf.mxu0 }
 0x24e   : > { %v1690_v25 = vadd.f32 %v1689_v23, %v1521_v10  ;;  %v1355_v2 = vadd.f32 %v1354_v15, %v4739_v11  ;;  %v1523_v4 = vpop.f32.mrf.mxu1 }
 0x250   : > { %v2334_v16 = vmax.f32 %v1690_v25, 0.0  ;;  %v1524_v20 = vadd.f32 %v1523_v4, %v1355_v2  ;;  %1393 = vmatmul.bf16.gmra.mxu0 %v5272_v52  ;;  %v5284_v10 = vpop.f32.mrf.mxu3  ;;  %1885 = vmatmul.bf16.gmra.mxu3 %v5200_v42 }
 0x251   : > { %1562 = vmatmul.bf16.gmra.mxu1 %v5274_v51 }
 0x252   : > { %1731 = vmatmul.bf16.gmra.mxu2 %v5276_v19  ;;  %v5282_v61 = vpack.c.bf16 %v2334_v16, %v2332_v62 }
 0x255   : > { %v1692_v24 = vpop.f32.mrf.mxu2  ;;  %v1356_v1 = vpop.f32.mrf.mxu0 }
 0x256   : > { %v1693_v46 = vadd.f32 %v1692_v24, %v1524_v20  ;;  %v1357_v29 = vadd.f32 %v1356_v1, %v4739_v11  ;;  %v1525_v36 = vpop.f32.mrf.mxu1 }
 0x258   : > { %v1526_v25 = vadd.f32 %v1525_v36, %v1357_v29  ;;  %v5288_v38 = vpop.f32.mrf.mxu3  ;;  %v2336_v14 = vmax.f32 %v1693_v46, 0.0 }
 0x25d   : > { %v1694_v23 = vpop.f32.mrf.mxu2  ;;  %v1359_v2 = vpop.f32.mrf.mxu0 }
 0x25e   : > { %v1695_v15 = vadd.f32 %v1694_v23, %v1526_v25  ;;  %v1360_v16 = vadd.f32 %v1359_v2, %v4739_v11  ;;  %v1528_v4 = vpop.f32.mrf.mxu1 }
 0x260   : > { %v2338_v62 = vmax.f32 %v1695_v15, 0.0  ;;  %v1529_v19 = vadd.f32 %v1528_v4, %v1360_v16  ;;  %1914 = vmatmul.bf16.vlgmr.msrb.gmra.mxu0 %v4626_v21  ;;  %v5296_v57 = vpop.f32.mrf.mxu3  ;;  %1890 = vmatmul.bf16.gmra.mxu3 %v5224_v5 }
 0x261   : > { %2083 = vmatmul.bf16.vlgmr.msrb.gmra.mxu1 %v4628_v22 }
 0x262   : > { %2576 = vmatmul.bf16.vlgmr.msrb.gmra.mxu2 %v4774_v3  ;;  %v5294_v20 = vpack.c.bf16 %v2338_v62, %v2336_v14 }
 0x265   : > { %v1697_v24 = vpop.f32.mrf.mxu2  ;;  %v1361_v29 = vpop.f32.mrf.mxu0 }
 0x266   : > { %v1698_v1 = vadd.f32 %v1697_v24, %v1529_v19  ;;  %v1362_v36 = vadd.f32 %v1361_v29, %v4739_v11  ;;  %v1530_v25 = vpop.f32.mrf.mxu1 }
 0x268   : > { %v1531_v23 = vadd.f32 %v1530_v25, %v1362_v36  ;;  %v5300_v46 = vpop.f32.mrf.mxu3  ;;  %v2340_v16 = vmax.f32 %v1698_v1, 0.0 }
 0x26d   : > { %v1699_v21 = vpop.f32.mrf.mxu2  ;;  %v1364_v22 = vpop.f32.mrf.mxu0 }
 0x26e   : > { %v1700_v15 = vadd.f32 %v1699_v21, %v1531_v23  ;;  %v1365_v3 = vadd.f32 %v1364_v22, %v4739_v11  ;;  %v1533_v2 = vpop.f32.mrf.mxu1 }
 0x270   : > { %v2342_v4 = vmax.f32 %v1700_v15, 0.0  ;;  %v1534_v14 = vadd.f32 %v1533_v2, %v1365_v3  ;;  %1919 = vmatmul.bf16.gmra.mxu0 %v4641_v30  ;;  %v5308_v33 = vpop.f32.mrf.mxu3  ;;  %1895 = vmatmul.bf16.gmra.mxu3 %v5248_v9 }
 0x271   : > { %2088 = vmatmul.bf16.gmra.mxu1 %v4643_v31 }
 0x272   : > { %2581 = vmatmul.bf16.gmra.mxu2 %v4796_v49  ;;  %v5306_v19 = vpack.c.bf16 %v2342_v4, %v2340_v16 }
 0x275   : > { %v1702_v62 = vpop.f32.mrf.mxu2  ;;  %v1366_v29 = vpop.f32.mrf.mxu0 }
 0x276   : > { %v1703_v24 = vadd.f32 %v1702_v62, %v1534_v14  ;;  %v1367_v36 = vadd.f32 %v1366_v29, %v4739_v11  ;;  %v1535_v25 = vpop.f32.mrf.mxu1 }
 0x278   : > { %v1536_v23 = vadd.f32 %v1535_v25, %v1367_v36  ;;  %v5312_v1 = vpop.f32.mrf.mxu3  ;;  %v2344_v22 = vmax.f32 %v1703_v24, 0.0 }
 0x27d   : > { %v1704_v30 = vpop.f32.mrf.mxu2  ;;  %v1369_v31 = vpop.f32.mrf.mxu0 }
 0x27e   : > { %v1705_v21 = vadd.f32 %v1704_v30, %v1536_v23  ;;  %v1370_v49 = vadd.f32 %v1369_v31, %v4739_v11  ;;  %v1538_v15 = vpop.f32.mrf.mxu1 }
 0x280   : > { %v2346_v3 = vmax.f32 %v1705_v21, 0.0  ;;  %v1539_v2 = vadd.f32 %v1538_v15, %v1370_v49  ;;  %1924 = vmatmul.bf16.gmra.mxu0 %v4656_v39  ;;  %v5320_v50 = vpop.f32.mrf.mxu3  ;;  %v3963_v15 = vld [vmem:[#allocation8 + $0x40] sm:$0xff]  ;;  %1900 = vmatmul.bf16.gmra.mxu3 %v5272_v52 }
 0x281   : > { %2093 = vmatmul.bf16.gmra.mxu1 %v4658_v40  ;;  %2744 = vmatpush.bf16.msrb.mxu3 %v3963_v15 }
 0x282   : > { %2586 = vmatmul.bf16.gmra.mxu2 %v4816_v53  ;;  %v5318_v16 = vpack.c.bf16 %v2346_v3, %v2344_v22 }
 0x285   : > { %v1707_v4 = vpop.f32.mrf.mxu2  ;;  %v1371_v62 = vpop.f32.mrf.mxu0 }
 0x286   : > { %v1708_v14 = vadd.f32 %v1707_v4, %v1539_v2  ;;  %v1372_v29 = vadd.f32 %v1371_v62, %v4739_v11  ;;  %v1540_v36 = vpop.f32.mrf.mxu1 }
 0x288   : > { %v1541_v25 = vadd.f32 %v1540_v36, %v1372_v29  ;;  %v5324_v24 = vpop.f32.mrf.mxu3  ;;  %v2348_v21 = vmax.f32 %v1708_v14, 0.0 }
 0x28d   : > { %v1709_v39 = vpop.f32.mrf.mxu2  ;;  %v1374_v40 = vpop.f32.mrf.mxu0 }
 0x28e   : > { %v1710_v23 = vadd.f32 %v1709_v39, %v1541_v25  ;;  %v1375_v53 = vadd.f32 %v1374_v40, %v4739_v11  ;;  %v1543_v30 = vpop.f32.mrf.mxu1 }
 0x290   : > { %v2350_v31 = vmax.f32 %v1710_v23, 0.0  ;;  %v1544_v49 = vadd.f32 %v1543_v30, %v1375_v53  ;;  %1929 = vmatmul.bf16.gmra.mxu0 %v4671_v54  ;;  %v5332_v42 = vpop.f32.mrf.mxu3 }
 0x291   : > { %2098 = vmatmul.bf16.gmra.mxu1 %v4673_v55 }
 0x292   : > { %2591 = vmatmul.bf16.gmra.mxu2 %v4836_v28  ;;  %v5330_v22 = vpack.c.bf16 %v2350_v31, %v2348_v21 }
 0x295   : > { %v1712_v3 = vpop.f32.mrf.mxu2  ;;  %v1376_v4 = vpop.f32.mrf.mxu0 }
 0x296   : > { %v1713_v2 = vadd.f32 %v1712_v3, %v1544_v49  ;;  %v1377_v62 = vadd.f32 %v1376_v4, %v4739_v11  ;;  %v1545_v14 = vpop.f32.mrf.mxu1 }
 0x298   : > { %v1546_v29 = vadd.f32 %v1545_v14, %v1377_v62  ;;  %v5336_v54 = vpop.f32.mrf.mxu3  ;;  %v2352_v23 = vmax.f32 %v1713_v2, 0.0 }
 0x29d   : > { %v1714_v36 = vpop.f32.mrf.mxu2  ;;  %v1379_v25 = vpop.f32.mrf.mxu0 }
 0x29e   : > { %v1715_v55 = vadd.f32 %v1714_v36, %v1546_v29  ;;  %v1380_v28 = vadd.f32 %v1379_v25, %v4739_v11  ;;  %v1548_v39 = vpop.f32.mrf.mxu1 }
 0x2a0   : > { %v2354_v40 = vmax.f32 %v1715_v55, 0.0  ;;  %v1549_v53 = vadd.f32 %v1548_v39, %v1380_v28  ;;  %1934 = vmatmul.bf16.gmra.mxu0 %v4686_v63  ;;  %v5344_v5 = vpop.f32.mrf.mxu3 }
 0x2a1   : > { %2103 = vmatmul.bf16.gmra.mxu1 %v4688_v0 }
 0x2a2   : > { %2596 = vmatmul.bf16.gmra.mxu2 %v4856_v13  ;;  %v5342_v30 = vpack.c.bf16 %v2354_v40, %v2352_v23 }
 0x2a5   : > { %v1717_v21 = vpop.f32.mrf.mxu2  ;;  %v1381_v49 = vpop.f32.mrf.mxu0 }
 0x2a6   : > { %v1718_v31 = vadd.f32 %v1717_v21, %v1549_v53  ;;  %v1382_v15 = vadd.f32 %v1381_v49, %v4739_v11  ;;  %v1550_v3 = vpop.f32.mrf.mxu1 }
 0x2a8   : > { %v1551_v4 = vadd.f32 %v1550_v3, %v1382_v15  ;;  %v5348_v2 = vpop.f32.mrf.mxu3  ;;  %v2356_v29 = vmax.f32 %v1718_v31, 0.0 }
 0x2ad   : > { %v1719_v63 = vpop.f32.mrf.mxu2  ;;  %v1384_v0 = vpop.f32.mrf.mxu0 }
 0x2ae   : > { %v1720_v62 = vadd.f32 %v1719_v63, %v1551_v4  ;;  %v1385_v13 = vadd.f32 %v1384_v0, %v4739_v11  ;;  %v1553_v14 = vpop.f32.mrf.mxu1 }
 0x2b0   : > { %v2358_v36 = vmax.f32 %v1720_v62, 0.0  ;;  %v1554_v55 = vadd.f32 %v1553_v14, %v1385_v13  ;;  %1939 = vmatmul.bf16.gmra.mxu0 %v4701_v17  ;;  %v5356_v23 = vpop.f32.mrf.mxu3 }
 0x2b1   : > { %2108 = vmatmul.bf16.gmra.mxu1 %v4703_v18 }
 0x2b2   : > { %2601 = vmatmul.bf16.gmra.mxu2 %v4876_v32  ;;  %v5354_v25 = vpack.c.bf16 %v2358_v36, %v2356_v29 }
 0x2b5   : > { %v1722_v9 = vpop.f32.mrf.mxu2  ;;  %v1386_v39 = vpop.f32.mrf.mxu0 }
 0x2b6   : > { %v1723_v28 = vadd.f32 %v1722_v9, %v1554_v55  ;;  %v1387_v40 = vadd.f32 %v1386_v39, %v4739_v11  ;;  %v1555_v53 = vpop.f32.mrf.mxu1 }
 0x2b8   : > { %v1556_v21 = vadd.f32 %v1555_v53, %v1387_v40  ;;  %v2360_v32 = vmax.f32 %v1723_v28, 0.0  ;;  %v5361_v4 = vpop.f32.mrf.mxu3 }
 0x2bd   : > { %v1724_v31 = vpop.f32.mrf.mxu2  ;;  %v1389_v17 = vpop.f32.mrf.mxu0 }
 0x2be   : > { %v1725_v49 = vadd.f32 %v1724_v31, %v1556_v21  ;;  %v1390_v18 = vadd.f32 %v1389_v17, %v4739_v11  ;;  %v1558_v15 = vpop.f32.mrf.mxu1 }
 0x2c0   : > { %v2362_v3 = vmax.f32 %v1725_v49, 0.0  ;;  %v1559_v63 = vadd.f32 %v1558_v15, %v1390_v18  ;;  %1944 = vmatmul.bf16.gmra.mxu0 %v4716_v44  ;;  %v5369_v55 = vpop.f32.mrf.mxu3 }
 0x2c1   : > { %2113 = vmatmul.bf16.gmra.mxu1 %v4718_v45  ;;  %6029 = vst [vmem:[#allocation96_spill] sm:$0xff] %v5369_v55 }
 0x2c2   : > { %2606 = vmatmul.bf16.gmra.mxu2 %v4898_v47  ;;  %v5366_v62 = vpack.c.bf16 %v2362_v3, %v2360_v32 }
 0x2c5   : > { %v1727_v52 = vpop.f32.mrf.mxu2  ;;  %v1391_v13 = vpop.f32.mrf.mxu0 }
 0x2c6   : > { %v1728_v0 = vadd.f32 %v1727_v52, %v1559_v63  ;;  %v1392_v14 = vadd.f32 %v1391_v13, %v4739_v11  ;;  %v1560_v29 = vpop.f32.mrf.mxu1  ;;  %v4252_v63 = vld [vmem:[#allocation7] sm:$0x3] }
 0x2c7   : > { %v5380_v52 = vperm.slane %v4252_v63, 1 }
 0x2c8   : > { %v1561_v36 = vadd.f32 %v1560_v29, %v1392_v14  ;;  %v2364_v45 = vmax.f32 %v1728_v0, 0.0  ;;  %v5377_v31 = vpop.f32.mrf.mxu3 }
 0x2c9   : > { %6030 = vst [vmem:[#allocation97_spill] sm:$0xff] %v5377_v31 }
 0x2cd   : > { %v1729_v9 = vpop.f32.mrf.mxu2  ;;  %v1394_v39 = vpop.f32.mrf.mxu0 }
 0x2ce   : > { %v1730_v28 = vadd.f32 %v1729_v9, %v1561_v36  ;;  %v1395_v44 = vadd.f32 %v1394_v39, %v4739_v11  ;;  %v1563_v40 = vpop.f32.mrf.mxu1  ;;  %v1747_v36 = vadd.f32 %v4886_v6, %v5380_v52 }
 0x2d0   : > { %v2366_v53 = vmax.f32 %v1730_v28, 0.0  ;;  %v1564_v47 = vadd.f32 %v1563_v40, %v1395_v44  ;;  %1949 = vmatmul.bf16.gmra.mxu0 %v4732_v7  ;;  %v1749_v28 = vadd.f32 %v4900_v37, %v5380_v52  ;;  %v1752_v37 = vadd.f32 %v4910_v41, %v5380_v52 }
 0x2d1   : > { %2118 = vmatmul.bf16.gmra.mxu1 %v4734_v8  ;;  %v5382_v8 = vpop.f32.mrf.mxu3 }
 0x2d2   : > { %2611 = vmatmul.bf16.gmra.mxu2 %v4922_v43  ;;  %v5375_v21 = vpack.c.bf16 %v2366_v53, %v2364_v45  ;;  %6031 = vst [vmem:[#allocation98_spill] sm:$0xff] %v5382_v8 }
 0x2d5   : > { %v1732_v49 = vpop.f32.mrf.mxu2  ;;  %v1396_v18 = vpop.f32.mrf.mxu0 }
 0x2d6   : > { %v1733_v17 = vadd.f32 %v1732_v49, %v1564_v47  ;;  %v1397_v15 = vadd.f32 %v1396_v18, %v4739_v11  ;;  %v1565_v32 = vpop.f32.mrf.mxu1 }
 0x2d8   : > { %v1566_v3 = vadd.f32 %v1565_v32, %v1397_v15  ;;  %v2368_v14 = vmax.f32 %v1733_v17, 0.0 }
 0x2d9   : > { %v5395_v47 = vpop.f32.mrf.mxu3 }
 0x2da   : > { %6033 = vst [vmem:[#allocation100_spill] sm:$0xff] %v5395_v47 }
 0x2dd   : > { %v1734_v0 = vpop.f32.mrf.mxu2  ;;  %v1915_v13 = vpop.f32.mrf.mxu0 }
 0x2de   : > { %v1735_v7 = vadd.f32 %v1734_v0, %v1566_v3  ;;  %v2084_v43 = vpop.f32.mrf.mxu1  ;;  %v1916_v9 = vadd.f32 %v1915_v13, %v1747_v36  ;;  %v1754_v3 = vadd.f32 %v4924_v12, %v5380_v52  ;;  %v1757_v12 = vadd.f32 %v4934_v56, %v5380_v52 }
 0x2e0   : > { %v2370_v29 = vmax.f32 %v1735_v7, 0.0  ;;  %1954 = vmatmul.bf16.gmra.mxu0 %v4750_v26  ;;  %v2085_v40 = vadd.f32 %v2084_v43, %v1916_v9 }
 0x2e1   : > { %2123 = vmatmul.bf16.gmra.mxu1 %v4752_v27  ;;  %v5404_v15 = vpop.f32.mrf.mxu3 }
 0x2e2   : > { %2616 = vmatmul.bf16.gmra.mxu2 %v4946_v48  ;;  %v5389_v11 = vpack.c.bf16 %v2370_v29, %v2368_v14  ;;  %v2245_v26 = vmax.f32 %v2085_v40, 0.0  ;;  %6034 = vst [vmem:[#allocation101_spill] sm:$0xff] %v5404_v15 }
 0x2e4   : > { %6032 = vst [vmem:[#allocation99_spill] sm:$0xff] %v5389_v11 }
 0x2e5   : > { %v5393_v39 = vpop.f32.mrf.mxu2  ;;  %v1917_v44 = vpop.f32.mrf.mxu0 }
 0x2e6   : > { %v1918_v45 = vadd.f32 %v1917_v44, %v1749_v28  ;;  %v2086_v53 = vpop.f32.mrf.mxu1  ;;  %v6036_v28 = vld [vmem:[#allocation15_spill] sm:$0xff]  ;;  %v6037_v44 = vld [vmem:[#allocation38_spill] sm:$0xff] }
 0x2e8   : > { %v2087_v6 = vadd.f32 %v2086_v53, %v1918_v45  ;;  %v6038_v45 = vld [vmem:[#allocation30_spill] sm:$0xff] }
 0x2e9   : > { %v1759_v53 = vadd.f32 %v6038_v45, %v5380_v52 }
 0x2ea   : > { %v2247_v49 = vmax.f32 %v2087_v6, 0.0 }
 0x2ec   : > { %v2373_v27 = vpack.c.bf16 %v2247_v49, %v2245_v26 }
 0x2ed   : > { %v5397_v17 = vpop.f32.mrf.mxu2  ;;  %v1920_v48 = vpop.f32.mrf.mxu0 }
 0x2ee   : > { %v2089_v18 = vpop.f32.mrf.mxu1  ;;  %2745 = vmatmul.bf16.vlgmr.msrb.gmra.mxu3 %v2373_v27  ;;  %v1921_v32 = vadd.f32 %v1920_v48, %v1752_v37 }
 0x2f0   : > { %1959 = vmatmul.bf16.gmra.mxu0 %v4768_v58  ;;  %v2090_v7 = vadd.f32 %v2089_v18, %v1921_v32  ;;  %v5410_v58 = vpop.f32.mrf.mxu3 }
 0x2f1   : > { %2128 = vmatmul.bf16.gmra.mxu1 %v4770_v59  ;;  %6035 = vst [vmem:[#allocation102_spill] sm:$0xff] %v5410_v58  ;;  %v6069_v58 = vld [vmem:[#allocation25_spill] sm:$0xff] }
 0x2f2   : > { %2621 = vmatmul.bf16.gmra.mxu2 %v4970_v60  ;;  %v2249_v41 = vmax.f32 %v2090_v7, 0.0 }
 0x2f5   : > { %v5408_v63 = vpop.f32.mrf.mxu2  ;;  %v1922_v0 = vpop.f32.mrf.mxu0 }
 0x2f6   : > { %v1923_v13 = vadd.f32 %v1922_v0, %v1754_v3  ;;  %v2091_v43 = vpop.f32.mrf.mxu1 }
 0x2f8   : > { %v2092_v14 = vadd.f32 %v2091_v43, %v1923_v13  ;;  %v5423_v49 = vpop.f32.mrf.mxu3  ;;  %v6041_v43 = vld [vmem:[#allocation31_spill] sm:$0xff] }
 0x2f9   : > { %6039 = vst [vmem:[#allocation15_spill] sm:$0xff] %v5423_v49 }
 0x2fa   : > { %v2251_v29 = vmax.f32 %v2092_v14, 0.0  ;;  %v1762_v14 = vadd.f32 %v6041_v43, %v5380_v52 }
 0x2fc   : > { %v2375_v60 = vpack.c.bf16 %v2251_v29, %v2249_v41  ;;  %v6042_v41 = vld [vmem:[#allocation16_spill] sm:$0xff]  ;;  %v6043_v29 = vld [vmem:[#allocation17_spill] sm:$0xff] }
 0x2fd   : > { %v5412_v59 = vpop.f32.mrf.mxu2  ;;  %v1925_v36 = vpop.f32.mrf.mxu0 }
 0x2fe   : > { %v2094_v9 = vpop.f32.mrf.mxu1  ;;  %2750 = vmatmul.bf16.gmra.mxu3 %v2375_v60  ;;  %v1926_v40 = vadd.f32 %v1925_v36, %v1757_v12  ;;  %v6044_v60 = vld [vmem:[#allocation43_spill] sm:$0xff] }
 0x300   : > { %1964 = vmatmul.bf16.gmra.mxu0 %v4788_v34  ;;  %v2095_v27 = vadd.f32 %v2094_v9, %v1926_v40  ;;  %v5427_v13 = vpop.f32.mrf.mxu3  ;;  %v6045_v9 = vld [vmem:[#allocation34_spill] sm:$0xff] }
 0x301   : > { %2133 = vmatmul.bf16.gmra.mxu1 %v6036_v28  ;;  %6040 = vst [vmem:[#allocation38_spill] sm:$0xff] %v5427_v13  ;;  %v1764_v12 = vadd.f32 %v6045_v9, %v5380_v52  ;;  %v6062_v13 = vld [vmem:[#allocation23_spill] sm:$0xff] }
 0x302   : > { %2626 = vmatmul.bf16.gmra.mxu2 %v6037_v44  ;;  %v2253_v56 = vmax.f32 %v2095_v27, 0.0 }
 0x305   : > { %v5421_v6 = vpop.f32.mrf.mxu2  ;;  %v1927_v26 = vpop.f32.mrf.mxu0 }
 0x306   : > { %v1928_v48 = vadd.f32 %v1927_v26, %v1759_v53  ;;  %v2096_v18 = vpop.f32.mrf.mxu1 }
 0x308   : > { %v2097_v37 = vadd.f32 %v2096_v18, %v1928_v48  ;;  %v5438_v27 = vpop.f32.mrf.mxu3 }
 0x309   : > { %6046 = vst [vmem:[#allocation30_spill] sm:$0xff] %v5438_v27 }
 0x30a   : > { %v2255_v32 = vmax.f32 %v2097_v37, 0.0 }
 0x30c   : > { %v2377_v3 = vpack.c.bf16 %v2255_v32, %v2253_v56 }
 0x30d   : > { %v5425_v34 = vpop.f32.mrf.mxu2  ;;  %v1930_v0 = vpop.f32.mrf.mxu0 }
 0x30e   : > { %v2099_v7 = vpop.f32.mrf.mxu1  ;;  %2755 = vmatmul.bf16.gmra.mxu3 %v2377_v3  ;;  %v1931_v36 = vadd.f32 %v1930_v0, %v1762_v14  ;;  %v6047_v0 = vld [vmem:[#allocation35_spill] sm:$0xff]  ;;  %v6048_v14 = vld [vmem:[#allocation18_spill] sm:$0xff] }
 0x30f   : > { %v1767_v43 = vadd.f32 %v6047_v0, %v5380_v52 }
 0x310   : > { %1969 = vmatmul.bf16.gmra.mxu0 %v6042_v41  ;;  %v2100_v40 = vadd.f32 %v2099_v7, %v1931_v36  ;;  %v6049_v41 = vld [vmem:[#allocation19_spill] sm:$0xff]  ;;  %v6050_v7 = vld [vmem:[#allocation48_spill] sm:$0xff] }
 0x311   : > { %2138 = vmatmul.bf16.gmra.mxu1 %v6043_v29  ;;  %v6052_v36 = vld [vmem:[#allocation39_spill] sm:$0xff] }
 0x312   : > { %2631 = vmatmul.bf16.gmra.mxu2 %v6044_v60  ;;  %v2257_v48 = vmax.f32 %v2100_v40, 0.0  ;;  %v5447_v60 = vpop.f32.mrf.mxu3  ;;  %v1769_v9 = vadd.f32 %v6052_v36, %v5380_v52  ;;  %v6055_v36 = vld [vmem:[#allocation20_spill] sm:$0xff] }
 0x313   : > { %6051 = vst [vmem:[#allocation31_spill] sm:$0xff] %v5447_v60  ;;  %v6056_v60 = vld [vmem:[#allocation21_spill] sm:$0xff] }
 0x315   : > { %v5436_v28 = vpop.f32.mrf.mxu2  ;;  %v1932_v44 = vpop.f32.mrf.mxu0 }
 0x316   : > { %v1933_v45 = vadd.f32 %v1932_v44, %v1764_v12  ;;  %v2101_v53 = vpop.f32.mrf.mxu1 }
 0x318   : > { %v2102_v26 = vadd.f32 %v2101_v53, %v1933_v45 }
 0x31a   : > { %v2259_v18 = vmax.f32 %v2102_v26, 0.0 }
 0x31c   : > { %v2379_v56 = vpack.c.bf16 %v2259_v18, %v2257_v48 }
 0x31d   : > { %v5440_v37 = vpop.f32.mrf.mxu2  ;;  %v1935_v32 = vpop.f32.mrf.mxu0 }
 0x31e   : > { %v2104_v3 = vpop.f32.mrf.mxu1  ;;  %2760 = vmatmul.bf16.gmra.mxu3 %v2379_v56  ;;  %v1936_v29 = vadd.f32 %v1935_v32, %v1767_v43  ;;  %v6054_v43 = vld [vmem:[#allocation40_spill] sm:$0xff] }
 0x320   : > { %1974 = vmatmul.bf16.gmra.mxu0 %v6048_v14  ;;  %v2105_v40 = vadd.f32 %v2104_v3, %v1936_v29  ;;  %v6057_v3 = vld [vmem:[#allocation53_spill] sm:$0xff] }
 0x321   : > { %2143 = vmatmul.bf16.gmra.mxu1 %v6049_v41  ;;  %v5455_v41 = vpop.f32.mrf.mxu3 }
 0x322   : > { %2636 = vmatmul.bf16.gmra.mxu2 %v6050_v7  ;;  %v2261_v48 = vmax.f32 %v2105_v40, 0.0  ;;  %6053 = vst [vmem:[#allocation16_spill] sm:$0xff] %v5455_v41  ;;  %v1772_v7 = vadd.f32 %v6054_v43, %v5380_v52 }
 0x325   : > { %v5451_v12 = vpop.f32.mrf.mxu2  ;;  %v1937_v44 = vpop.f32.mrf.mxu0 }
 0x326   : > { %v1938_v45 = vadd.f32 %v1937_v44, %v1769_v9  ;;  %v2106_v53 = vpop.f32.mrf.mxu1  ;;  %v6058_v9 = vld [vmem:[#allocation44_spill] sm:$0xff] }
 0x327   : > { %v1774_v44 = vadd.f32 %v6058_v9, %v5380_v52  ;;  %v6061_v9 = vld [vmem:[#allocation22_spill] sm:$0xff] }
 0x328   : > { %v2107_v26 = vadd.f32 %v2106_v53, %v1938_v45 }
 0x32a   : > { %v2263_v18 = vmax.f32 %v2107_v26, 0.0 }
 0x32c   : > { %v2381_v0 = vpack.c.bf16 %v2263_v18, %v2261_v48  ;;  %v5466_v18 = vpop.f32.mrf.mxu3 }
 0x32d   : > { %v5453_v56 = vpop.f32.mrf.mxu2  ;;  %v1940_v14 = vpop.f32.mrf.mxu0  ;;  %6059 = vst [vmem:[#allocation17_spill] sm:$0xff] %v5466_v18 }
 0x32e   : > { %v2109_v32 = vpop.f32.mrf.mxu1  ;;  %2765 = vmatmul.bf16.gmra.mxu3 %v2381_v0  ;;  %v1941_v29 = vadd.f32 %v1940_v14, %v1772_v7  ;;  %v6060_v14 = vld [vmem:[#allocation45_spill] sm:$0xff] }
 0x32f   : > { %v1777_v7 = vadd.f32 %v6060_v14, %v5380_v52 }
 0x330   : > { %1979 = vmatmul.bf16.gmra.mxu0 %v6055_v36  ;;  %v2110_v53 = vadd.f32 %v2109_v32, %v1941_v29  ;;  %v6063_v32 = vld [vmem:[#allocation58_spill] sm:$0xff] }
 0x331   : > { %2148 = vmatmul.bf16.gmra.mxu1 %v6056_v60 }
 0x332   : > { %2641 = vmatmul.bf16.gmra.mxu2 %v6057_v3  ;;  %v2265_v43 = vmax.f32 %v2110_v53, 0.0 }
 0x334   : > { %v5475_v29 = vpop.f32.mrf.mxu3 }
 0x335   : > { %v5464_v40 = vpop.f32.mrf.mxu2  ;;  %v1942_v45 = vpop.f32.mrf.mxu0  ;;  %6064 = vst [vmem:[#allocation43_spill] sm:$0xff] %v5475_v29 }
 0x336   : > { %v1943_v26 = vadd.f32 %v1942_v45, %v1774_v44  ;;  %v2111_v48 = vpop.f32.mrf.mxu1  ;;  %v6065_v45 = vld [vmem:[#allocation49_spill] sm:$0xff] }
 0x337   : > { %v1779_v53 = vadd.f32 %v6065_v45, %v5380_v52  ;;  %v6068_v45 = vld [vmem:[#allocation24_spill] sm:$0xff] }
 0x338   : > { %v2112_v0 = vadd.f32 %v2111_v48, %v1943_v26 }
 0x33a   : > { %v2267_v41 = vmax.f32 %v2112_v0, 0.0 }
 0x33c   : > { %v2383_v60 = vpack.c.bf16 %v2267_v41, %v2265_v43 }
 0x33d   : > { %v5468_v36 = vpop.f32.mrf.mxu2  ;;  %v1945_v27 = vpop.f32.mrf.mxu0 }
 0x33e   : > { %v2114_v3 = vpop.f32.mrf.mxu1  ;;  %2770 = vmatmul.bf16.gmra.mxu3 %v2383_v60  ;;  %v1946_v44 = vadd.f32 %v1945_v27, %v1777_v7  ;;  %v6067_v27 = vld [vmem:[#allocation50_spill] sm:$0xff] }
 0x33f   : > { %v1782_v7 = vadd.f32 %v6067_v27, %v5380_v52 }
 0x340   : > { %1984 = vmatmul.bf16.gmra.mxu0 %v6061_v9  ;;  %v2115_v48 = vadd.f32 %v2114_v3, %v1946_v44  ;;  %v5481_v9 = vpop.f32.mrf.mxu3  ;;  %v6070_v3 = vld [vmem:[#allocation63_spill] sm:$0xff] }
 0x341   : > { %2153 = vmatmul.bf16.gmra.mxu1 %v6062_v13  ;;  %6066 = vst [vmem:[#allocation34_spill] sm:$0xff] %v5481_v9 }
 0x342   : > { %2646 = vmatmul.bf16.gmra.mxu2 %v6063_v32  ;;  %v2269_v14 = vmax.f32 %v2115_v48, 0.0 }
 0x345   : > { %v5479_v26 = vpop.f32.mrf.mxu2  ;;  %v1947_v41 = vpop.f32.mrf.mxu0 }
 0x346   : > { %v1948_v0 = vadd.f32 %v1947_v41, %v1779_v53  ;;  %v2116_v43 = vpop.f32.mrf.mxu1  ;;  %v6071_v53 = vld [vmem:[#allocation54_spill] sm:$0xff] }
 0x347   : > { %v1784_v41 = vadd.f32 %v6071_v53, %v5380_v52  ;;  %v6075_v53 = vld [vmem:[#allocation26_spill] sm:$0xff] }
 0x348   : > { %v2117_v60 = vadd.f32 %v2116_v43, %v1948_v0  ;;  %v5492_v48 = vpop.f32.mrf.mxu3 }
 0x349   : > { %6072 = vst [vmem:[#allocation35_spill] sm:$0xff] %v5492_v48 }
 0x34a   : > { %v2271_v18 = vmax.f32 %v2117_v60, 0.0 }
 0x34c   : > { %v2385_v13 = vpack.c.bf16 %v2271_v18, %v2269_v14 }
 0x34d   : > { %v5483_v49 = vpop.f32.mrf.mxu2  ;;  %v1950_v32 = vpop.f32.mrf.mxu0 }
 0x34e   : > { %v2119_v29 = vpop.f32.mrf.mxu1  ;;  %2775 = vmatmul.bf16.gmra.mxu3 %v2385_v13  ;;  %v1951_v44 = vadd.f32 %v1950_v32, %v1782_v7  ;;  %v6074_v32 = vld [vmem:[#allocation55_spill] sm:$0xff] }
 0x34f   : > { %v1787_v7 = vadd.f32 %v6074_v32, %v5380_v52 }
 0x350   : > { %1989 = vmatmul.bf16.gmra.mxu0 %v6068_v45  ;;  %v2120_v0 = vadd.f32 %v2119_v29, %v1951_v44  ;;  %v6076_v29 = vld [vmem:[#allocation27_spill] sm:$0xff]  ;;  %v6077_v44 = vld [vmem:[#allocation68_spill] sm:$0xff] }
 0x351   : > { %2158 = vmatmul.bf16.gmra.mxu1 %v6069_v58 }
 0x352   : > { %2651 = vmatmul.bf16.gmra.mxu2 %v6070_v3  ;;  %v2273_v27 = vmax.f32 %v2120_v0, 0.0  ;;  %v5496_v3 = vpop.f32.mrf.mxu3 }
 0x353   : > { %6073 = vst [vmem:[#allocation18_spill] sm:$0xff] %v5496_v3 }
 0x355   : > { %v1952_v18 = vpop.f32.mrf.mxu0  ;;  %v5494_v14 = vpop.f32.mrf.mxu2 }
 0x356   : > { %v1953_v43 = vadd.f32 %v1952_v18, %v1784_v41  ;;  %v2121_v60 = vpop.f32.mrf.mxu1  ;;  %v6078_v18 = vld [vmem:[#allocation59_spill] sm:$0xff] }
 0x358   : > { %v2122_v13 = vadd.f32 %v2121_v60, %v1953_v43 }
 0x35a   : > { %v2275_v9 = vmax.f32 %v2122_v13, 0.0 }
 0x35c   : > { %v2387_v45 = vpack.c.bf16 %v2275_v9, %v2273_v27  ;;  %v1789_v9 = vadd.f32 %v6078_v18, %v5380_v52 }
 0x35d   : > { %v1955_v15 = vpop.f32.mrf.mxu0  ;;  %v5501_v48 = vpop.f32.mrf.mxu2 }
 0x35e   : > { %v2124_v58 = vpop.f32.mrf.mxu1  ;;  %2780 = vmatmul.bf16.gmra.mxu3 %v2387_v45  ;;  %v1956_v41 = vadd.f32 %v1955_v15, %v1787_v7  ;;  %v5507_v45 = vpop.f32.mrf.mxu3  ;;  %v6080_v15 = vld [vmem:[#allocation60_spill] sm:$0xff] }
 0x35f   : > { %6079 = vst [vmem:[#allocation19_spill] sm:$0xff] %v5507_v45  ;;  %v1792_v7 = vadd.f32 %v6080_v15, %v5380_v52 }
 0x360   : > { %1994 = vmatmul.bf16.gmra.mxu0 %v6075_v53  ;;  %v2125_v43 = vadd.f32 %v2124_v58, %v1956_v41  ;;  %v6082_v58 = vld [vmem:[#allocation29_spill] sm:$0xff] }
 0x361   : > { %2163 = vmatmul.bf16.gmra.mxu1 %v6076_v29  ;;  %v6083_v41 = vld [vmem:[#allocation73_spill] sm:$0xff] }
 0x362   : > { %2656 = vmatmul.bf16.gmra.mxu2 %v6077_v44  ;;  %v2277_v32 = vmax.f32 %v2125_v43, 0.0  ;;  %v6081_v44 = vld [vmem:[#allocation28_spill] sm:$0xff] }
 0x365   : > { %v1957_v0 = vpop.f32.mrf.mxu0  ;;  %v5509_v53 = vpop.f32.mrf.mxu2 }
 0x366   : > { %v1958_v60 = vadd.f32 %v1957_v0, %v1789_v9  ;;  %v2126_v13 = vpop.f32.mrf.mxu1  ;;  %v6084_v0 = vld [vmem:[#allocation64_spill] sm:$0xff] }
 0x367   : > { %v1794_v43 = vadd.f32 %v6084_v0, %v5380_v52 }
 0x368   : > { %v2127_v27 = vadd.f32 %v2126_v13, %v1958_v60 }
 0x36a   : > { %v2279_v3 = vmax.f32 %v2127_v27, 0.0 }
 0x36c   : > { %v2389_v47 = vpack.c.bf16 %v2279_v3, %v2277_v32  ;;  %v5521_v3 = vld [vmem:[%s5896_s4] ss:$0 sm:$0xff] }
 0x36d   : > { %v1960_v8 = vpop.f32.mrf.mxu0  ;;  %v2578_v15 = vadd.f32 %v5521_v3, %v5393_v39 }
 0x36e   : > { %v2129_v29 = vpop.f32.mrf.mxu1  ;;  %2785 = vmatmul.bf16.gmra.mxu3 %v2389_v47  ;;  %v1961_v9 = vadd.f32 %v1960_v8, %v1792_v7  ;;  %v5523_v47 = vpop.f32.mrf.mxu2  ;;  %v2580_v8 = vadd.f32 %v5521_v3, %v5397_v17  ;;  %v6085_v17 = vld [vmem:[#allocation65_spill] sm:$0xff] }
 0x370   : > { %1999 = vmatmul.bf16.gmra.mxu0 %v6081_v44  ;;  %v2130_v13 = vadd.f32 %v2129_v29, %v1961_v9  ;;  %v1797_v9 = vadd.f32 %v6085_v17, %v5380_v52 }
 0x371   : > { %2168 = vmatmul.bf16.gmra.mxu1 %v6082_v58  ;;  %v2746_v18 = vpop.f32.mrf.mxu3 }
 0x372   : > { %2661 = vmatmul.bf16.gmra.mxu2 %v6083_v41  ;;  %v2281_v58 = vmax.f32 %v2130_v13, 0.0  ;;  %v2747_v41 = vadd.f32 %v2746_v18, %v2578_v15  ;;  %v6088_v18 = vld [vmem:[#allocation78_spill] sm:$0xff] }
 0x375   : > { %v1962_v60 = vpop.f32.mrf.mxu0 }
 0x376   : > { %v1963_v27 = vadd.f32 %v1962_v60, %v1794_v43  ;;  %v2131_v32 = vpop.f32.mrf.mxu1  ;;  %v5533_v39 = vpop.f32.mrf.mxu2  ;;  %v6086_v43 = vld [vmem:[#allocation32_spill] sm:$0xff]  ;;  %v6087_v60 = vld [vmem:[#allocation33_spill] sm:$0xff] }
 0x378   : > { %v2132_v7 = vadd.f32 %v2131_v32, %v1963_v27  ;;  %v6089_v27 = vld [vmem:[#allocation69_spill] sm:$0xff] }
 0x379   : > { %v2748_v44 = vpop.f32.mrf.mxu3  ;;  %v1799_v32 = vadd.f32 %v6089_v27, %v5380_v52 }
 0x37a   : > { %v2283_v0 = vmax.f32 %v2132_v7, 0.0  ;;  %v2749_v45 = vadd.f32 %v2748_v44, %v2580_v8  ;;  %v2583_v7 = vadd.f32 %v5521_v3, %v5408_v63  ;;  %v2585_v44 = vadd.f32 %v5521_v3, %v5412_v59  ;;  %v6092_v59 = vld [vmem:[#allocation37_spill] sm:$0xff] }
 0x37c   : > { %v3975_v31 = vpack.c.bf16 %v2749_v45, %v2747_v41  ;;  %v2391_v55 = vpack.c.bf16 %v2283_v0, %v2281_v58 }
 0x37d   : > { %v1965_v11 = vpop.f32.mrf.mxu0 }
 0x37e   : > { %3976 = vst [vmem:[%s5530_s17] sm:$0xff] %v3975_v31   ;;  %v2134_v29 = vpop.f32.mrf.mxu1  ;;  %2790 = vmatmul.bf16.gmra.mxu3 %v2391_v55  ;;  %v1966_v13 = vadd.f32 %v1965_v11, %v1797_v9  ;;  %v5546_v41 = vpop.f32.mrf.mxu2 }
 0x380   : > { %2004 = vmatmul.bf16.gmra.mxu0 %v6086_v43  ;;  %v2135_v31 = vadd.f32 %v2134_v29, %v1966_v13  ;;  %v6090_v13 = vld [vmem:[#allocation70_spill] sm:$0xff] }
 0x381   : > { %2173 = vmatmul.bf16.gmra.mxu1 %v6087_v60  ;;  %v2751_v45 = vpop.f32.mrf.mxu3  ;;  %v1802_v63 = vadd.f32 %v6090_v13, %v5380_v52 }
 0x382   : > { %2666 = vmatmul.bf16.gmra.mxu2 %v6088_v18  ;;  %v2285_v17 = vmax.f32 %v2135_v31, 0.0  ;;  %v2752_v11 = vadd.f32 %v2751_v45, %v2583_v7 }
 0x385   : > { %v1967_v15 = vpop.f32.mrf.mxu0 }
 0x386   : > { %v1968_v55 = vadd.f32 %v1967_v15, %v1799_v32  ;;  %v2136_v8 = vpop.f32.mrf.mxu1  ;;  %v6091_v32 = vld [vmem:[#allocation36_spill] sm:$0xff]  ;;  %v6093_v15 = vld [vmem:[#allocation83_spill] sm:$0xff]  ;;  %v5554_v45 = vpop.f32.mrf.mxu2 }
 0x388   : > { %v2137_v58 = vadd.f32 %v2136_v8, %v1968_v55  ;;  %v6094_v8 = vld [vmem:[#allocation74_spill] sm:$0xff] }
 0x389   : > { %v2753_v0 = vpop.f32.mrf.mxu3  ;;  %v1804_v7 = vadd.f32 %v6094_v8, %v5380_v52 }
 0x38a   : > { %v2287_v9 = vmax.f32 %v2137_v58, 0.0  ;;  %v2754_v43 = vadd.f32 %v2753_v0, %v2585_v44 }
 0x38c   : > { %v3980_v60 = vpack.c.bf16 %v2754_v43, %v2752_v11  ;;  %v2393_v18 = vpack.c.bf16 %v2287_v9, %v2285_v17  ;;  %v2588_v11 = vadd.f32 %v5521_v3, %v5421_v6  ;;  %v2590_v9 = vadd.f32 %v5521_v3, %v5425_v34  ;;  %v6097_v34 = vld [vmem:[#allocation42_spill] sm:$0xff] }
 0x38d   : > { %v1970_v27 = vpop.f32.mrf.mxu0 }
 0x38e   : > { %4132 = vst [vmem:[%s5530_s17 + $0x8] sm:$0xff] %v3980_v60   ;;  %v2139_v29 = vpop.f32.mrf.mxu1  ;;  %2795 = vmatmul.bf16.gmra.mxu3 %v2393_v18  ;;  %v1971_v31 = vadd.f32 %v1970_v27, %v1802_v63 }
 0x390   : > { %2009 = vmatmul.bf16.gmra.mxu0 %v6091_v32  ;;  %v2140_v58 = vadd.f32 %v2139_v29, %v1971_v31  ;;  %v6095_v31 = vld [vmem:[#allocation75_spill] sm:$0xff] }
 0x391   : > { %2178 = vmatmul.bf16.gmra.mxu1 %v6092_v59  ;;  %v2756_v55 = vpop.f32.mrf.mxu3  ;;  %v1807_v6 = vadd.f32 %v6095_v31, %v5380_v52 }
 0x392   : > { %2671 = vmatmul.bf16.gmra.mxu2 %v6093_v15  ;;  %v2289_v18 = vmax.f32 %v2140_v58, 0.0  ;;  %v2757_v27 = vadd.f32 %v2756_v55, %v2588_v11  ;;  %v5562_v15 = vpop.f32.mrf.mxu2 }
 0x395   : > { %v1972_v44 = vpop.f32.mrf.mxu0 }
 0x396   : > { %v1973_v0 = vadd.f32 %v1972_v44, %v1804_v7  ;;  %v2141_v17 = vpop.f32.mrf.mxu1  ;;  %v6096_v7 = vld [vmem:[#allocation41_spill] sm:$0xff]  ;;  %v6098_v44 = vld [vmem:[#allocation88_spill] sm:$0xff] }
 0x398   : > { %v2142_v43 = vadd.f32 %v2141_v17, %v1973_v0  ;;  %v6099_v0 = vld [vmem:[#allocation79_spill] sm:$0xff] }
 0x399   : > { %v2758_v60 = vpop.f32.mrf.mxu3  ;;  %v1809_v17 = vadd.f32 %v6099_v0, %v5380_v52 }
 0x39a   : > { %v2291_v13 = vmax.f32 %v2142_v43, 0.0  ;;  %v2759_v63 = vadd.f32 %v2758_v60, %v2590_v9 }
 0x39c   : > { %v3985_v32 = vpack.c.bf16 %v2759_v63, %v2757_v27  ;;  %v2395_v59 = vpack.c.bf16 %v2291_v13, %v2289_v18  ;;  %v5572_v18 = vpop.f32.mrf.mxu2  ;;  %v2593_v27 = vadd.f32 %v5521_v3, %v5436_v28  ;;  %v2595_v13 = vadd.f32 %v5521_v3, %v5440_v37  ;;  %v6102_v37 = vld [vmem:[#allocation47_spill] sm:$0xff] }
 0x39d   : > { %v1975_v8 = vpop.f32.mrf.mxu0 }
 0x39e   : > { %4133 = vst [vmem:[%s5530_s17 + $0x10] sm:$0xff] %v3985_v32   ;;  %v2144_v29 = vpop.f32.mrf.mxu1  ;;  %2800 = vmatmul.bf16.gmra.mxu3 %v2395_v59  ;;  %v1976_v58 = vadd.f32 %v1975_v8, %v1807_v6 }
 0x3a0   : > { %2014 = vmatmul.bf16.gmra.mxu0 %v6096_v7  ;;  %v2145_v9 = vadd.f32 %v2144_v29, %v1976_v58  ;;  %v6100_v58 = vld [vmem:[#allocation80_spill] sm:$0xff] }
 0x3a1   : > { %2183 = vmatmul.bf16.gmra.mxu1 %v6097_v34  ;;  %v2761_v55 = vpop.f32.mrf.mxu3  ;;  %v1812_v0 = vadd.f32 %v6100_v58, %v5380_v52 }
 0x3a2   : > { %2676 = vmatmul.bf16.gmra.mxu2 %v6098_v44  ;;  %v2293_v59 = vmax.f32 %v2145_v9, 0.0  ;;  %v2762_v8 = vadd.f32 %v2761_v55, %v2593_v27 }
 0x3a4   : > { %v5582_v28 = vpop.f32.mrf.mxu2 }
 0x3a5   : > { %v1977_v11 = vpop.f32.mrf.mxu0 }
 0x3a6   : > { %v1978_v43 = vadd.f32 %v1977_v11, %v1809_v17  ;;  %v2146_v60 = vpop.f32.mrf.mxu1  ;;  %v6101_v17 = vld [vmem:[#allocation46_spill] sm:$0xff]  ;;  %v6103_v11 = vld [vmem:[#allocation93_spill] sm:$0xff] }
 0x3a8   : > { %v2147_v63 = vadd.f32 %v2146_v60, %v1978_v43  ;;  %v6104_v43 = vld [vmem:[#allocation84_spill] sm:$0xff] }
 0x3a9   : > { %v2763_v32 = vpop.f32.mrf.mxu3  ;;  %v1814_v60 = vadd.f32 %v6104_v43, %v5380_v52  ;;  %v6106_v43 = vld [vmem:[#allocation51_spill] sm:$0xff] }
 0x3aa   : > { %v2295_v31 = vmax.f32 %v2147_v63, 0.0  ;;  %v2764_v6 = vadd.f32 %v2763_v32, %v2595_v13 }
 0x3ac   : > { %v3990_v7 = vpack.c.bf16 %v2764_v6, %v2762_v8  ;;  %v2397_v34 = vpack.c.bf16 %v2295_v31, %v2293_v59  ;;  %v2598_v59 = vadd.f32 %v5521_v3, %v5451_v12  ;;  %v2600_v8 = vadd.f32 %v5521_v3, %v5453_v56  ;;  %v6107_v56 = vld [vmem:[#allocation52_spill] sm:$0xff] }
 0x3ad   : > { %v1980_v44 = vpop.f32.mrf.mxu0 }
 0x3ae   : > { %4134 = vst [vmem:[%s5530_s17 + $0x18] sm:$0xff] %v3990_v7   ;;  %v2149_v29 = vpop.f32.mrf.mxu1  ;;  %2805 = vmatmul.bf16.gmra.mxu3 %v2397_v34  ;;  %v1981_v9 = vadd.f32 %v1980_v44, %v1812_v0  ;;  %v5592_v0 = vpop.f32.mrf.mxu2 }
 0x3b0   : > { %2019 = vmatmul.bf16.gmra.mxu0 %v6101_v17  ;;  %v2150_v13 = vadd.f32 %v2149_v29, %v1981_v9  ;;  %v6105_v9 = vld [vmem:[#allocation85_spill] sm:$0xff] }
 0x3b1   : > { %2188 = vmatmul.bf16.gmra.mxu1 %v6102_v37  ;;  %v2766_v55 = vpop.f32.mrf.mxu3  ;;  %v1817_v12 = vadd.f32 %v6105_v9, %v5380_v52 }
 0x3b2   : > { %2681 = vmatmul.bf16.gmra.mxu2 %v6103_v11  ;;  %v2297_v7 = vmax.f32 %v2150_v13, 0.0  ;;  %v2767_v34 = vadd.f32 %v2766_v55, %v2598_v59 }
 0x3b5   : > { %v1982_v27 = vpop.f32.mrf.mxu0 }
 0x3b6   : > { %v1983_v63 = vadd.f32 %v1982_v27, %v1814_v60  ;;  %v2151_v32 = vpop.f32.mrf.mxu1  ;;  %v6108_v27 = vld [vmem:[#allocation89_spill] sm:$0xff] }
 0x3b7   : > { %v1819_v13 = vadd.f32 %v6108_v27, %v5380_v52 }
 0x3b8   : > { %v2152_v31 = vadd.f32 %v2151_v32, %v1983_v63  ;;  %v5602_v63 = vpop.f32.mrf.mxu2 }
 0x3b9   : > { %v2768_v6 = vpop.f32.mrf.mxu3 }
 0x3ba   : > { %v2299_v58 = vmax.f32 %v2152_v31, 0.0  ;;  %v2769_v44 = vadd.f32 %v2768_v6, %v2600_v8  ;;  %v2603_v6 = vadd.f32 %v5521_v3, %v5464_v40 }
 0x3bc   : > { %v3995_v17 = vpack.c.bf16 %v2769_v44, %v2767_v34  ;;  %v2399_v37 = vpack.c.bf16 %v2299_v58, %v2297_v7  ;;  %v2605_v7 = vadd.f32 %v5521_v3, %v5468_v36  ;;  %v6111_v36 = vld [vmem:[#allocation57_spill] sm:$0xff] }
 0x3bd   : > { %v1985_v11 = vpop.f32.mrf.mxu0 }
 0x3be   : > { %4135 = vst [vmem:[%s5530_s17 + $0x20] sm:$0xff] %v3995_v17   ;;  %v2154_v29 = vpop.f32.mrf.mxu1  ;;  %2810 = vmatmul.bf16.gmra.mxu3 %v2399_v37  ;;  %v1986_v60 = vadd.f32 %v1985_v11, %v1817_v12 }
 0x3c0   : > { %2024 = vmatmul.bf16.gmra.mxu0 %v6106_v43  ;;  %v2155_v59 = vadd.f32 %v2154_v29, %v1986_v60  ;;  %v5609_v29 = vpop.f32.mrf.mxu2  ;;  %v6110_v60 = vld [vmem:[#allocation56_spill] sm:$0xff] }
 0x3c1   : > { %2193 = vmatmul.bf16.gmra.mxu1 %v6107_v56  ;;  %v2771_v55 = vpop.f32.mrf.mxu3  ;;  %v6109_v56 = vld [vmem:[#allocation90_spill] sm:$0xff] }
 0x3c2   : > { %2686 = vmatmul.bf16.gmra.mxu2 %v5282_v61  ;;  %v2301_v58 = vmax.f32 %v2155_v59, 0.0  ;;  %v2772_v44 = vadd.f32 %v2771_v55, %v2603_v6  ;;  %v1822_v40 = vadd.f32 %v6109_v56, %v5380_v52 }
 0x3c5   : > { %v1987_v32 = vpop.f32.mrf.mxu0 }
 0x3c6   : > { %v1988_v8 = vadd.f32 %v1987_v32, %v1819_v13  ;;  %v2156_v31 = vpop.f32.mrf.mxu1  ;;  %v6112_v13 = vld [vmem:[#allocation94_spill] sm:$0xff] }
 0x3c7   : > { %v1824_v32 = vadd.f32 %v6112_v13, %v5380_v52 }
 0x3c8   : > { %v2157_v34 = vadd.f32 %v2156_v31, %v1988_v8 }
 0x3c9   : > { %v2773_v61 = vpop.f32.mrf.mxu3 }
 0x3ca   : > { %v2303_v17 = vmax.f32 %v2157_v34, 0.0  ;;  %v2774_v37 = vadd.f32 %v2773_v61, %v2605_v7  ;;  %v2608_v7 = vadd.f32 %v5521_v3, %v5479_v26  ;;  %v2610_v34 = vadd.f32 %v5521_v3, %v5483_v49  ;;  %v6114_v49 = vld [vmem:[#allocation62_spill] sm:$0xff] }
 0x3cb   : > { %v1827_v26 = vadd.f32 %v5270_v35, %v5380_v52  ;;  %v2613_v35 = vadd.f32 %v5521_v3, %v5494_v14  ;;  %v1832_v14 = vadd.f32 %v5288_v38, %v5380_v52  ;;  %v2618_v38 = vadd.f32 %v5521_v3, %v5509_v53 }
 0x3cc   : > { %v4000_v11 = vpack.c.bf16 %v2774_v37, %v2772_v44  ;;  %v2401_v9 = vpack.c.bf16 %v2303_v17, %v2301_v58  ;;  %v5622_v58 = vpop.f32.mrf.mxu2 }
 0x3cd   : > { %v1990_v12 = vpop.f32.mrf.mxu0 }
 0x3ce   : > { %4136 = vst [vmem:[%s5530_s17 + $0x28] sm:$0xff] %v4000_v11   ;;  %v2159_v43 = vpop.f32.mrf.mxu1  ;;  %2815 = vmatmul.bf16.gmra.mxu3 %v2401_v9  ;;  %v1991_v27 = vadd.f32 %v1990_v12, %v1822_v40  ;;  %v6113_v40 = vld [vmem:[#allocation61_spill] sm:$0xff] }
 0x3d0   : > { %2029 = vmatmul.bf16.gmra.mxu0 %v6110_v60  ;;  %v2160_v8 = vadd.f32 %v2159_v43, %v1991_v27  ;;  %v1829_v27 = vadd.f32 %v5284_v10, %v5380_v52 }
 0x3d1   : > { %2198 = vmatmul.bf16.gmra.mxu1 %v6111_v36  ;;  %v2776_v55 = vpop.f32.mrf.mxu3 }
 0x3d2   : > { %2691 = vmatmul.bf16.gmra.mxu2 %v5294_v20  ;;  %v2305_v44 = vmax.f32 %v2160_v8, 0.0  ;;  %v2777_v17 = vadd.f32 %v2776_v55, %v2608_v7 }
 0x3d4   : > { %v5630_v55 = vpop.f32.mrf.mxu2 }
 0x3d5   : > { %v1992_v59 = vpop.f32.mrf.mxu0 }
 0x3d6   : > { %v1993_v31 = vadd.f32 %v1992_v59, %v1824_v32  ;;  %v2161_v6 = vpop.f32.mrf.mxu1 }
 0x3d8   : > { %v2162_v61 = vadd.f32 %v2161_v6, %v1993_v31  ;;  %v2615_v31 = vadd.f32 %v5521_v3, %v5501_v48  ;;  %v6116_v48 = vld [vmem:[#allocation67_spill] sm:$0xff] }
 0x3d9   : > { %v2778_v20 = vpop.f32.mrf.mxu3 }
 0x3da   : > { %v2307_v37 = vmax.f32 %v2162_v61, 0.0  ;;  %v2779_v11 = vadd.f32 %v2778_v20, %v2610_v34 }
 0x3dc   : > { %v4005_v9 = vpack.c.bf16 %v2779_v11, %v2777_v17  ;;  %v2403_v12 = vpack.c.bf16 %v2307_v37, %v2305_v44  ;;  %v5638_v10 = vpop.f32.mrf.mxu2 }
 0x3dd   : > { %v1995_v56 = vpop.f32.mrf.mxu0 }
 0x3de   : > { %4137 = vst [vmem:[%s5530_s17 + $0x30] sm:$0xff] %v4005_v9   ;;  %v2164_v43 = vpop.f32.mrf.mxu1  ;;  %2820 = vmatmul.bf16.gmra.mxu3 %v2403_v12  ;;  %v1996_v36 = vadd.f32 %v1995_v56, %v1827_v26  ;;  %v6115_v9 = vld [vmem:[#allocation66_spill] sm:$0xff] }
 0x3e0   : > { %2034 = vmatmul.bf16.gmra.mxu0 %v6113_v40  ;;  %v2165_v32 = vadd.f32 %v2164_v43, %v1996_v36  ;;  %v1834_v43 = vadd.f32 %v5296_v57, %v5380_v52 }
 0x3e1   : > { %2203 = vmatmul.bf16.gmra.mxu1 %v6114_v49  ;;  %v2781_v60 = vpop.f32.mrf.mxu3 }
 0x3e2   : > { %2696 = vmatmul.bf16.gmra.mxu2 %v5306_v19  ;;  %v2309_v7 = vmax.f32 %v2165_v32, 0.0  ;;  %v2782_v34 = vadd.f32 %v2781_v60, %v2613_v35 }
 0x3e4   : > { %v5648_v36 = vpop.f32.mrf.mxu2 }
 0x3e5   : > { %v1997_v13 = vpop.f32.mrf.mxu0 }
 0x3e6   : > { %v1998_v59 = vadd.f32 %v1997_v13, %v1829_v27  ;;  %v2166_v8 = vpop.f32.mrf.mxu1  ;;  %v2620_v27 = vadd.f32 %v5521_v3, %v5523_v47  ;;  %v6118_v47 = vld [vmem:[#allocation72_spill] sm:$0xff] }
 0x3e8   : > { %v2167_v6 = vadd.f32 %v2166_v8, %v1998_v59 }
 0x3e9   : > { %v2783_v19 = vpop.f32.mrf.mxu3 }
 0x3ea   : > { %v2311_v61 = vmax.f32 %v2167_v6, 0.0  ;;  %v2784_v20 = vadd.f32 %v2783_v19, %v2615_v31 }
 0x3ec   : > { %v4010_v44 = vpack.c.bf16 %v2784_v20, %v2782_v34  ;;  %v2405_v17 = vpack.c.bf16 %v2311_v61, %v2309_v7  ;;  %v1837_v7 = vadd.f32 %v5300_v46, %v5380_v52  ;;  %v6117_v34 = vld [vmem:[#allocation71_spill] sm:$0xff]  ;;  %v5658_v53 = vpop.f32.mrf.mxu2  ;;  %v2623_v46 = vadd.f32 %v5521_v3, %v5533_v39 }
 0x3ed   : > { %v2000_v37 = vpop.f32.mrf.mxu0  ;;  %v1842_v39 = vadd.f32 %v5312_v1, %v5380_v52  ;;  %v2628_v1 = vadd.f32 %v5521_v3, %v5554_v45  ;;  %v1847_v45 = vadd.f32 %v5324_v24, %v5380_v52  ;;  %v2635_v24 = vadd.f32 %v5521_v3, %v5582_v28  ;;  %v6124_v28 = vld [vmem:[#allocation87_spill] sm:$0xff] }
 0x3ee   : > { %4138 = vst [vmem:[%s5530_s17 + $0x38] sm:$0xff] %v4010_v44   ;;  %v2169_v11 = vpop.f32.mrf.mxu1  ;;  %2825 = vmatmul.bf16.gmra.mxu3 %v2405_v17  ;;  %v2001_v56 = vadd.f32 %v2000_v37, %v1832_v14  ;;  %v1839_v44 = vadd.f32 %v5308_v33, %v5380_v52 }
 0x3f0   : > { %2039 = vmatmul.bf16.gmra.mxu0 %v6115_v9  ;;  %v2170_v40 = vadd.f32 %v2169_v11, %v2001_v56  ;;  %v2625_v9 = vadd.f32 %v5521_v3, %v5546_v41  ;;  %v6120_v41 = vld [vmem:[#allocation77_spill] sm:$0xff] }
 0x3f1   : > { %2208 = vmatmul.bf16.gmra.mxu1 %v6116_v48  ;;  %v2786_v12 = vpop.f32.mrf.mxu3 }
 0x3f2   : > { %2701 = vmatmul.bf16.gmra.mxu2 %v5318_v16  ;;  %v2313_v32 = vmax.f32 %v2170_v40, 0.0  ;;  %v2787_v59 = vadd.f32 %v2786_v12, %v2618_v38 }
 0x3f4   : > { %v5668_v40 = vpop.f32.mrf.mxu2 }
 0x3f5   : > { %v2002_v26 = vpop.f32.mrf.mxu0 }
 0x3f6   : > { %v2003_v49 = vadd.f32 %v2002_v26, %v1834_v43  ;;  %v2171_v60 = vpop.f32.mrf.mxu1 }
 0x3f8   : > { %v2172_v13 = vadd.f32 %v2171_v60, %v2003_v49 }
 0x3f9   : > { %v2788_v16 = vpop.f32.mrf.mxu3 }
 0x3fa   : > { %v2315_v8 = vmax.f32 %v2172_v13, 0.0  ;;  %v2789_v35 = vadd.f32 %v2788_v16, %v2620_v27  ;;  %v6119_v27 = vld [vmem:[#allocation76_spill] sm:$0xff] }
 0x3fc   : > { %v4015_v57 = vpack.c.bf16 %v2789_v35, %v2787_v59  ;;  %v2407_v31 = vpack.c.bf16 %v2315_v8, %v2313_v32  ;;  %v1844_v32 = vadd.f32 %v5320_v50, %v5380_v52  ;;  %v5678_v59 = vpop.f32.mrf.mxu2 }
 0x3fd   : > { %v2005_v6 = vpop.f32.mrf.mxu0 }
 0x3fe   : > { %4139 = vst [vmem:[%s5530_s17 + $0x40] sm:$0xff] %v4015_v57   ;;  %v2174_v19 = vpop.f32.mrf.mxu1  ;;  %2830 = vmatmul.bf16.gmra.mxu3 %v2407_v31  ;;  %v2006_v20 = vadd.f32 %v2005_v6, %v1837_v7  ;;  %v2630_v6 = vadd.f32 %v5521_v3, %v5562_v15  ;;  %v6122_v15 = vld [vmem:[#allocation82_spill] sm:$0xff] }
 0x400   : > { %2044 = vmatmul.bf16.gmra.mxu0 %v6117_v34  ;;  %v2175_v37 = vadd.f32 %v2174_v19, %v2006_v20 }
 0x401   : > { %2213 = vmatmul.bf16.gmra.mxu1 %v6118_v47  ;;  %v2791_v61 = vpop.f32.mrf.mxu3 }
 0x402   : > { %2706 = vmatmul.bf16.gmra.mxu2 %v5330_v22  ;;  %v2317_v56 = vmax.f32 %v2175_v37, 0.0  ;;  %v2792_v22 = vadd.f32 %v2791_v61, %v2623_v46 }
 0x404   : > { %v5685_v37 = vpop.f32.mrf.mxu2 }
 0x405   : > { %v2007_v17 = vpop.f32.mrf.mxu0 }
 0x406   : > { %v2008_v11 = vadd.f32 %v2007_v17, %v1839_v44  ;;  %v2176_v14 = vpop.f32.mrf.mxu1 }
 0x408   : > { %v2177_v48 = vadd.f32 %v2176_v14, %v2008_v11  ;;  %v6121_v11 = vld [vmem:[#allocation81_spill] sm:$0xff] }
 0x409   : > { %v2793_v12 = vpop.f32.mrf.mxu3 }
 0x40a   : > { %v2319_v43 = vmax.f32 %v2177_v48, 0.0  ;;  %v2794_v26 = vadd.f32 %v2793_v12, %v2625_v9  ;;  %v1849_v9 = vadd.f32 %v5332_v42, %v5380_v52 }
 0x40c   : > { %v4020_v33 = vpack.c.bf16 %v2794_v26, %v2792_v22  ;;  %v2409_v49 = vpack.c.bf16 %v2319_v43, %v2317_v56  ;;  %v2633_v43 = vadd.f32 %v5521_v3, %v5572_v18  ;;  %v1852_v18 = vadd.f32 %v5336_v54, %v5380_v52 }
 0x40d   : > { %v2010_v60 = vpop.f32.mrf.mxu0  ;;  %v2638_v54 = vadd.f32 %v5521_v3, %v5592_v0  ;;  %v1857_v0 = vadd.f32 %v5348_v2, %v5380_v52  ;;  %v2643_v2 = vadd.f32 %v5521_v3, %v5609_v29 }
 0x40e   : > { %4140 = vst [vmem:[%s5530_s17 + $0x48] sm:$0xff] %v4020_v33   ;;  %v2179_v38 = vpop.f32.mrf.mxu1  ;;  %2835 = vmatmul.bf16.gmra.mxu3 %v2409_v49  ;;  %v2011_v16 = vadd.f32 %v2010_v60, %v1842_v39  ;;  %v5698_v33 = vpop.f32.mrf.mxu2 }
 0x410   : > { %2049 = vmatmul.bf16.gmra.mxu0 %v6119_v27  ;;  %v2180_v35 = vadd.f32 %v2179_v38, %v2011_v16  ;;  %v6123_v16 = vld [vmem:[#allocation86_spill] sm:$0xff] }
 0x411   : > { %2218 = vmatmul.bf16.gmra.mxu1 %v6120_v41  ;;  %v2796_v13 = vpop.f32.mrf.mxu3 }
 0x412   : > { %2711 = vmatmul.bf16.gmra.mxu2 %v5342_v30  ;;  %v2321_v7 = vmax.f32 %v2180_v35, 0.0  ;;  %v2797_v34 = vadd.f32 %v2796_v13, %v2628_v1 }
 0x415   : > { %v2012_v8 = vpop.f32.mrf.mxu0 }
 0x416   : > { %v2013_v57 = vadd.f32 %v2012_v8, %v1844_v32  ;;  %v2181_v31 = vpop.f32.mrf.mxu1  ;;  %v5706_v35 = vpop.f32.mrf.mxu2 }
 0x418   : > { %v2182_v19 = vadd.f32 %v2181_v31, %v2013_v57  ;;  %v1854_v57 = vadd.f32 %v5344_v5, %v5380_v52 }
 0x419   : > { %v2798_v30 = vpop.f32.mrf.mxu3 }
 0x41a   : > { %v2323_v47 = vmax.f32 %v2182_v19, 0.0  ;;  %v2799_v61 = vadd.f32 %v2798_v30, %v2630_v6  ;;  %v2640_v30 = vadd.f32 %v5521_v3, %v5602_v63  ;;  %v6126_v63 = vld [vmem:[#allocation92_spill] sm:$0xff] }
 0x41c   : > { %v4025_v50 = vpack.c.bf16 %v2799_v61, %v2797_v34  ;;  %v2411_v20 = vpack.c.bf16 %v2323_v47, %v2321_v7 }
 0x41d   : > { %v2015_v44 = vpop.f32.mrf.mxu0 }
 0x41e   : > { %4141 = vst [vmem:[%s5530_s17 + $0x50] sm:$0xff] %v4025_v50   ;;  %v2184_v17 = vpop.f32.mrf.mxu1  ;;  %2840 = vmatmul.bf16.gmra.mxu3 %v2411_v20  ;;  %v2016_v46 = vadd.f32 %v2015_v44, %v1847_v45  ;;  %v5714_v5 = vpop.f32.mrf.mxu2 }
 0x420   : > { %2054 = vmatmul.bf16.gmra.mxu0 %v6121_v11  ;;  %v2185_v12 = vadd.f32 %v2184_v17, %v2016_v46  ;;  %v6125_v11 = vld [vmem:[#allocation91_spill] sm:$0xff]  ;;  %v1859_v46 = vadd.f32 %v5356_v23, %v5380_v52 }
 0x421   : > { %2223 = vmatmul.bf16.gmra.mxu1 %v6122_v15  ;;  %v2801_v14 = vpop.f32.mrf.mxu3 }
 0x422   : > { %2716 = vmatmul.bf16.gmra.mxu2 %v5354_v25  ;;  %v2325_v49 = vmax.f32 %v2185_v12, 0.0  ;;  %v2802_v60 = vadd.f32 %v2801_v14, %v2633_v43  ;;  %v2645_v43 = vadd.f32 %v5521_v3, %v5622_v58  ;;  %v6127_v58 = vld [vmem:[#allocation95_spill] sm:$0xff] }
 0x425   : > { %v2017_v48 = vpop.f32.mrf.mxu0 }
 0x426   : > { %v2018_v56 = vadd.f32 %v2017_v48, %v1849_v9  ;;  %v2186_v22 = vpop.f32.mrf.mxu1 }
 0x428   : > { %v2187_v26 = vadd.f32 %v2186_v22, %v2018_v56  ;;  %v5724_v22 = vpop.f32.mrf.mxu2 }
 0x429   : > { %v2803_v25 = vpop.f32.mrf.mxu3 }
 0x42a   : > { %v2327_v38 = vmax.f32 %v2187_v26, 0.0  ;;  %v2804_v39 = vadd.f32 %v2803_v25, %v2635_v24 }
 0x42c   : > { %v2413_v42 = vpack.c.bf16 %v2327_v38, %v2325_v49  ;;  %v4030_v27 = vpack.c.bf16 %v2804_v39, %v2802_v60 }
 0x42d   : > { %v2020_v41 = vpop.f32.mrf.mxu0 }
 0x42e   : > { %4142 = vst [vmem:[%s5530_s17 + $0x58] sm:$0xff] %v4030_v27   ;;  %v2189_v13 = vpop.f32.mrf.mxu1  ;;  %2845 = vmatmul.bf16.gmra.mxu3 %v2413_v42  ;;  %v2021_v8 = vadd.f32 %v2020_v41, %v1852_v18  ;;  %v1862_v27 = vadd.f32 %v5361_v4, %v5380_v52  ;;  %v6128_v41 = vld [vmem:[#allocation99_spill] sm:$0xff]  ;;  %v2648_v4 = vadd.f32 %v5521_v3, %v5630_v55 }
 0x430   : > { %2059 = vmatmul.bf16.gmra.mxu0 %v6123_v16  ;;  %v2190_v1 = vadd.f32 %v2189_v13, %v2021_v8  ;;  %v5734_v29 = vpop.f32.mrf.mxu2  ;;  %v6129_v16 = vld [vmem:[#allocation96_spill] sm:$0xff] }
 0x431   : > { %2228 = vmatmul.bf16.gmra.mxu1 %v6124_v28  ;;  %v2806_v32 = vpop.f32.mrf.mxu3  ;;  %v1864_v28 = vadd.f32 %v6129_v16, %v5380_v52 }
 0x432   : > { %2721 = vmatmul.bf16.gmra.mxu2 %v5366_v62  ;;  %v2329_v34 = vmax.f32 %v2190_v1, 0.0  ;;  %v2807_v47 = vadd.f32 %v2806_v32, %v2638_v54 }
 0x435   : > { %v2022_v31 = vpop.f32.mrf.mxu0 }
 0x436   : > { %v2023_v6 = vadd.f32 %v2022_v31, %v1854_v57  ;;  %v2191_v19 = vpop.f32.mrf.mxu1 }
 0x438   : > { %v2192_v7 = vadd.f32 %v2191_v19, %v2023_v6 }
 0x439   : > { %v2808_v62 = vpop.f32.mrf.mxu3 }
 0x43a   : > { %v2331_v61 = vmax.f32 %v2192_v7, 0.0  ;;  %v2809_v50 = vadd.f32 %v2808_v62, %v2640_v30 }
 0x43c   : > { %v2415_v20 = vpack.c.bf16 %v2331_v61, %v2329_v34  ;;  %v4035_v44 = vpack.c.bf16 %v2809_v50, %v2807_v47  ;;  %v6130_v50 = vld [vmem:[#allocation97_spill] sm:$0xff] }
 0x43d   : > { %v2025_v17 = vpop.f32.mrf.mxu0 }
 0x43e   : > { %4143 = vst [vmem:[%s5530_s17 + $0x60] sm:$0xff] %v4035_v44   ;;  %v2194_v45 = vpop.f32.mrf.mxu1  ;;  %2850 = vmatmul.bf16.gmra.mxu3 %v2415_v20  ;;  %v2026_v14 = vadd.f32 %v2025_v17, %v1857_v0  ;;  %v1867_v20 = vadd.f32 %v6130_v50, %v5380_v52  ;;  %v6131_v17 = vld [vmem:[#allocation98_spill] sm:$0xff]  ;;  %v2665_v50 = vadd.f32 %v5521_v3, %v5698_v33 }
 0x440   : > { %2064 = vmatmul.bf16.gmra.mxu0 %v6125_v11  ;;  %v2195_v48 = vadd.f32 %v2194_v45, %v2026_v14  ;;  %v2655_v14 = vadd.f32 %v5521_v3, %v5658_v53 }
 0x441   : > { %2233 = vmatmul.bf16.gmra.mxu1 %v6126_v63  ;;  %v2811_v15 = vpop.f32.mrf.mxu3 }
 0x442   : > { %2726 = vmatmul.bf16.gmra.mxu2 %v5375_v21  ;;  %v2333_v26 = vmax.f32 %v2195_v48, 0.0  ;;  %v2812_v25 = vadd.f32 %v2811_v15, %v2643_v2  ;;  %v2653_v15 = vadd.f32 %v5521_v3, %v5648_v36 }
 0x445   : > { %v2027_v9 = vpop.f32.mrf.mxu0 }
 0x446   : > { %v2028_v12 = vadd.f32 %v2027_v9, %v1859_v46  ;;  %v2196_v56 = vpop.f32.mrf.mxu1 }
 0x448   : > { %v2197_v24 = vadd.f32 %v2196_v56, %v2028_v12 }
 0x449   : > { %v2813_v21 = vpop.f32.mrf.mxu3 }
 0x44a   : > { %v2335_v49 = vmax.f32 %v2197_v24, 0.0  ;;  %v2814_v60 = vadd.f32 %v2813_v21, %v2645_v43 }
 0x44c   : > { %v2417_v23 = vpack.c.bf16 %v2335_v49, %v2333_v26  ;;  %v4040_v38 = vpack.c.bf16 %v2814_v60, %v2812_v25  ;;  %v6132_v25 = vld [vmem:[#allocation100_spill] sm:$0xff] }
 0x44d   : > { %v2030_v39 = vpop.f32.mrf.mxu0  ;;  %v1872_v49 = vadd.f32 %v6132_v25, %v5380_v52  ;;  %v2670_v25 = vadd.f32 %v5521_v3, %v5714_v5  ;;  %v6139_v5 = vld [vmem:[#allocation16_spill] sm:$0xff] }
 0x44e   : > { %4144 = vst [vmem:[%s5530_s17 + $0x68] sm:$0xff] %v4040_v38   ;;  %v2199_v42 = vpop.f32.mrf.mxu1  ;;  %2855 = vmatmul.bf16.gmra.mxu3 %v2417_v23  ;;  %v2031_v18 = vadd.f32 %v2030_v39, %v1862_v27  ;;  %v6133_v23 = vld [vmem:[#allocation101_spill] sm:$0xff] }
 0x44f   : > { %v1874_v53 = vadd.f32 %v6133_v23, %v5380_v52 }
 0x450   : > { %2069 = vmatmul.bf16.gmra.mxu0 %v5274_v51  ;;  %v2200_v8 = vadd.f32 %v2199_v42, %v2031_v18  ;;  %v2650_v51 = vadd.f32 %v5521_v3, %v5638_v10  ;;  %v1869_v10 = vadd.f32 %v6131_v17, %v5380_v52 }
 0x451   : > { %2238 = vmatmul.bf16.gmra.mxu1 %v6127_v58  ;;  %v2816_v13 = vpop.f32.mrf.mxu3  ;;  %v2658_v58 = vadd.f32 %v5521_v3, %v5668_v40 }
 0x452   : > { %2731 = vmatmul.bf16.gmra.mxu2 %v6128_v41  ;;  %v2337_v19 = vmax.f32 %v2200_v8, 0.0  ;;  %v2817_v54 = vadd.f32 %v2816_v13, %v2648_v4  ;;  %v2660_v41 = vadd.f32 %v5521_v3, %v5678_v59  ;;  %v6135_v59 = vld [vmem:[#allocation15_spill] sm:$0xff] }
 0x455   : > { %v2032_v32 = vpop.f32.mrf.mxu0 }
 0x456   : > { %v2033_v57 = vadd.f32 %v2032_v32, %v1864_v28  ;;  %v2201_v31 = vpop.f32.mrf.mxu1 }
 0x458   : > { %v2202_v1 = vadd.f32 %v2201_v31, %v2033_v57 }
 0x459   : > { %v2818_v6 = vpop.f32.mrf.mxu3 }
 0x45a   : > { %v2339_v30 = vmax.f32 %v2202_v1, 0.0  ;;  %v2819_v7 = vadd.f32 %v2818_v6, %v2650_v51  ;;  %v5763_v1 = vpop.f32.mrf.mxu2  ;;  %v6134_v6 = vld [vmem:[#allocation102_spill] sm:$0xff] }
 0x45b   : > { %v1877_v40 = vadd.f32 %v6134_v6, %v5380_v52  ;;  %v2675_v6 = vadd.f32 %v5521_v3, %v5734_v29 }
 0x45c   : > { %v2419_v62 = vpack.c.bf16 %v2339_v30, %v2337_v19  ;;  %v4045_v34 = vpack.c.bf16 %v2819_v7, %v2817_v54  ;;  %v1879_v30 = vadd.f32 %v6135_v59, %v5380_v52 }
 0x45d   : > { %v2035_v47 = vpop.f32.mrf.mxu0 }
 0x45e   : > { %4145 = vst [vmem:[%s5530_s17 + $0x70] sm:$0xff] %v4045_v34   ;;  %v2204_v61 = vpop.f32.mrf.mxu1  ;;  %2860 = vmatmul.bf16.gmra.mxu3 %v2419_v62  ;;  %v2036_v55 = vadd.f32 %v2035_v47, %v1867_v20 }
 0x460   : > { %v2205_v0 = vadd.f32 %v2204_v61, %v2036_v55  ;;  %v2663_v61 = vadd.f32 %v5521_v3, %v5685_v37 }
 0x461   : > { %v2821_v44 = vpop.f32.mrf.mxu3 }
 0x462   : > { %v2341_v48 = vmax.f32 %v2205_v0, 0.0  ;;  %v2822_v12 = vadd.f32 %v2821_v44, %v2653_v15  ;;  %v5773_v44 = vpop.f32.mrf.mxu2 }
 0x465   : > { %v2037_v45 = vpop.f32.mrf.mxu0 }
 0x466   : > { %v2038_v11 = vadd.f32 %v2037_v45, %v1869_v10  ;;  %v2206_v63 = vpop.f32.mrf.mxu1 }
 0x468   : > { %v2207_v46 = vadd.f32 %v2206_v63, %v2038_v11 }
 0x469   : > { %v2823_v9 = vpop.f32.mrf.mxu3 }
 0x46a   : > { %v2343_v56 = vmax.f32 %v2207_v46, 0.0  ;;  %v2824_v2 = vadd.f32 %v2823_v9, %v2655_v14  ;;  %v6136_v46 = vld [vmem:[#allocation38_spill] sm:$0xff]  ;;  %v5778_v33 = vpop.f32.mrf.mxu2 }
 0x46b   : > { %v1882_v37 = vadd.f32 %v6136_v46, %v5380_v52 }
 0x46c   : > { %v2421_v43 = vpack.c.bf16 %v2343_v56, %v2341_v48  ;;  %v4050_v24 = vpack.c.bf16 %v2824_v2, %v2822_v12  ;;  %v6137_v12 = vld [vmem:[#allocation30_spill] sm:$0xff] }
 0x46d   : > { %v2040_v21 = vpop.f32.mrf.mxu0  ;;  %v1884_v56 = vadd.f32 %v6137_v12, %v5380_v52 }
 0x46e   : > { %4146 = vst [vmem:[%s5530_s17 + $0x78] sm:$0xff] %v4050_v24   ;;  %v2209_v26 = vpop.f32.mrf.mxu1  ;;  %2865 = vmatmul.bf16.gmra.mxu3 %v2421_v43  ;;  %v2041_v36 = vadd.f32 %v2040_v21, %v1872_v49 }
 0x470   : > { %v2210_v39 = vadd.f32 %v2209_v26, %v2041_v36  ;;  %v2668_v26 = vadd.f32 %v5521_v3, %v5706_v35 }
 0x471   : > { %v2826_v60 = vpop.f32.mrf.mxu3 }
 0x472   : > { %v2345_v16 = vmax.f32 %v2210_v39, 0.0  ;;  %v2827_v28 = vadd.f32 %v2826_v60, %v2658_v58 }
 0x475   : > { %v2042_v38 = vpop.f32.mrf.mxu0 }
 0x476   : > { %v2043_v42 = vadd.f32 %v2042_v38, %v1874_v53  ;;  %v2211_v27 = vpop.f32.mrf.mxu1 }
 0x478   : > { %v2212_v13 = vadd.f32 %v2211_v27, %v2043_v42  ;;  %v5786_v27 = vpop.f32.mrf.mxu2 }
 0x479   : > { %v2828_v18 = vpop.f32.mrf.mxu3 }
 0x47a   : > { %v2347_v32 = vmax.f32 %v2212_v13, 0.0  ;;  %v2829_v8 = vadd.f32 %v2828_v18, %v2660_v41  ;;  %v6138_v13 = vld [vmem:[#allocation31_spill] sm:$0xff] }
 0x47b   : > { %v1887_v35 = vadd.f32 %v6138_v13, %v5380_v52 }
 0x47c   : > { %v2423_v57 = vpack.c.bf16 %v2347_v32, %v2345_v16  ;;  %v4055_v31 = vpack.c.bf16 %v2829_v8, %v2827_v28  ;;  %v1889_v28 = vadd.f32 %v6139_v5, %v5380_v52 }
 0x47d   : > { %v2045_v4 = vpop.f32.mrf.mxu0 }
 0x47e   : > { %4147 = vst [vmem:[%s5530_s17 + $0x80] sm:$0xff] %v4055_v31   ;;  %v2214_v51 = vpop.f32.mrf.mxu1  ;;  %2870 = vmatmul.bf16.gmra.mxu3 %v2423_v57  ;;  %v2046_v54 = vadd.f32 %v2045_v4, %v1877_v40 }
 0x480   : > { %v2215_v62 = vadd.f32 %v2214_v51, %v2046_v54  ;;  %v5793_v4 = vpop.f32.mrf.mxu2  ;;  %v2673_v51 = vadd.f32 %v5521_v3, %v5724_v22  ;;  %v6141_v3 = vld [vmem:[#allocation43_spill] sm:$0xff] }
 0x481   : > { %v2831_v19 = vpop.f32.mrf.mxu3  ;;  %v1894_v29 = vadd.f32 %v6141_v3, %v5380_v52 }
 0x482   : > { %v2349_v17 = vmax.f32 %v2215_v62, 0.0  ;;  %v2832_v10 = vadd.f32 %v2831_v19, %v2663_v61 }
 0x485   : > { %v2047_v7 = vpop.f32.mrf.mxu0 }
 0x486   : > { %v2048_v34 = vadd.f32 %v2047_v7, %v1879_v30  ;;  %v2216_v47 = vpop.f32.mrf.mxu1 }
 0x488   : > { %v2217_v20 = vadd.f32 %v2216_v47, %v2048_v34 }
 0x489   : > { %v2833_v55 = vpop.f32.mrf.mxu3 }
 0x48a   : > { %v2351_v45 = vmax.f32 %v2217_v20, 0.0  ;;  %v2834_v0 = vadd.f32 %v2833_v55, %v2665_v50  ;;  %v6140_v50 = vld [vmem:[#allocation17_spill] sm:$0xff]  ;;  %v2689_v55 = vpop.f32.mrf.mxu2 }
 0x48b   : > { %v1892_v20 = vadd.f32 %v6140_v50, %v5380_v52 }
 0x48c   : > { %v2425_v11 = vpack.c.bf16 %v2351_v45, %v2349_v17  ;;  %v4060_v63 = vpack.c.bf16 %v2834_v0, %v2832_v10 }
 0x48d   : > { %v2050_v15 = vpop.f32.mrf.mxu0 }
 0x48e   : > { %4148 = vst [vmem:[%s5530_s17 + $0x88] sm:$0xff] %v4060_v63   ;;  %v2219_v14 = vpop.f32.mrf.mxu1  ;;  %2875 = vmatmul.bf16.gmra.mxu3 %v2425_v11  ;;  %v2051_v48 = vadd.f32 %v2050_v15, %v1882_v37  ;;  %v5807_v63 = vld [vmem:[%s5896_s4] ss:$0 sm:$0xff] }
 0x48f   : > { %v2678_v15 = vadd.f32 %v5807_v63, %v5763_v1 }
 0x490   : > { %v2220_v43 = vadd.f32 %v2219_v14, %v2051_v48  ;;  %v2680_v14 = vadd.f32 %v5807_v63, %v5773_v44  ;;  %v6143_v44 = vld [vmem:[#allocation35_spill] sm:$0xff] }
 0x491   : > { %v2836_v9 = vpop.f32.mrf.mxu3 }
 0x492   : > { %v2353_v36 = vmax.f32 %v2220_v43, 0.0  ;;  %v2837_v23 = vadd.f32 %v2836_v9, %v2668_v26 }
 0x495   : > { %v2052_v2 = vpop.f32.mrf.mxu0 }
 0x496   : > { %v2053_v24 = vadd.f32 %v2052_v2, %v1884_v56  ;;  %v2221_v21 = vpop.f32.mrf.mxu1  ;;  %v2692_v2 = vpop.f32.mrf.mxu2 }
 0x498   : > { %v2222_v49 = vadd.f32 %v2221_v21, %v2053_v24 }
 0x499   : > { %v2838_v60 = vpop.f32.mrf.mxu3 }
 0x49a   : > { %v2355_v53 = vmax.f32 %v2222_v49, 0.0  ;;  %v2839_v38 = vadd.f32 %v2838_v60, %v2670_v25  ;;  %v6142_v25 = vld [vmem:[#allocation34_spill] sm:$0xff] }
 0x49b   : > { %v1897_v49 = vadd.f32 %v6142_v25, %v5380_v52 }
 0x49c   : > { %v2427_v39 = vpack.c.bf16 %v2355_v53, %v2353_v36  ;;  %v4065_v42 = vpack.c.bf16 %v2839_v38, %v2837_v23  ;;  %v1899_v36 = vadd.f32 %v6143_v44, %v5380_v52 }
 0x49d   : > { %v2055_v58 = vpop.f32.mrf.mxu0 }
 0x49e   : > { %4149 = vst [vmem:[%s5530_s17 + $0x90] sm:$0xff] %v4065_v42   ;;  %v2224_v41 = vpop.f32.mrf.mxu1  ;;  %2880 = vmatmul.bf16.gmra.mxu3 %v2427_v39  ;;  %v2056_v16 = vadd.f32 %v2055_v58, %v1887_v35  ;;  %v2694_v23 = vpop.f32.mrf.mxu2  ;;  %v2683_v58 = vadd.f32 %v5807_v63, %v5778_v33 }
 0x4a0   : > { %v2225_v8 = vadd.f32 %v2224_v41, %v2056_v16  ;;  %v2685_v41 = vadd.f32 %v5807_v63, %v5786_v27  ;;  %v6145_v27 = vld [vmem:[#allocation19_spill] sm:$0xff] }
 0x4a1   : > { %v2841_v18 = vpop.f32.mrf.mxu3 }
 0x4a2   : > { %v2357_v54 = vmax.f32 %v2225_v8, 0.0  ;;  %v2842_v59 = vadd.f32 %v2841_v18, %v2673_v51 }
 0x4a5   : > { %v2057_v32 = vpop.f32.mrf.mxu0 }
 0x4a6   : > { %v2058_v57 = vadd.f32 %v2057_v32, %v1889_v28  ;;  %v2226_v31 = vpop.f32.mrf.mxu1  ;;  %v2697_v51 = vpop.f32.mrf.mxu2 }
 0x4a8   : > { %v2227_v40 = vadd.f32 %v2226_v31, %v2058_v57 }
 0x4a9   : > { %v2843_v19 = vpop.f32.mrf.mxu3 }
 0x4aa   : > { %v2359_v30 = vmax.f32 %v2227_v40, 0.0  ;;  %v2844_v7 = vadd.f32 %v2843_v19, %v2675_v6  ;;  %v6144_v6 = vld [vmem:[#allocation18_spill] sm:$0xff] }
 0x4ab   : > { %v1902_v40 = vadd.f32 %v6144_v6, %v5380_v52 }
 0x4ac   : > { %v2429_v62 = vpack.c.bf16 %v2359_v30, %v2357_v54  ;;  %v4070_v34 = vpack.c.bf16 %v2844_v7, %v2842_v59  ;;  %v1904_v54 = vadd.f32 %v6145_v27, %v5380_v52 }
 0x4ad   : > { %v2060_v47 = vpop.f32.mrf.mxu0 }
 0x4ae   : > { %4150 = vst [vmem:[%s5530_s17 + $0x98] sm:$0xff] %v4070_v34   ;;  %v2229_v61 = vpop.f32.mrf.mxu1  ;;  %2885 = vmatmul.bf16.gmra.mxu3 %v2429_v62  ;;  %v2061_v17 = vadd.f32 %v2060_v47, %v1892_v20  ;;  %v2688_v34 = vadd.f32 %v5807_v63, %v5793_v4  ;;  %v2690_v47 = vadd.f32 %v5807_v63, %v2689_v55  ;;  %v2699_v50 = vpop.f32.mrf.mxu2 }
 0x4af   : > { %v2695_v4 = vadd.f32 %v5807_v63, %v2694_v23 }
 0x4b0   : > { %v2230_v45 = vadd.f32 %v2229_v61, %v2061_v17 }
 0x4b1   : > { %v2846_v22 = vpop.f32.mrf.mxu3 }
 0x4b2   : > { %v2361_v9 = vmax.f32 %v2230_v45, 0.0  ;;  %v2847_v48 = vadd.f32 %v2846_v22, %v2678_v15 }
 0x4b5   : > { %v2062_v10 = vpop.f32.mrf.mxu0 }
 0x4b6   : > { %v2063_v0 = vadd.f32 %v2062_v10, %v1894_v29  ;;  %v2231_v11 = vpop.f32.mrf.mxu1 }
 0x4b8   : > { %v2232_v46 = vadd.f32 %v2231_v11, %v2063_v0  ;;  %v2702_v0 = vpop.f32.mrf.mxu2  ;;  %v2693_v11 = vadd.f32 %v5807_v63, %v2692_v2 }
 0x4b9   : > { %v2848_v37 = vpop.f32.mrf.mxu3 }
 0x4ba   : > { %v2363_v12 = vmax.f32 %v2232_v46, 0.0  ;;  %v2849_v56 = vadd.f32 %v2848_v37, %v2680_v14 }
 0x4bc   : > { %v2431_v43 = vpack.c.bf16 %v2363_v12, %v2361_v9  ;;  %v4075_v24 = vpack.c.bf16 %v2849_v56, %v2847_v48  ;;  %v2698_v12 = vadd.f32 %v5807_v63, %v2697_v51  ;;  %v2700_v56 = vadd.f32 %v5807_v63, %v2699_v50 }
 0x4bd   : > { %v2065_v21 = vpop.f32.mrf.mxu0 }
 0x4be   : > { %4151 = vst [vmem:[%s5530_s17 + $0xa0] sm:$0xff] %v4075_v24   ;;  %v2234_v26 = vpop.f32.mrf.mxu1  ;;  %2890 = vmatmul.bf16.gmra.mxu3 %v2431_v43  ;;  %v2066_v60 = vadd.f32 %v2065_v21, %v1897_v49  ;;  %v2703_v49 = vadd.f32 %v5807_v63, %v2702_v0 }
 0x4c0   : > { %v2235_v38 = vadd.f32 %v2234_v26, %v2066_v60  ;;  %v2704_v37 = vpop.f32.mrf.mxu2 }
 0x4c1   : > { %v2851_v1 = vpop.f32.mrf.mxu3 }
 0x4c2   : > { %v2365_v18 = vmax.f32 %v2235_v38, 0.0  ;;  %v2852_v16 = vadd.f32 %v2851_v1, %v2683_v58  ;;  %v2705_v1 = vadd.f32 %v5807_v63, %v2704_v37 }
 0x4c5   : > { %v2067_v53 = vpop.f32.mrf.mxu0 }
 0x4c6   : > { %v2068_v39 = vadd.f32 %v2067_v53, %v1899_v36  ;;  %v2236_v42 = vpop.f32.mrf.mxu1 }
 0x4c8   : > { %v2237_v13 = vadd.f32 %v2236_v42, %v2068_v39  ;;  %v2707_v48 = vpop.f32.mrf.mxu2 }
 0x4c9   : > { %v2853_v35 = vpop.f32.mrf.mxu3  ;;  %v2708_v42 = vadd.f32 %v5807_v63, %v2707_v48 }
 0x4ca   : > { %v2367_v5 = vmax.f32 %v2237_v13, 0.0  ;;  %v2854_v28 = vadd.f32 %v2853_v35, %v2685_v41 }
 0x4cc   : > { %v2433_v32 = vpack.c.bf16 %v2367_v5, %v2365_v18  ;;  %v4080_v8 = vpack.c.bf16 %v2854_v28, %v2852_v16 }
 0x4cd   : > { %v2070_v57 = vpop.f32.mrf.mxu0 }
 0x4ce   : > { %4152 = vst [vmem:[%s5530_s17 + $0xa8] sm:$0xff] %v4080_v8   ;;  %v2239_v31 = vpop.f32.mrf.mxu1  ;;  %2895 = vmatmul.bf16.gmra.mxu3 %v2433_v32  ;;  %v2071_v19 = vadd.f32 %v2070_v57, %v1902_v40 }
 0x4d0   : > { %v2240_v30 = vadd.f32 %v2239_v31, %v2071_v19  ;;  %v2709_v26 = vpop.f32.mrf.mxu2 }
 0x4d1   : > { %v2856_v33 = vpop.f32.mrf.mxu3  ;;  %v2710_v58 = vadd.f32 %v5807_v63, %v2709_v26 }
 0x4d2   : > { %v2369_v22 = vmax.f32 %v2240_v30, 0.0  ;;  %v2857_v17 = vadd.f32 %v2856_v33, %v2688_v34 }
 0x4d5   : > { %v2072_v59 = vpop.f32.mrf.mxu0 }
 0x4d6   : > { %v2073_v7 = vadd.f32 %v2072_v59, %v1904_v54  ;;  %v2241_v62 = vpop.f32.mrf.mxu1 }
 0x4d8   : > { %v2242_v61 = vadd.f32 %v2241_v62, %v2073_v7  ;;  %v2712_v23 = vpop.f32.mrf.mxu2 }
 0x4d9   : > { %v2858_v20 = vpop.f32.mrf.mxu3  ;;  %v2713_v28 = vadd.f32 %v5807_v63, %v2712_v23 }
 0x4da   : > { %v2371_v3 = vmax.f32 %v2242_v61, 0.0  ;;  %v2859_v29 = vadd.f32 %v2858_v20, %v2690_v47 }
 0x4dc   : > { %v2435_v10 = vpack.c.bf16 %v2371_v3, %v2369_v22  ;;  %v4085_v52 = vpack.c.bf16 %v2859_v29, %v2857_v17 }
 0x4de   : > { %4153 = vst [vmem:[%s5530_s17 + $0xb0] sm:$0xff] %v4085_v52   ;;  %2900 = vmatmul.bf16.gmra.mxu3 %v2435_v10 }
 0x4e0   : > { %v2714_v39 = vpop.f32.mrf.mxu2 }
 0x4e1   : > { %v2861_v45 = vpop.f32.mrf.mxu3  ;;  %v2715_v32 = vadd.f32 %v5807_v63, %v2714_v39 }
 0x4e2   : > { %v2862_v15 = vadd.f32 %v2861_v45, %v2693_v11 }
 0x4e8   : > { %v2717_v16 = vpop.f32.mrf.mxu2 }
 0x4e9   : > { %v2863_v55 = vpop.f32.mrf.mxu3  ;;  %v2718_v19 = vadd.f32 %v5807_v63, %v2717_v16 }
 0x4ea   : > { %v2864_v14 = vadd.f32 %v2863_v55, %v2695_v4 }
 0x4ec   : > { %v4090_v46 = vpack.c.bf16 %v2864_v14, %v2862_v15 }
 0x4ee   : > { %4154 = vst [vmem:[%s5530_s17 + $0xb8] sm:$0xff] %v4090_v46  }
 0x4f0   : > { %v2719_v8 = vpop.f32.mrf.mxu2 }
 0x4f1   : > { %v2866_v9 = vpop.f32.mrf.mxu3  ;;  %v2720_v27 = vadd.f32 %v5807_v63, %v2719_v8 }
 0x4f2   : > { %v2867_v24 = vadd.f32 %v2866_v9, %v2698_v12 }
 0x4f8   : > { %v2722_v33 = vpop.f32.mrf.mxu2 }
 0x4f9   : > { %v2868_v43 = vpop.f32.mrf.mxu3  ;;  %v2723_v61 = vadd.f32 %v5807_v63, %v2722_v33 }
 0x4fa   : > { %v2869_v21 = vadd.f32 %v2868_v43, %v2700_v56 }
 0x4fc   : > { %v4095_v2 = vpack.c.bf16 %v2869_v21, %v2867_v24 }
 0x4fe   : > { %4155 = vst [vmem:[%s5530_s17 + $0xc0] sm:$0xff] %v4095_v2  }
 0x500   : > { %v2724_v62 = vpop.f32.mrf.mxu2 }
 0x501   : > { %v2871_v25 = vpop.f32.mrf.mxu3  ;;  %v2725_v50 = vadd.f32 %v5807_v63, %v2724_v62 }
 0x502   : > { %v2872_v44 = vadd.f32 %v2871_v25, %v2703_v49 }
 0x508   : > { %v2727_v47 = vpop.f32.mrf.mxu2 }
 0x509   : > { %v2873_v60 = vpop.f32.mrf.mxu3  ;;  %v2728_v52 = vadd.f32 %v5807_v63, %v2727_v47 }
 0x50a   : > { %v2874_v36 = vadd.f32 %v2873_v60, %v2705_v1 }
 0x50c   : > { %v4100_v53 = vpack.c.bf16 %v2874_v36, %v2872_v44 }
 0x50e   : > { %4156 = vst [vmem:[%s5530_s17 + $0xc8] sm:$0xff] %v4100_v53  }
 0x510   : > { %v2729_v29 = vpop.f32.mrf.mxu2 }
 0x511   : > { %v2876_v38 = vpop.f32.mrf.mxu3  ;;  %v2730_v45 = vadd.f32 %v5807_v63, %v2729_v29 }
 0x512   : > { %v2877_v13 = vadd.f32 %v2876_v38, %v2708_v42 }
 0x518   : > { %v2732_v55 = vpop.f32.mrf.mxu2 }
 0x519   : > { %v2878_v41 = vpop.f32.mrf.mxu3  ;;  %v2733_v37 = vadd.f32 %v5807_v63, %v2732_v55 }
 0x51a   : > { %v2879_v35 = vadd.f32 %v2878_v41, %v2710_v58 }
 0x51c   : > { %v4105_v18 = vpack.c.bf16 %v2879_v35, %v2877_v13 }
 0x51e   : > { %4157 = vst [vmem:[%s5530_s17 + $0xd0] sm:$0xff] %v4105_v18  }
 0x520   : > { %v2734_v46 = vpop.f32.mrf.mxu2 }
 0x521   : > { %v2881_v5 = vpop.f32.mrf.mxu3  ;;  %v2735_v9 = vadd.f32 %v5807_v63, %v2734_v46 }
 0x522   : > { %v2882_v31 = vadd.f32 %v2881_v5, %v2713_v28 }
 0x529   : > { %v2883_v57 = vpop.f32.mrf.mxu3 }
 0x52a   : > { %v2884_v51 = vadd.f32 %v2883_v57, %v2715_v32 }
 0x52c   : > { %v4110_v6 = vpack.c.bf16 %v2884_v51, %v2882_v31 }
 0x52e   : > { %4158 = vst [vmem:[%s5530_s17 + $0xd8] sm:$0xff] %v4110_v6  }
 0x531   : > { %v2886_v40 = vpop.f32.mrf.mxu3 }
 0x532   : > { %v2887_v59 = vadd.f32 %v2886_v40, %v2718_v19 }
 0x539   : > { %v2888_v54 = vpop.f32.mrf.mxu3 }
 0x53a   : > { %v2889_v30 = vadd.f32 %v2888_v54, %v2720_v27 }
 0x53c   : > { %v4115_v7 = vpack.c.bf16 %v2889_v30, %v2887_v59 }
 0x53e   : > { %4159 = vst [vmem:[%s5530_s17 + $0xe0] sm:$0xff] %v4115_v7  }
 0x541   : > { %v2891_v34 = vpop.f32.mrf.mxu3 }
 0x542   : > { %v2892_v22 = vadd.f32 %v2891_v34, %v2723_v61 }
 0x549   : > { %v2893_v20 = vpop.f32.mrf.mxu3 }
 0x54a   : > { %v2894_v17 = vadd.f32 %v2893_v20, %v2725_v50 }
 0x54c   : > { %v4120_v3 = vpack.c.bf16 %v2894_v17, %v2892_v22 }
 0x54e   : > { %4160 = vst [vmem:[%s5530_s17 + $0xe8] sm:$0xff] %v4120_v3  }
 0x551   : > { %v2896_v10 = vpop.f32.mrf.mxu3 }
 0x552   : > { %v2897_v11 = vadd.f32 %v2896_v10, %v2728_v52 }
 0x559   : > { %v2898_v0 = vpop.f32.mrf.mxu3 }
 0x55a   : > { %v2899_v4 = vadd.f32 %v2898_v0, %v2730_v45 }
 0x55c   : > { %v4125_v15 = vpack.c.bf16 %v2899_v4, %v2897_v11 }
 0x55e   : > { %4161 = vst [vmem:[%s5530_s17 + $0xf0] sm:$0xff] %v4125_v15  }
 0x561   : > { %v2901_v14 = vpop.f32.mrf.mxu3 }
 0x562   : > { %v2902_v12 = vadd.f32 %v2901_v14, %v2733_v37 }
 0x569   : > { %v2903_v48 = vpop.f32.mrf.mxu3 }
 0x56a   : > { %v2904_v56 = vadd.f32 %v2903_v48, %v2735_v9 }
 0x56c   : > { %v4130_v43 = vpack.c.bf16 %v2904_v56, %v2902_v12 }
 0x56e   : > { %4162 = vst [vmem:[%s5530_s17 + $0xf8] sm:$0xff] %v4130_v43  }
 0x56f   : > { %4401 = shalt.err (!%p4398_p10)
}
 0x570   : > { %s4459_s15 = smov 64   ;;  %s4460_s17 = smov 4  }
 0x571   : > { %4180 = dma.vmem_to_hbm [thread:$0]  (%p4574_p7), %s3048_s14, 4096, %s3050_s11, %s3035_s22, %s4459_s15, %s4459_s15, %s4460_s17  }
 0x572 PF: > { %s3064_s26 = sand.u32 1, %s4436_s18   ;;  %p6146_p12 = scmp.ge.s32.totalorder %s4448_s21, 2 }
 0x573   : > { %s3065_s27 = scalar_lea.sflag [#allocation4], %s3064_s26 }
 0x574   : > { %p4197_p13 = pnand %p6146_p12, %p4526_p6 }
 0x576   : > { %p4198_p0 = pneg %p4197_p13 }
 0x578   : > { %4431 = dma.done.wait (%p4198_p0), %s3065_s27, 4096  }
 0x579   : > { %4433 = vsyncadd (%p4198_p0), %s3065_s27, 4294963200  ;;  %p20_p3 = scmp.ge.s32.totalorder %s4560_s30, 4   ;;  %s6147_s18 = smov %s4440_s19 }
 0x57a   : > { %s6148_s19 = smov %s4444_s20  ;;  %s6149_s20 = smov %s4570_s9 }
 0x57b   : > { %s6150_s21 = smov %s4560_s30  ;;  %22 = sbr.rel (!%p20_p3) target bundleno = 9 (0x9), region = 97 }
 0x580   :  { %3071 = vsyncpa [#allocation3], 1 }
 0x581   :  { %3073 = vsyncpa [#allocation3 + $0x1], 1 }
 0x582   :  { %3074 = vsyncpa [#allocation6], 1 }
 0x583   :  { %3075 = vsyncpa [#allocation9], 1 }
 0x584   :  { %3076 = vsyncpa [#allocation4], 1 }
 0x585   :  { %3078 = vsyncpa [#allocation4 + $0x1], 1 }

</bundles_post_ra>
